<compile_context>
chip_gen: v7x
topology: tpu7x:2x2x1
jax: 0.10.0
libtpu: 0.0.40
codegen_flags: <defaults>
</compile_context>

<pallas_src>
import math

import jax
import jax.numpy as jnp
from jax.experimental import pallas as pl
from jax.experimental.pallas import tpu as pltpu

EMB = 32            # embeddings_size
BATCH = 16          # demo batch (kernel works for any batch; multiples of 8 are layout-friendly)
N_ITEMS = 5         # self.n
HID1 = 2048
HID2 = 1024
HID3 = 512
FEAT = 256          # per-item base feature width
HEAD_HID = 128
HEAD_PAD = 128      # padded lane width for the 5-wide output matmul
TK1 = 512           # block width over the 2048 hidden dim (grid axis)
NEG_BIG = -1e30


# ---------------------------------------------------------------------------
# Fused Pallas kernel: base MLP (split-K over the 2048 hidden dim) + head + softmax
# ---------------------------------------------------------------------------
def fused_kernel(x_ref, w1_ref, b1_ref, w2_ref, b2_ref, w3_ref, b3_ref,
                 w4_ref, b4_ref, w5_ref, b5_ref, w6p_ref, b6p_ref,
                 o_ref, acc2_ref):
    k = pl.program_id(0)

    @pl.when(k == 0)
    def _():
        acc2_ref[...] = jnp.zeros_like(acc2_ref)

    # Layer 1 (one 512-wide column block) + partial layer-2 accumulation.
    h1 = jnp.dot(x_ref[...], w1_ref[...], preferred_element_type=jnp.float32) + b1_ref[...]
    h1 = jnp.maximum(h1, 0.0).astype(jnp.bfloat16)
    acc2_ref[...] += jnp.dot(h1, w2_ref[...], preferred_element_type=jnp.float32)

    @pl.when(k == pl.num_programs(0) - 1)
    def _():
        nb = o_ref.shape[0]  # batch size (static)

        h2 = jnp.maximum(acc2_ref[...] + b2_ref[...], 0.0).astype(jnp.bfloat16)
        h3 = jnp.dot(h2, w3_ref[...], preferred_element_type=jnp.float32) + b3_ref[...]
        h3 = jnp.maximum(h3, 0.0).astype(jnp.bfloat16)
        h4 = jnp.dot(h3, w4_ref[...], preferred_element_type=jnp.float32) + b4_ref[...]
        h4 = jnp.maximum(h4, 0.0).astype(jnp.bfloat16)  # (5B, 256), item-major blocks of B rows

        # torch.concat(dim=1) @ w5  ==  sum_i base(item_i) @ w5[i*256:(i+1)*256, :]
        s = jnp.zeros((nb, HEAD_HID), jnp.float32)
        for i in range(N_ITEMS):
            s += jnp.dot(h4[i * nb:(i + 1) * nb, :],
                         w5_ref[i * FEAT:(i + 1) * FEAT, :],
                         preferred_element_type=jnp.float32)
        h5 = jax.nn.sigmoid(s + b5_ref[...]).astype(jnp.bfloat16)

        # Padded columns carry bias -1e30 (f32) => exp() == 0, so softmax over the padded
        # 128 lanes equals softmax over the first N_ITEMS columns.
        logits = jnp.dot(h5, w6p_ref[...], preferred_element_type=jnp.float32) + b6p_ref[...]
        m = jnp.max(logits, axis=1, keepdims=True)
        e = jnp.exp(logits - m)
        probs = e / jnp.sum(e, axis=1, keepdims=True)
        o_ref[...] = probs[:, :N_ITEMS].astype(o_ref.dtype)


# ---------------------------------------------------------------------------
# Wrapper
# ---------------------------------------------------------------------------
@jax.jit
def listnet_forward(item_1, item_2, item_3, item_4, item_5, params):
    (w1, b1, w2, b2, w3, b3, w4, b4, w5, b5, w6p, b6p) = params
    B = item_1.shape[0]
    rows = B * N_ITEMS

    # Item-major stacking: rows [i*B:(i+1)*B] hold item_i.  Inputs go through the MXU in
    # bf16 (cast once here).
    x = jnp.concatenate([item_1, item_2, item_3, item_4, item_5], axis=0).astype(jnp.bfloat16)

    grid = (HID1 // TK1,)
    return pl.pallas_call(
        fused_kernel,
        out_shape=jax.ShapeDtypeStruct((B, N_ITEMS), jnp.float32),
        grid_spec=pltpu.PrefetchScalarGridSpec(
            num_scalar_prefetch=0,
            grid=grid,
            in_specs=[
                pl.BlockSpec((rows, EMB), lambda k: (0, 0)),           # x (resident)
                pl.BlockSpec((EMB, TK1), lambda k: (0, k)),            # w1 (blocked over cols)
                pl.BlockSpec((1, TK1), lambda k: (0, k)),              # b1 (blocked)
                pl.BlockSpec((TK1, HID2), lambda k: (k, 0)),           # w2 (blocked over rows)
                pl.BlockSpec((1, HID2), lambda k: (0, 0)),             # b2
                pl.BlockSpec((HID2, HID3), lambda k: (0, 0)),          # w3
                pl.BlockSpec((1, HID3), lambda k: (0, 0)),             # b3
                pl.BlockSpec((HID3, FEAT), lambda k: (0, 0)),          # w4
                pl.BlockSpec((1, FEAT), lambda k: (0, 0)),             # b4
                pl.BlockSpec((FEAT * N_ITEMS, HEAD_HID), lambda k: (0, 0)),  # w5
                pl.BlockSpec((1, HEAD_HID), lambda k: (0, 0)),         # b5
                pl.BlockSpec((HEAD_HID, HEAD_PAD), lambda k: (0, 0)),  # w6 (padded)
                pl.BlockSpec((1, HEAD_PAD), lambda k: (0, 0)),         # b6 (padded, f32)
            ],
            out_specs=pl.BlockSpec((B, N_ITEMS), lambda k: (0, 0)),
            scratch_shapes=[pltpu.VMEM((rows, HID2), jnp.float32)],    # layer-2 accumulator
        ),
        compiler_params=pltpu.CompilerParams(
            dimension_semantics=("arbitrary",),
            vmem_limit_bytes=32 << 20,   # right-sized: fits v7x (64 MiB physical VMEM)
        ),
    )(x, w1, b1, w2, b2, w3, b3, w4, b4, w5, b5, w6p, b6p)


# ---------------------------------------------------------------------------
# Deterministic parameter init (PyTorch nn.Linear default: U(-1/sqrt(fan_in), +1/sqrt(fan_in)))
# Weights stored transposed (in_features, out_features); weights cast to bf16 once here.
# ---------------------------------------------------------------------------
def _linear_params(key, fan_in, fan_out):
    kw, kb = jax.random.split(key)
    bound = 1.0 / math.sqrt(fan_in)
    w = jax.random.uniform(kw, (fan_in, fan_out), jnp.float32, -bound, bound)
    b = jax.random.uniform(kb, (1, fan_out), jnp.float32, -bound, bound)
    return w, b


def make_params(key):
    keys = jax.random.split(key, 6)
    w1, b1 = _linear_params(keys[0], EMB, HID1)
    w2, b2 = _linear_params(keys[1], HID1, HID2)
    w3, b3 = _linear_params(keys[2], HID2, HID3)
    w4, b4 = _linear_params(keys[3], HID3, FEAT)
    w5, b5 = _linear_params(keys[4], FEAT * N_ITEMS, HEAD_HID)
    w6, b6 = _linear_params(keys[5], HEAD_HID, N_ITEMS)

    # bf16 weights (cast once, outside the kernel). Biases stay f32.
    w1, w2, w3, w4, w5 = (w.astype(jnp.bfloat16) for w in (w1, w2, w3, w4, w5))
    w6_bf = w6.astype(jnp.bfloat16)

    # Pad the 5-wide output projection to a full 128-lane tile; padded bias = -1e30
    # (kept in f32) so those columns drop out of the softmax exactly.
    w6p = jnp.zeros((HEAD_HID, HEAD_PAD), jnp.bfloat16).at[:, :N_ITEMS].set(w6_bf)
    b6p = jnp.full((1, HEAD_PAD), NEG_BIG, jnp.float32).at[:, :N_ITEMS].set(b6)

    params = (w1, b1, w2, b2, w3, b3, w4, b4, w5, b5, w6p, b6p)
    return params, (w6_bf, b6)


# ---------------------------------------------------------------------------
# Pure-JAX reference mirroring the PyTorch forward with the same precision policy
# (bf16 weights/activations, f32 accumulation/bias/softmax).
# ---------------------------------------------------------------------------
def reference_forward(items, params, unpadded_head):
    (w1, b1, w2, b2, w3, b3, w4, b4, w5, b5, _, _) = params
    w6, b6 = unpadded_head
    f32 = lambda a: a.astype(jnp.float32)
    rb = lambda a: a.astype(jnp.bfloat16).astype(jnp.float32)  # round to bf16

    def base(x):
        h = rb(x)
        h = rb(jax.nn.relu(h @ f32(w1) + b1))
        h = rb(jax.nn.relu(h @ f32(w2) + b2))
        h = rb(jax.nn.relu(h @ f32(w3) + b3))
        h = rb(jax.nn.relu(h @ f32(w4) + b4))
        return h

    delta = jnp.concatenate([base(it) for it in items], axis=1)  # (B, 1280)
    h = rb(jax.nn.sigmoid(delta @ f32(w5) + b5))
    logits = h @ f32(w6) + b6
    return jax.nn.softmax(logits, axis=1)


if __name__ == "__main__":
    key = jax.random.PRNGKey(0)
    pkey, dkey = jax.random.split(key)
    params, unpadded_head = make_params(pkey)

    item_keys = jax.random.split(dkey, N_ITEMS)
    items = [jax.random.normal(item_keys[i], (BATCH, EMB), jnp.float32) for i in range(N_ITEMS)]

    out = listnet_forward(*items, params)
    out = jax.block_until_ready(out)

    ref = reference_forward(items, params, unpadded_head)
    assert out.shape == (BATCH, N_ITEMS)
    assert jnp.allclose(jnp.sum(out, axis=1), 1.0, atol=1e-4)
    assert jnp.allclose(out, ref, atol=1e-3, rtol=1e-2), float(jnp.max(jnp.abs(out - ref)))

    print("KERNEL_OK")
</pallas_src>

<mosaic_0001>
module attributes {stable_mosaic.version = 11 : i64} {
  func.func @fused_kernel(%arg0: i32, %arg1: memref<80x32xbf16, #tpu.memory_space<vmem>>, %arg2: memref<32x512xbf16, #tpu.memory_space<vmem>>, %arg3: memref<1x512xf32, #tpu.memory_space<vmem>>, %arg4: memref<512x1024xbf16, #tpu.memory_space<vmem>>, %arg5: memref<1x1024xf32, #tpu.memory_space<vmem>>, %arg6: memref<1024x512xbf16, #tpu.memory_space<vmem>>, %arg7: memref<1x512xf32, #tpu.memory_space<vmem>>, %arg8: memref<512x256xbf16, #tpu.memory_space<vmem>>, %arg9: memref<1x256xf32, #tpu.memory_space<vmem>>, %arg10: memref<1280x128xbf16, #tpu.memory_space<vmem>>, %arg11: memref<1x128xf32, #tpu.memory_space<vmem>>, %arg12: memref<128x128xbf16, #tpu.memory_space<vmem>>, %arg13: memref<1x128xf32, #tpu.memory_space<vmem>>, %arg14: memref<16x5xf32, #tpu.memory_space<vmem>>, %arg15: memref<80x1024xf32, #tpu.memory_space<vmem>>) attributes {dimension_semantics = [#tpu.dimension_semantics<arbitrary>], iteration_bounds = array<i64: 4>, scalar_prefetch = 0 : i64, scratch_operands = 1 : i64, tpu.core_type = #tpu.core_type<tc>, window_params = [{pipeline_mode = #tpu.pipeline_mode<synchronous>, transform_indices = @transform_0, window_bounds = array<i64: 80, 32>}, {transform_indices = @transform_1, window_bounds = array<i64: 32, 512>}, {transform_indices = @transform_2, window_bounds = array<i64: 1, 512>}, {transform_indices = @transform_3, window_bounds = array<i64: 512, 1024>}, {pipeline_mode = #tpu.pipeline_mode<synchronous>, transform_indices = @transform_4, window_bounds = array<i64: 1, 1024>}, {pipeline_mode = #tpu.pipeline_mode<synchronous>, transform_indices = @transform_5, window_bounds = array<i64: 1024, 512>}, {pipeline_mode = #tpu.pipeline_mode<synchronous>, transform_indices = @transform_6, window_bounds = array<i64: 1, 512>}, {pipeline_mode = #tpu.pipeline_mode<synchronous>, transform_indices = @transform_7, window_bounds = array<i64: 512, 256>}, {pipeline_mode = #tpu.pipeline_mode<synchronous>, transform_indices = @transform_8, window_bounds = array<i64: 1, 256>}, {pipeline_mode = #tpu.pipeline_mode<synchronous>, transform_indices = @transform_9, window_bounds = array<i64: 1280, 128>}, {pipeline_mode = #tpu.pipeline_mode<synchronous>, transform_indices = @transform_10, window_bounds = array<i64: 1, 128>}, {pipeline_mode = #tpu.pipeline_mode<synchronous>, transform_indices = @transform_11, window_bounds = array<i64: 128, 128>}, {pipeline_mode = #tpu.pipeline_mode<synchronous>, transform_indices = @transform_12, window_bounds = array<i64: 1, 128>}, {pipeline_mode = #tpu.pipeline_mode<synchronous>, transform_indices = @transform_13, window_bounds = array<i64: 16, 5>}]} {
    %c0_i32 = arith.constant 0 : i32
    %0 = arith.cmpi eq, %arg0, %c0_i32 : i32
    %1 = arith.extui %0 : i1 to i32
    %c0_i32_0 = arith.constant 0 : i32
    %2 = arith.cmpi ne, %1, %c0_i32_0 : i32
    scf.if %2 {
      %cst_15 = arith.constant 0.000000e+00 : f32
      %20 = vector.broadcast %cst_15 : f32 to vector<80x1024xf32>
      %c0_16 = arith.constant 0 : index
      %c0_17 = arith.constant 0 : index
      %21 = vector.load %arg15[%c0_16, %c0_17] : memref<80x1024xf32, #tpu.memory_space<vmem>>, vector<80x1024xf32>
      tpu.vector_store %arg15[%c0_16, %c0_17], %20 {strides = array<i32>} : memref<80x1024xf32, #tpu.memory_space<vmem>>, vector<80x1024xf32>,
    } else {
    }
    %c0 = arith.constant 0 : index
    %c0_1 = arith.constant 0 : index
    %3 = vector.load %arg1[%c0, %c0_1] : memref<80x32xbf16, #tpu.memory_space<vmem>>, vector<80x32xbf16>
    %c0_2 = arith.constant 0 : index
    %c0_3 = arith.constant 0 : index
    %4 = vector.load %arg2[%c0_2, %c0_3] : memref<32x512xbf16, #tpu.memory_space<vmem>>, vector<32x512xbf16>
    %cst = arith.constant dense<0.000000e+00> : vector<80x512xf32>
    %5 = tpu.matmul %3, %4, %cst {dimension_numbers = #tpu.dot_dimension_numbers<[1], [0], [0], [1], [0, 0, 1, 1], [], []>} : vector<80x32xbf16>, vector<32x512xbf16>, vector<80x512xf32> -> vector<80x512xf32>
    %c0_4 = arith.constant 0 : index
    %c0_5 = arith.constant 0 : index
    %6 = vector.load %arg3[%c0_4, %c0_5] : memref<1x512xf32, #tpu.memory_space<vmem>>, vector<1x512xf32>
    %7 = vector.broadcast %6 : vector<1x512xf32> to vector<80x512xf32>
    %8 = arith.addf %5, %7 : vector<80x512xf32>
    %cst_6 = arith.constant 0.000000e+00 : f32
    %9 = vector.broadcast %cst_6 : f32 to vector<80x512xf32>
    %10 = arith.maximumf %8, %9 : vector<80x512xf32>
    %11 = arith.truncf %10 : vector<80x512xf32> to vector<80x512xbf16>
    %c0_7 = arith.constant 0 : index
    %c0_8 = arith.constant 0 : index
    %12 = vector.load %arg15[%c0_7, %c0_8] : memref<80x1024xf32, #tpu.memory_space<vmem>>, vector<80x1024xf32>
    %c0_9 = arith.constant 0 : index
    %c0_10 = arith.constant 0 : index
    %13 = vector.load %arg4[%c0_9, %c0_10] : memref<512x1024xbf16, #tpu.memory_space<vmem>>, vector<512x1024xbf16>
    %cst_11 = arith.constant dense<0.000000e+00> : vector<80x1024xf32>
    %14 = tpu.matmul %11, %13, %cst_11 {dimension_numbers = #tpu.dot_dimension_numbers<[1], [0], [0], [1], [0, 0, 1, 1], [], []>} : vector<80x512xbf16>, vector<512x1024xbf16>, vector<80x1024xf32> -> vector<80x1024xf32>
    %15 = arith.addf %12, %14 : vector<80x1024xf32>
    %c0_12 = arith.constant 0 : index
    %c0_13 = arith.constant 0 : index
    %16 = vector.load %arg15[%c0_12, %c0_13] : memref<80x1024xf32, #tpu.memory_space<vmem>>, vector<80x1024xf32>
    tpu.vector_store %arg15[%c0_12, %c0_13], %15 {strides = array<i32>} : memref<80x1024xf32, #tpu.memory_space<vmem>>, vector<80x1024xf32>,
    %c3_i32 = arith.constant 3 : i32
    %17 = arith.cmpi eq, %arg0, %c3_i32 : i32
    %18 = arith.extui %17 : i1 to i32
    %c0_i32_14 = arith.constant 0 : i32
    %19 = arith.cmpi ne, %18, %c0_i32_14 : i32
    scf.if %19 {
      %c0_15 = arith.constant 0 : index
      %c0_16 = arith.constant 0 : index
      %20 = vector.load %arg15[%c0_15, %c0_16] : memref<80x1024xf32, #tpu.memory_space<vmem>>, vector<80x1024xf32>
      %c0_17 = arith.constant 0 : index
      %c0_18 = arith.constant 0 : index
      %21 = vector.load %arg5[%c0_17, %c0_18] : memref<1x1024xf32, #tpu.memory_space<vmem>>, vector<1x1024xf32>
      %22 = vector.broadcast %21 : vector<1x1024xf32> to vector<80x1024xf32>
      %23 = arith.addf %20, %22 : vector<80x1024xf32>
      %cst_19 = arith.constant 0.000000e+00 : f32
      %24 = vector.broadcast %cst_19 : f32 to vector<80x1024xf32>
      %25 = arith.maximumf %23, %24 : vector<80x1024xf32>
      %26 = arith.truncf %25 : vector<80x1024xf32> to vector<80x1024xbf16>
      %c0_20 = arith.constant 0 : index
      %c0_21 = arith.constant 0 : index
      %27 = vector.load %arg6[%c0_20, %c0_21] : memref<1024x512xbf16, #tpu.memory_space<vmem>>, vector<1024x512xbf16>
      %cst_22 = arith.constant dense<0.000000e+00> : vector<80x512xf32>
      %28 = tpu.matmul %26, %27, %cst_22 {dimension_numbers = #tpu.dot_dimension_numbers<[1], [0], [0], [1], [0, 0, 1, 1], [], []>} : vector<80x1024xbf16>, vector<1024x512xbf16>, vector<80x512xf32> -> vector<80x512xf32>
      %c0_23 = arith.constant 0 : index
      %c0_24 = arith.constant 0 : index
      %29 = vector.load %arg7[%c0_23, %c0_24] : memref<1x512xf32, #tpu.memory_space<vmem>>, vector<1x512xf32>
      %30 = vector.broadcast %29 : vector<1x512xf32> to vector<80x512xf32>
      %31 = arith.addf %28, %30 : vector<80x512xf32>
      %cst_25 = arith.constant 0.000000e+00 : f32
      %32 = vector.broadcast %cst_25 : f32 to vector<80x512xf32>
      %33 = arith.maximumf %31, %32 : vector<80x512xf32>
      %34 = arith.truncf %33 : vector<80x512xf32> to vector<80x512xbf16>
      %c0_26 = arith.constant 0 : index
      %c0_27 = arith.constant 0 : index
      %35 = vector.load %arg8[%c0_26, %c0_27] : memref<512x256xbf16, #tpu.memory_space<vmem>>, vector<512x256xbf16>
      %cst_28 = arith.constant dense<0.000000e+00> : vector<80x256xf32>
      %36 = tpu.matmul %34, %35, %cst_28 {dimension_numbers = #tpu.dot_dimension_numbers<[1], [0], [0], [1], [0, 0, 1, 1], [], []>} : vector<80x512xbf16>, vector<512x256xbf16>, vector<80x256xf32> -> vector<80x256xf32>
      %c0_29 = arith.constant 0 : index
      %c0_30 = arith.constant 0 : index
      %37 = vector.load %arg9[%c0_29, %c0_30] : memref<1x256xf32, #tpu.memory_space<vmem>>, vector<1x256xf32>
      %38 = vector.broadcast %37 : vector<1x256xf32> to vector<80x256xf32>
      %39 = arith.addf %36, %38 : vector<80x256xf32>
      %cst_31 = arith.constant 0.000000e+00 : f32
      %40 = vector.broadcast %cst_31 : f32 to vector<80x256xf32>
      %41 = arith.maximumf %39, %40 : vector<80x256xf32>
      %42 = arith.truncf %41 : vector<80x256xf32> to vector<80x256xbf16>
      %cst_32 = arith.constant 0.000000e+00 : f32
      %43 = vector.broadcast %cst_32 : f32 to vector<16x128xf32>
      %44 = vector.extract_strided_slice %42 {offsets = [0, 0], sizes = [16, 256], strides = [1, 1]} : vector<80x256xbf16> to vector<16x256xbf16>
      %c0_33 = arith.constant 0 : index
      %c0_34 = arith.constant 0 : index
      %45 = vector.load %arg10[%c0_33, %c0_34] : memref<1280x128xbf16, #tpu.memory_space<vmem>>, vector<256x128xbf16>
      %cst_35 = arith.constant dense<0.000000e+00> : vector<16x128xf32>
      %46 = tpu.matmul %44, %45, %cst_35 {dimension_numbers = #tpu.dot_dimension_numbers<[1], [0], [0], [1], [0, 0, 1, 1], [], []>} : vector<16x256xbf16>, vector<256x128xbf16>, vector<16x128xf32> -> vector<16x128xf32>
      %47 = arith.addf %43, %46 : vector<16x128xf32>
      %48 = vector.extract_strided_slice %42 {offsets = [16, 0], sizes = [16, 256], strides = [1, 1]} : vector<80x256xbf16> to vector<16x256xbf16>
      %c256 = arith.constant 256 : index
      %c0_36 = arith.constant 0 : index
      %49 = vector.load %arg10[%c256, %c0_36] : memref<1280x128xbf16, #tpu.memory_space<vmem>>, vector<256x128xbf16>
      %cst_37 = arith.constant dense<0.000000e+00> : vector<16x128xf32>
      %50 = tpu.matmul %48, %49, %cst_37 {dimension_numbers = #tpu.dot_dimension_numbers<[1], [0], [0], [1], [0, 0, 1, 1], [], []>} : vector<16x256xbf16>, vector<256x128xbf16>, vector<16x128xf32> -> vector<16x128xf32>
      %51 = arith.addf %47, %50 : vector<16x128xf32>
      %52 = vector.extract_strided_slice %42 {offsets = [32, 0], sizes = [16, 256], strides = [1, 1]} : vector<80x256xbf16> to vector<16x256xbf16>
      %c512 = arith.constant 512 : index
      %c0_38 = arith.constant 0 : index
      %53 = vector.load %arg10[%c512, %c0_38] : memref<1280x128xbf16, #tpu.memory_space<vmem>>, vector<256x128xbf16>
      %cst_39 = arith.constant dense<0.000000e+00> : vector<16x128xf32>
      %54 = tpu.matmul %52, %53, %cst_39 {dimension_numbers = #tpu.dot_dimension_numbers<[1], [0], [0], [1], [0, 0, 1, 1], [], []>} : vector<16x256xbf16>, vector<256x128xbf16>, vector<16x128xf32> -> vector<16x128xf32>
      %55 = arith.addf %51, %54 : vector<16x128xf32>
      %56 = vector.extract_strided_slice %42 {offsets = [48, 0], sizes = [16, 256], strides = [1, 1]} : vector<80x256xbf16> to vector<16x256xbf16>
      %c768 = arith.constant 768 : index
      %c0_40 = arith.constant 0 : index
      %57 = vector.load %arg10[%c768, %c0_40] : memref<1280x128xbf16, #tpu.memory_space<vmem>>, vector<256x128xbf16>
      %cst_41 = arith.constant dense<0.000000e+00> : vector<16x128xf32>
      %58 = tpu.matmul %56, %57, %cst_41 {dimension_numbers = #tpu.dot_dimension_numbers<[1], [0], [0], [1], [0, 0, 1, 1], [], []>} : vector<16x256xbf16>, vector<256x128xbf16>, vector<16x128xf32> -> vector<16x128xf32>
      %59 = arith.addf %55, %58 : vector<16x128xf32>
      %60 = vector.extract_strided_slice %42 {offsets = [64, 0], sizes = [16, 256], strides = [1, 1]} : vector<80x256xbf16> to vector<16x256xbf16>
      %c1024 = arith.constant 1024 : index
      %c0_42 = arith.constant 0 : index
      %61 = vector.load %arg10[%c1024, %c0_42] : memref<1280x128xbf16, #tpu.memory_space<vmem>>, vector<256x128xbf16>
      %cst_43 = arith.constant dense<0.000000e+00> : vector<16x128xf32>
      %62 = tpu.matmul %60, %61, %cst_43 {dimension_numbers = #tpu.dot_dimension_numbers<[1], [0], [0], [1], [0, 0, 1, 1], [], []>} : vector<16x256xbf16>, vector<256x128xbf16>, vector<16x128xf32> -> vector<16x128xf32>
      %63 = arith.addf %59, %62 : vector<16x128xf32>
      %c0_44 = arith.constant 0 : index
      %c0_45 = arith.constant 0 : index
      %64 = vector.load %arg11[%c0_44, %c0_45] : memref<1x128xf32, #tpu.memory_space<vmem>>, vector<1x128xf32>
      %65 = vector.broadcast %64 : vector<1x128xf32> to vector<16x128xf32>
      %66 = arith.addf %63, %65 : vector<16x128xf32>
      %67 = arith.negf %66 : vector<16x128xf32>
      %68 = math.exp %67 : vector<16x128xf32>
      %cst_46 = arith.constant 1.000000e+00 : f32
      %69 = vector.broadcast %cst_46 : f32 to vector<16x128xf32>
      %70 = arith.addf %69, %68 : vector<16x128xf32>
      %71 = arith.divf %69, %70 : vector<16x128xf32>
      %72 = arith.truncf %71 : vector<16x128xf32> to vector<16x128xbf16>
      %c0_47 = arith.constant 0 : index
      %c0_48 = arith.constant 0 : index
      %73 = vector.load %arg12[%c0_47, %c0_48] : memref<128x128xbf16, #tpu.memory_space<vmem>>, vector<128x128xbf16>
      %cst_49 = arith.constant dense<0.000000e+00> : vector<16x128xf32>
      %74 = tpu.matmul %72, %73, %cst_49 {dimension_numbers = #tpu.dot_dimension_numbers<[1], [0], [0], [1], [0, 0, 1, 1], [], []>} : vector<16x128xbf16>, vector<128x128xbf16>, vector<16x128xf32> -> vector<16x128xf32>
      %c0_50 = arith.constant 0 : index
      %c0_51 = arith.constant 0 : index
      %75 = vector.load %arg13[%c0_50, %c0_51] : memref<1x128xf32, #tpu.memory_space<vmem>>, vector<1x128xf32>
      %76 = vector.broadcast %75 : vector<1x128xf32> to vector<16x128xf32>
      %77 = arith.addf %74, %76 : vector<16x128xf32>
      %cst_52 = arith.constant dense<0xFF800000> : vector<16xf32>
      %78 = vector.multi_reduction <maximumf>, %77, %cst_52 [1] : vector<16x128xf32> to vector<16xf32>
      %79 = vector.shape_cast %78 : vector<16xf32> to vector<16x1xf32>
      %80 = vector.broadcast %79 : vector<16x1xf32> to vector<16x128xf32>
      %81 = arith.subf %77, %80 : vector<16x128xf32>
      %82 = math.exp %81 : vector<16x128xf32>
      %cst_53 = arith.constant dense<0.000000e+00> : vector<16xf32>
      %83 = vector.multi_reduction <add>, %82, %cst_53 [1] : vector<16x128xf32> to vector<16xf32>
      %84 = vector.shape_cast %83 : vector<16xf32> to vector<16x1xf32>
      %85 = vector.broadcast %84 : vector<16x1xf32> to vector<16x128xf32>
      %86 = arith.divf %82, %85 : vector<16x128xf32>
      %87 = vector.extract_strided_slice %86 {offsets = [0, 0], sizes = [16, 5], strides = [1, 1]} : vector<16x128xf32> to vector<16x5xf32>
      %c0_54 = arith.constant 0 : index
      %c0_55 = arith.constant 0 : index
      %88 = vector.load %arg14[%c0_54, %c0_55] : memref<16x5xf32, #tpu.memory_space<vmem>>, vector<16x5xf32>
      tpu.vector_store %arg14[%c0_54, %c0_55], %87 {strides = array<i32>} : memref<16x5xf32, #tpu.memory_space<vmem>>, vector<16x5xf32>,
    } else {
    }
    return
  }
  func.func @transform_0(%arg0: i32) -> (i32, i32) {
    %c0_i32 = arith.constant 0 : i32
    %c0_i32_0 = arith.constant 0 : i32
    %c0_i32_1 = arith.constant 0 : i32
    return %c0_i32, %c0_i32_0 : i32, i32
  }
  func.func @transform_1(%arg0: i32) -> (i32, i32) {
    %c0_i32 = arith.constant 0 : i32
    %c0_i32_0 = arith.constant 0 : i32
    return %c0_i32, %arg0 : i32, i32
  }
  func.func @transform_2(%arg0: i32) -> (i32, i32) {
    %c0_i32 = arith.constant 0 : i32
    %c0_i32_0 = arith.constant 0 : i32
    return %c0_i32, %arg0 : i32, i32
  }
  func.func @transform_3(%arg0: i32) -> (i32, i32) {
    %c0_i32 = arith.constant 0 : i32
    %c0_i32_0 = arith.constant 0 : i32
    return %arg0, %c0_i32 : i32, i32
  }
  func.func @transform_4(%arg0: i32) -> (i32, i32) {
    %c0_i32 = arith.constant 0 : i32
    %c0_i32_0 = arith.constant 0 : i32
    %c0_i32_1 = arith.constant 0 : i32
    return %c0_i32, %c0_i32_0 : i32, i32
  }
  func.func @transform_5(%arg0: i32) -> (i32, i32) {
    %c0_i32 = arith.constant 0 : i32
    %c0_i32_0 = arith.constant 0 : i32
    %c0_i32_1 = arith.constant 0 : i32
    return %c0_i32, %c0_i32_0 : i32, i32
  }
  func.func @transform_6(%arg0: i32) -> (i32, i32) {
    %c0_i32 = arith.constant 0 : i32
    %c0_i32_0 = arith.constant 0 : i32
    %c0_i32_1 = arith.constant 0 : i32
    return %c0_i32, %c0_i32_0 : i32, i32
  }
  func.func @transform_7(%arg0: i32) -> (i32, i32) {
    %c0_i32 = arith.constant 0 : i32
    %c0_i32_0 = arith.constant 0 : i32
    %c0_i32_1 = arith.constant 0 : i32
    return %c0_i32, %c0_i32_0 : i32, i32
  }
  func.func @transform_8(%arg0: i32) -> (i32, i32) {
    %c0_i32 = arith.constant 0 : i32
    %c0_i32_0 = arith.constant 0 : i32
    %c0_i32_1 = arith.constant 0 : i32
    return %c0_i32, %c0_i32_0 : i32, i32
  }
  func.func @transform_9(%arg0: i32) -> (i32, i32) {
    %c0_i32 = arith.constant 0 : i32
    %c0_i32_0 = arith.constant 0 : i32
    %c0_i32_1 = arith.constant 0 : i32
    return %c0_i32, %c0_i32_0 : i32, i32
  }
  func.func @transform_10(%arg0: i32) -> (i32, i32) {
    %c0_i32 = arith.constant 0 : i32
    %c0_i32_0 = arith.constant 0 : i32
    %c0_i32_1 = arith.constant 0 : i32
    return %c0_i32, %c0_i32_0 : i32, i32
  }
  func.func @transform_11(%arg0: i32) -> (i32, i32) {
    %c0_i32 = arith.constant 0 : i32
    %c0_i32_0 = arith.constant 0 : i32
    %c0_i32_1 = arith.constant 0 : i32
    return %c0_i32, %c0_i32_0 : i32, i32
  }
  func.func @transform_12(%arg0: i32) -> (i32, i32) {
    %c0_i32 = arith.constant 0 : i32
    %c0_i32_0 = arith.constant 0 : i32
    %c0_i32_1 = arith.constant 0 : i32
    return %c0_i32, %c0_i32_0 : i32, i32
  }
  func.func @transform_13(%arg0: i32) -> (i32, i32) {
    %c0_i32 = arith.constant 0 : i32
    %c0_i32_0 = arith.constant 0 : i32
    %c0_i32_1 = arith.constant 0 : i32
    return %c0_i32, %c0_i32_0 : i32, i32
  }
}

</mosaic_0001>

<bundles_post_ra>
// kernel: listnet_forward.1
= control target key start
LH: loop header
LB: loop body
LE: loop exit
PB: predicated region body
PF: predicated region fallthrough
CT: control target
= control target key end

     0   :  { %s11743_s0 = inlined_call_operand.vmem [shape: bf16[80,32], index: 0, kind: input, shape index: {}]   ;;  %s11744_s1 = inlined_call_operand.hbm [shape: bf16[32,2048], index: 1, kind: input, shape index: {}]   ;;  %s11745_s2 = inlined_call_operand.hbm [shape: f32[1,2048], index: 2, kind: input, shape index: {}]   ;;  %s11746_s3 = inlined_call_operand.hbm [shape: bf16[2048,1024], index: 3, kind: input, shape index: {}]   ;;  %s11747_s4 = inlined_call_operand.hbm [shape: f32[1,1024], index: 4, kind: input, shape index: {}]   ;;  %s11748_s5 = inlined_call_operand.hbm [shape: bf16[1024,512], index: 5, kind: input, shape index: {}]   ;;  %s11749_s6 = inlined_call_operand.hbm [shape: f32[1,512], index: 6, kind: input, shape index: {}]   ;;  %s11750_s7 = inlined_call_operand.hbm [shape: bf16[512,256], index: 7, kind: input, shape index: {}]   ;;  %s11751_s8 = inlined_call_operand.hbm [shape: f32[1,256], index: 8, kind: input, shape index: {}]   ;;  %s11752_s9 = inlined_call_operand.hbm [shape: bf16[1280,128], index: 9, kind: input, shape index: {}]   ;;  %s11753_s10 = inlined_call_operand.hbm [shape: f32[1,128], index: 10, kind: input, shape index: {}]   ;;  %s11754_s11 = inlined_call_operand.hbm [shape: bf16[128,128], index: 11, kind: input, shape index: {}]   ;;  %s11755_s12 = inlined_call_operand.hbm [shape: f32[1,128], index: 12, kind: input, shape index: {}]   ;;  %s11756_s13 = inlined_call_operand.vmem [shape: f32[16,5], index: 13, kind: output, shape index: {}]  }
   0x1   :  { %11775 = sst [smem:[#allocation32_spill]] %s11743_s0 }
   0x2   :  { %11776 = sst [smem:[#allocation33_spill]] %s11745_s2 }
   0x3   :  { %11777 = sst [smem:[#allocation34_spill]] %s11746_s3 }
   0x4   :  { %11778 = sst [smem:[#allocation35_spill]] %s11747_s4 }
   0x5   :  { %11779 = sst [smem:[#allocation36_spill]] %s11749_s6 }
   0x6   :  { %11780 = sst [smem:[#allocation37_spill]] %s11751_s8 }
   0x7   :  { %11781 = sst [smem:[#allocation38_spill]] %s11753_s10 }
   0x8   :  { %11782 = sst [smem:[#allocation39_spill]] %s11756_s13 }
   0x9   :  { %18 = vsyncpa [#allocation4], 0 }
   0xa   :  { %20 = vsyncpa [#allocation4 + $0x1], 0 }
   0xb   :  { %21 = vsyncpa [#allocation6], 0 }
   0xc   :  { %23 = vsyncpa [#allocation6 + $0x1], 0 }
   0xd   :  { %24 = vsyncpa [#allocation9], 0 }
   0xe   :  { %25 = vsyncpa [#allocation12], 0 }
   0xf   :  { %26 = vsyncpa [#allocation15], 0 }
  0x10   :  { %27 = vsyncpa [#allocation18], 0 }
  0x11   :  { %28 = vsyncpa [#allocation21], 0  ;;  %s10297_s25 = smov 0   ;;  %s10299_s26 = smov 0  }
  0x12   :  { %s10301_s27 = smov 0   ;;  %s10303_s28 = smov 0  }
  0x13 LB: > { %11783 = sst [smem:[#allocation29_spill]] %s10196_s27  ;;  %s10202_s29 = smov [#allocation8]   ;;  %s10200_s28 = sphi %s10303_s28, %s11827_s28   ;;  %s10196_s27 = sphi %s10301_s27, %s11824_s27   ;;  %s10192_s26 = sphi %s10299_s26, %s11826_s26   ;;  %s10188_s25 = sphi %s10297_s25, %s11825_s25  }
  0x14   : > { %s364_s30 = sshll.u32 %s10202_s29, 4  ;;  %s10318_s14 = sadd.s32 4294967295, %s10200_s28   ;;  %s10324_s30 = int_to_ptr.vmem [resolvable:$true] %s364_s30 }
  0x15   : > { %p7893_p0 = scmp.ge.s32.totalorder %s10200_s28, 1  ;;  %p11761_p1 = scmp.eq.s32.totalorder %s10318_s14, 0 }
  0x16   : > { %p348_p2 = scmp.lt.s32.totalorder %s10200_s28, 5  ;;  %s10203_s16 = smov [#allocation11]  }
  0x17   : > { %s388_s17 = sshll.u32 %s10203_s16, 4  ;;  %s10204_s18 = smov [#allocation14]   ;;  %s10332_s17 = int_to_ptr.vmem [resolvable:$true] %s388_s17 }
  0x18   : > { %p10326_p4 = pnand %p7893_p0, %p348_p2  ;;  %s412_s19 = sshll.u32 %s10204_s18, 4  ;;  %s10340_s19 = int_to_ptr.vmem [resolvable:$true] %s412_s19 }
  0x19   : > { %s10205_s21 = smov [#allocation17]   ;;  %s11787_s4 = sld [smem:[#allocation35_spill]] }
  0x1a   : > { %s11784_s15 = scalar_select %p10326_p4, 1, 0 }
  0x1b   : > { %p9087_p5 = pneg %p10326_p4  ;;  %s10342_s22 = sshll.u32 %s10205_s21, 4  ;;  %s437_s22 = int_to_ptr.vmem [resolvable:$true] %s10342_s22 }
  0x1c   : > { %11785 = sst [smem:[#allocation30_spill]] %s11784_s15 }
  0x1d   : > { %p10336_p6 = pnand %p9087_p5, %p11761_p1 }
  0x1f   : > { %s11786_s20 = scalar_select %p10336_p6, 1, 0 }
  0x20   : > { %s9800_s29 = scalar_lea.hbm %s11787_s4, 128  ;;  %p10352_p8 = pneg %p10336_p6 }
  0x21   : > { %p9801_p7 = scmp.ne.s32.totalorder %s11787_s4, %s9800_s29  ;;  %p9807_p11 = scmp.lt.u32.totalorder %s9800_s29, %s11787_s4 }
  0x22   : > { %s11788_s18 = scalar_select %p10352_p8, 1, 0 }
  0x23   : > { %p9803_p9 = pnand %p10352_p8, %p9801_p7 }
  0x25   : > { %p9804_p10 = pneg %p9803_p9 }
  0x27   : > { %p9809_p12 = pnand %p9807_p11, %p9804_p10 }
  0x29   : > { %9812 = shalt.err (!%p9809_p12)
}
  0x2a   : > { %s9813_s13 = scalar_lea.vmem %s10324_s30, 128  ;;  %p9821_p5 = scmp.lt.s32.totalorder %s10324_s30, %s10324_s30 }
  0x2b   : > { %p9814_p13 = scmp.ne.s32.totalorder %s10324_s30, %s9813_s13  ;;  %p9822_p3 = scmp.lt.s32.totalorder %s9813_s13, %s9813_s13 }
  0x2d   : > { %p9816_p0 = pnand %p9814_p13, %p10352_p8  ;;  %p9823_p7 = por %p9822_p3, %p9821_p5 }
  0x2f   : > { %p9817_p2 = pneg %p9816_p0 }
  0x31   : > { %p9824_p9 = pnand %p9823_p7, %p9817_p2 }
  0x33   : > { %9827 = shalt.err (!%p9824_p9)
}
  0x34   : > { %9090 = dma.hbm_to_vmem [thread:$0]  (!%p10336_p6), %s11787_s4, 128, %s10324_s30, [#allocation9]  }
  0x35   : > { %s11789_s6 = sld [smem:[#allocation36_spill]] }
  0x3b   : > { %s9828_s16 = scalar_lea.hbm %s11789_s6, 64 }
  0x3c   : > { %p9829_p10 = scmp.ne.s32.totalorder %s11789_s6, %s9828_s16  ;;  %p9835_p12 = scmp.lt.u32.totalorder %s9828_s16, %s11789_s6 }
  0x3e   : > { %p9831_p3 = pnand %p9829_p10, %p10352_p8 }
  0x40   : > { %p9832_p11 = pneg %p9831_p3 }
  0x42   : > { %p9837_p13 = pnand %p9835_p12, %p9832_p11 }
  0x44   : > { %9840 = shalt.err (!%p9837_p13)
}
  0x45   : > { %s9841_s30 = scalar_lea.vmem %s10332_s17, 64  ;;  %p9849_p7 = scmp.lt.s32.totalorder %s10332_s17, %s10332_s17 }
  0x46   : > { %p9842_p0 = scmp.ne.s32.totalorder %s10332_s17, %s9841_s30  ;;  %p9850_p9 = scmp.lt.s32.totalorder %s9841_s30, %s9841_s30 }
  0x48   : > { %p9844_p2 = pnand %p9842_p0, %p10352_p8  ;;  %p9851_p10 = por %p9850_p9, %p9849_p7 }
  0x4a   : > { %p9845_p5 = pneg %p9844_p2 }
  0x4c   : > { %p9852_p3 = pnand %p9851_p10, %p9845_p5 }
  0x4e   : > { %9855 = shalt.err (!%p9852_p3)
}
  0x4f   : > { %9096 = dma.hbm_to_vmem [thread:$0]  (!%p10336_p6), %s11789_s6, 64, %s10332_s17, [#allocation12]  }
  0x50   : > { %s11790_s8 = sld [smem:[#allocation37_spill]] }
  0x56   : > { %s9856_s24 = scalar_lea.hbm %s11790_s8, 32 }
  0x57   : > { %p9857_p11 = scmp.ne.s32.totalorder %s11790_s8, %s9856_s24  ;;  %p9863_p0 = scmp.lt.u32.totalorder %s9856_s24, %s11790_s8 }
  0x59   : > { %p9859_p12 = pnand %p9857_p11, %p10352_p8 }
  0x5b   : > { %p9860_p13 = pneg %p9859_p12 }
  0x5d   : > { %p9865_p2 = pnand %p9863_p0, %p9860_p13 }
  0x5f   : > { %9868 = shalt.err (!%p9865_p2)
}
  0x60   : > { %s9869_s17 = scalar_lea.vmem %s10340_s19, 32  ;;  %p9877_p10 = scmp.lt.s32.totalorder %s10340_s19, %s10340_s19 }
  0x61   : > { %p9870_p5 = scmp.ne.s32.totalorder %s10340_s19, %s9869_s17  ;;  %p9878_p3 = scmp.lt.s32.totalorder %s9869_s17, %s9869_s17 }
  0x63   : > { %p9872_p7 = pnand %p9870_p5, %p10352_p8  ;;  %p9879_p11 = por %p9878_p3, %p9877_p10 }
  0x65   : > { %p9873_p9 = pneg %p9872_p7 }
  0x67   : > { %p9880_p12 = pnand %p9879_p11, %p9873_p9 }
  0x69   : > { %9883 = shalt.err (!%p9880_p12)
}
  0x6a   : > { %9102 = dma.hbm_to_vmem [thread:$0]  (!%p10336_p6), %s11790_s8, 32, %s10340_s19, [#allocation15]  }
  0x6b   : > { %s11791_s10 = sld [smem:[#allocation38_spill]] }
  0x71   : > { %s9884_s23 = scalar_lea.hbm %s11791_s10, 16 }
  0x72   : > { %p9885_p13 = scmp.ne.s32.totalorder %s11791_s10, %s9884_s23  ;;  %p9891_p5 = scmp.lt.u32.totalorder %s9884_s23, %s11791_s10 }
  0x74   : > { %p9887_p0 = pnand %p9885_p13, %p10352_p8 }
  0x76   : > { %p9888_p2 = pneg %p9887_p0 }
  0x78   : > { %p9893_p7 = pnand %p9891_p5, %p9888_p2 }
  0x7a   : > { %9896 = shalt.err (!%p9893_p7)
}
  0x7b   : > { %s9897_s13 = scalar_lea.vmem %s437_s22, 16  ;;  %s9904_s19 = scalar_lea.vmem %s437_s22, 32 }
  0x7c   : > { %p9898_p9 = scmp.ne.s32.totalorder %s437_s22, %s9897_s13  ;;  %p9905_p11 = scmp.lt.s32.totalorder %s437_s22, %s437_s22 }
  0x7d   : > { %p9906_p12 = scmp.lt.s32.totalorder %s9904_s19, %s9897_s13 }
  0x7e   : > { %p9900_p10 = pnand %p9898_p9, %p10352_p8 }
  0x7f   : > { %p9907_p1 = por %p9906_p12, %p9905_p11 }
  0x80   : > { %p9901_p3 = pneg %p9900_p10 }
  0x82   : > { %p9908_p4 = pnand %p9907_p1, %p9901_p3 }
  0x84   : > { %9911 = shalt.err (!%p9908_p4)
}
  0x85   : > { %9108 = dma.hbm_to_vmem [thread:$0]  (!%p10336_p6), %s11791_s10, 16, %s437_s22, [#allocation18]  }
  0x86   : > { %s10439_s3 = sadd.s32 1, %s10200_s28   ;;  %s62_s15 = sadd.s32 1, %s10196_s27 }
  0x87   : > { %s59_s0 = ssub.s32 %s10200_s28, %s10439_s3  ;;  %p69_p1 = scmp.ne.s32.totalorder %s10196_s27, %s10192_s26 }
  0x88   : > { %p60_p4 = scmp.eq.s32.totalorder %s59_s0, 0  ;;  %p70_p13 = scmp.eq.s32.totalorder %s10200_s28, 0 }
  0x89   : > { %p75_p0 = scmp.ne.s32.totalorder %s10192_s26, %s10188_s25  ;;  %p9134_p2 = scmp.lt.s32.totalorder %s10200_s28, 4 }
  0x8a   : > { %s10451_s23 = scalar_select %p60_p4, %s10196_s27, %s62_s15  }
  0x8b   : > { %p71_p5 = por %p70_p13, %p69_p1  ;;  %p11793_p7 = scmp.eq.s32.totalorder %s10318_s14, 0 }
  0x8c   : > { %11792 = sst [smem:[#allocation31_spill]] %s10451_s23  ;;  %s10460_s22 = sand.u32 1, %s10196_s27  }
  0x8d   : > { %p10455_p9 = por %p11793_p7, %p75_p0  ;;  %s492_s29 = sand.u32 1, %s10200_s28  }
  0x8e   : > { %p10464_p10 = pnand %p9134_p2, %p71_p5  ;;  %s7907_s25 = sshll.u32 %s10460_s22, 2 }
  0x8f   : > { %s11794_s24 = scalar_select %p10455_p9, 1, 0 }
  0x90   : > { %s11795_s21 = scalar_select %p10464_p10, 1, 0 }
  0x91   : > { %s8623_s13 = sshll.u32 %s10200_s28, 6  ;;  %s496_s19 = scalar_lea.vmem [#allocation5], %s7907_s25 }
  0x92   : > { %s504_s17 = sshll.u32 %s496_s19, 4  ;;  %s11796_s2 = sld [smem:[#allocation33_spill]]  ;;  %s10475_s17 = int_to_ptr.vmem [resolvable:$true] %s504_s17 }
  0x93   : > { %s10477_s16 = scalar_lea.sflag [#allocation6], %s492_s29  ;;  %p10483_p11 = pneg %p10464_p10 }
  0x95   : > { %s11797_s6 = scalar_select %p10483_p11, 1, 0 }
  0x98   : > { %s10473_s0 = scalar_lea.hbm %s11796_s2, %s8623_s13  ;;  %s9917_s19 = scalar_lea.hbm %s11796_s2, 256 }
  0x99   : > { %s9912_s4 = scalar_lea.hbm %s10473_s0, 64  ;;  %p9918_p4 = scmp.lt.u32.totalorder %s10473_s0, %s11796_s2 }
  0x9a   : > { %p9913_p3 = scmp.ne.s32.totalorder %s10473_s0, %s9912_s4  ;;  %p9919_p13 = scmp.lt.u32.totalorder %s9917_s19, %s9912_s4 }
  0x9b   : > { %p9921_p2 = scmp.lt.u32.totalorder %s9912_s4, %s10473_s0 }
  0x9c   : > { %p9915_p12 = pnand %p10483_p11, %p9913_p3  ;;  %p9920_p0 = por %p9919_p13, %p9918_p4 }
  0x9e   : > { %p9916_p1 = pneg %p9915_p12  ;;  %p9922_p5 = por %p9921_p2, %p9920_p0 }
  0xa0   : > { %p9923_p7 = pnand %p9922_p5, %p9916_p1 }
  0xa2   : > { %9926 = shalt.err (!%p9923_p7)
}
  0xa3   : > { %s9927_s29 = scalar_lea.vmem %s10475_s17, 64  ;;  %s10206_s25 = smov [#allocation5]  }
  0xa4   : > { %p9928_p3 = scmp.ne.s32.totalorder %s10475_s17, %s9927_s29  ;;  %s9932_s13 = sshll.u32 %s10206_s25, 4  ;;  %s9933_s13 = int_to_ptr.vmem [resolvable:$false] %s9932_s13 }
  0xa5   : > { %s9934_s30 = scalar_lea.vmem %s9933_s13, 128  ;;  %p9935_p6 = scmp.lt.s32.totalorder %s10475_s17, %s9933_s13 }
  0xa6   : > { %p9930_p12 = pnand %p9928_p3, %p10483_p11  ;;  %p9936_p8 = scmp.lt.s32.totalorder %s9934_s30, %s9927_s29 }
  0xa8   : > { %p9931_p9 = pneg %p9930_p12  ;;  %p9937_p4 = por %p9936_p8, %p9935_p6 }
  0xaa   : > { %p9938_p13 = pnand %p9937_p4, %p9931_p9 }
  0xac   : > { %9941 = shalt.err (!%p9938_p13)
}
  0xad   : > { %9121 = dma.hbm_to_vmem [thread:$0]  (!%p10464_p10), %s10473_s0, 64, %s10475_s17, %s10477_s16  }
  0xae   : > { %s10207_s19 = smov [#allocation10]   ;;  %s9942_s13 = scalar_lea.hbm %s11748_s5, 32768 }
  0xaf   : > { %s374_s15 = sshll.u32 %s10207_s19, 4  ;;  %p9943_p6 = scmp.ne.s32.totalorder %s11748_s5, %s9942_s13  ;;  %s375_s15 = int_to_ptr.vmem [resolvable:$true] %s374_s15 }
  0xb0   : > { %p11798_p8 = scmp.ne.s32.totalorder %s11788_s18, 0  ;;  %p9949_p0 = scmp.lt.u32.totalorder %s9942_s13, %s11748_s5 }
  0xb2   : > { %p9945_p9 = pnand %p9943_p6, %p11798_p8 }
  0xb4   : > { %p9946_p1 = pneg %p9945_p9 }
  0xb6   : > { %p9951_p2 = pnand %p9949_p0, %p9946_p1 }
  0xb8   : > { %9954 = shalt.err (!%p9951_p2)
}
  0xb9   : > { %s9955_s17 = scalar_lea.vmem %s375_s15, 32768  ;;  %p9963_p12 = scmp.lt.s32.totalorder %s375_s15, %s375_s15 }
  0xba   : > { %p9956_p5 = scmp.ne.s32.totalorder %s375_s15, %s9955_s17  ;;  %p9964_p4 = scmp.lt.s32.totalorder %s9955_s17, %s9955_s17 }
  0xbc   : > { %p9958_p7 = pnand %p9956_p5, %p11798_p8  ;;  %p9965_p13 = por %p9964_p4, %p9963_p12 }
  0xbe   : > { %p9959_p3 = pneg %p9958_p7 }
  0xc0   : > { %p9966_p10 = pnand %p9965_p13, %p9959_p3 }
  0xc2   : > { %9969 = shalt.err (!%p9966_p10)
}
  0xc3   : > { %s11773_s2 = smov 256   ;;  %s11774_s0 = smov 16  }
  0xc4   : > { %p11799_p6 = scmp.ne.s32.totalorder %s11786_s20, 0  ;;  %s10210_s19 = smov [#allocation13]  }
  0xc5   : > { %s398_s25 = sshll.u32 %s10210_s19, 4  ;;  %s9970_s30 = scalar_lea.hbm %s11750_s7, 8192  ;;  %s399_s25 = int_to_ptr.vmem [resolvable:$true] %s398_s25 }
  0xc6   : > { %9093 = dma.hbm_to_vmem [thread:$0]  (!%p11799_p6), %s11748_s5, 32768, %s375_s15, [#allocation9], %s11773_s2, %s11773_s2, %s11774_s0  }
  0xc7   : > { %p9971_p10 = scmp.ne.s32.totalorder %s11750_s7, %s9970_s30  ;;  %p9977_p0 = scmp.lt.u32.totalorder %s9970_s30, %s11750_s7 }
  0xc9   : > { %p9973_p9 = pnand %p9971_p10, %p11798_p8 }
  0xcb   : > { %p9974_p1 = pneg %p9973_p9 }
  0xcd   : > { %p9979_p2 = pnand %p9977_p0, %p9974_p1 }
  0xcf   : > { %9982 = shalt.err (!%p9979_p2)
}
  0xd0   : > { %s9983_s15 = scalar_lea.vmem %s399_s25, 8192  ;;  %p9991_p12 = scmp.lt.s32.totalorder %s399_s25, %s399_s25 }
  0xd1   : > { %p9984_p5 = scmp.ne.s32.totalorder %s399_s25, %s9983_s15  ;;  %p9992_p4 = scmp.lt.s32.totalorder %s9983_s15, %s9983_s15 }
  0xd3   : > { %p9986_p7 = pnand %p9984_p5, %p11798_p8  ;;  %p9993_p13 = por %p9992_p4, %p9991_p12 }
  0xd5   : > { %p9987_p3 = pneg %p9986_p7 }
  0xd7   : > { %p9994_p11 = pnand %p9993_p13, %p9987_p3 }
  0xd9   : > { %9997 = shalt.err (!%p9994_p11)
}
  0xda   : > { %s10211_s4 = smov 128   ;;  %s10212_s8 = smov 8  }
  0xdb   : > { %9099 = dma.hbm_to_vmem [thread:$0]  (!%p11799_p6), %s11750_s7, 8192, %s399_s25, [#allocation12], %s10211_s4, %s10211_s4, %s10212_s8  }
  0xdc   : > { %s10213_s10 = smov [#allocation16]   ;;  %s9998_s30 = scalar_lea.hbm %s11752_s9, 10240 }
  0xdd   : > { %s422_s19 = sshll.u32 %s10213_s10, 4  ;;  %p9999_p11 = scmp.ne.s32.totalorder %s11752_s9, %s9998_s30  ;;  %s423_s19 = int_to_ptr.vmem [resolvable:$true] %s422_s19 }
  0xde   : > { %p10005_p1 = scmp.lt.u32.totalorder %s9998_s30, %s11752_s9 }
  0xdf   : > { %p10001_p10 = pnand %p9999_p11, %p11798_p8 }
  0xe1   : > { %p10002_p9 = pneg %p10001_p10 }
  0xe3   : > { %p10007_p0 = pnand %p10005_p1, %p10002_p9 }
  0xe5   : > { %10010 = shalt.err (!%p10007_p0)
}
  0xe6   : > { %s10011_s25 = scalar_lea.vmem %s423_s19, 10240  ;;  %p10019_p3 = scmp.lt.s32.totalorder %s423_s19, %s423_s19 }
  0xe7   : > { %p10012_p2 = scmp.ne.s32.totalorder %s423_s19, %s10011_s25  ;;  %p10020_p12 = scmp.lt.s32.totalorder %s10011_s25, %s10011_s25 }
  0xe9   : > { %p10014_p5 = pnand %p10012_p2, %p11798_p8  ;;  %p10021_p4 = por %p10020_p12, %p10019_p3 }
  0xeb   : > { %p10015_p7 = pneg %p10014_p5 }
  0xed   : > { %p10022_p13 = pnand %p10021_p4, %p10015_p7 }
  0xef   : > { %10025 = shalt.err (!%p10022_p13)
}
  0xf0   : > { %s10214_s4 = smov 64   ;;  %s10215_s8 = smov 4  }
  0xf1   : > { %9105 = dma.hbm_to_vmem [thread:$0]  (!%p11799_p6), %s11752_s9, 10240, %s423_s19, [#allocation15], %s10214_s4, %s10214_s4, %s10215_s8  }
  0xf2   : > { %s10216_s27 = smov [#allocation19]   ;;  %s10217_s10 = smov [#allocation20]  }
  0xf3   : > { %s446_s23 = sshll.u32 %s10216_s27, 4  ;;  %s460_s13 = sshll.u32 %s10217_s10, 4  ;;  %s447_s23 = int_to_ptr.vmem [resolvable:$true] %s446_s23  ;;  %s10565_s13 = int_to_ptr.vmem [resolvable:$true] %s460_s13 }
  0xf4   : > { %s10026_s17 = scalar_lea.hbm %s11754_s11, 1024 }
  0xf5   : > { %p10027_p11 = scmp.ne.s32.totalorder %s11754_s11, %s10026_s17  ;;  %p10033_p1 = scmp.lt.u32.totalorder %s10026_s17, %s11754_s11 }
  0xf7   : > { %p10029_p10 = pnand %p10027_p11, %p11798_p8 }
  0xf9   : > { %p10030_p9 = pneg %p10029_p10 }
  0xfb   : > { %p10035_p0 = pnand %p10033_p1, %p10030_p9 }
  0xfd   : > { %10038 = shalt.err (!%p10035_p0)
}
  0xfe   : > { %s10039_s0 = scalar_lea.vmem %s447_s23, 1024  ;;  %p10047_p3 = scmp.lt.s32.totalorder %s447_s23, %s447_s23 }
  0xff   : > { %p10040_p2 = scmp.ne.s32.totalorder %s447_s23, %s10039_s0  ;;  %p10048_p12 = scmp.lt.s32.totalorder %s10039_s0, %s10039_s0 }
 0x101   : > { %p10042_p5 = pnand %p10040_p2, %p11798_p8  ;;  %p10049_p4 = por %p10048_p12, %p10047_p3 }
 0x103   : > { %p10043_p7 = pneg %p10042_p5 }
 0x105   : > { %p10050_p13 = pnand %p10049_p4, %p10043_p7 }
 0x107   : > { %10053 = shalt.err (!%p10050_p13)
}
 0x108   : > { %9111 = dma.hbm_to_vmem [thread:$0]  (!%p11799_p6), %s11754_s11, 1024, %s447_s23, [#allocation18], %s10214_s4, %s10214_s4, %s10215_s8  }
 0x109   : > { %s10054_s17 = scalar_lea.hbm %s11755_s12, 16 }
 0x10a   : > { %p10055_p11 = scmp.ne.s32.totalorder %s11755_s12, %s10054_s17  ;;  %p10061_p1 = scmp.lt.u32.totalorder %s10054_s17, %s11755_s12 }
 0x10c   : > { %p10057_p10 = pnand %p10055_p11, %p11798_p8 }
 0x10e   : > { %p10058_p9 = pneg %p10057_p10 }
 0x110   : > { %p10063_p0 = pnand %p10061_p1, %p10058_p9 }
 0x112   : > { %10066 = shalt.err (!%p10063_p0)
}
 0x113   : > { %s10067_s4 = scalar_lea.vmem %s10565_s13, 16  ;;  %s10074_s8 = scalar_lea.vmem %s10565_s13, 32 }
 0x114   : > { %p10068_p2 = scmp.ne.s32.totalorder %s10565_s13, %s10067_s4  ;;  %p10075_p3 = scmp.lt.s32.totalorder %s10565_s13, %s10565_s13 }
 0x115   : > { %p10076_p12 = scmp.lt.s32.totalorder %s10074_s8, %s10067_s4 }
 0x116   : > { %p10070_p5 = pnand %p10068_p2, %p11798_p8 }
 0x117   : > { %p10077_p4 = por %p10076_p12, %p10075_p3 }
 0x118   : > { %p10071_p7 = pneg %p10070_p5 }
 0x11a   : > { %p10078_p13 = pnand %p10077_p4, %p10071_p7 }
 0x11c   : > { %10081 = shalt.err (!%p10078_p13)
}
 0x11d   : > { %9114 = dma.hbm_to_vmem [thread:$0]  (!%p11799_p6), %s11755_s12, 16, %s10565_s13, [#allocation21]  }
 0x11e   : > { %s8622_s18 = sshll.u32 %s10200_s28, 8  ;;  %s11800_s27 = sshll.u32 %s10460_s22, 6 }
 0x11f   : > { %s475_s10 = scalar_lea.vmem [#allocation3], %s11800_s27  ;;  %s10615_s15 = scalar_lea.hbm %s11744_s1, %s8622_s18 }
 0x120   : > { %s482_s29 = sshll.u32 %s475_s10, 4  ;;  %s472_s20 = scalar_lea.sflag [#allocation4], %s10460_s22  ;;  %s10617_s29 = int_to_ptr.vmem [resolvable:$true] %s482_s29 }
 0x121   : > { %s10082_s25 = scalar_lea.hbm %s10615_s15, 1024  ;;  %p11801_p11 = scmp.ne.s32.totalorder %s11797_s6, 0 }
 0x122   : > { %p10083_p8 = scmp.ne.s32.totalorder %s10615_s15, %s10082_s25  ;;  %s10087_s19 = scalar_lea.hbm %s11744_s1, 4096 }
 0x123   : > { %p10088_p9 = scmp.lt.u32.totalorder %s10615_s15, %s11744_s1  ;;  %p10089_p1 = scmp.lt.u32.totalorder %s10087_s19, %s10082_s25 }
 0x124   : > { %p10085_p6 = pnand %p10083_p8, %p11801_p11  ;;  %p10091_p2 = scmp.lt.u32.totalorder %s10082_s25, %s10615_s15 }
 0x125   : > { %p10090_p0 = por %p10089_p1, %p10088_p9 }
 0x126   : > { %p10086_p10 = pneg %p10085_p6 }
 0x127   : > { %p10092_p5 = por %p10091_p2, %p10090_p0 }
 0x129   : > { %p10093_p7 = pnand %p10092_p5, %p10086_p10 }
 0x12b   : > { %10096 = shalt.err (!%p10093_p7)
}
 0x12c   : > { %s10097_s23 = scalar_lea.vmem %s10617_s29, 1024  ;;  %s10218_s0 = smov [#allocation3]  }
 0x12d   : > { %p10098_p3 = scmp.ne.s32.totalorder %s10617_s29, %s10097_s23  ;;  %s10102_s18 = sshll.u32 %s10218_s0, 4  ;;  %s10103_s18 = int_to_ptr.vmem [resolvable:$false] %s10102_s18 }
 0x12e   : > { %s10104_s27 = scalar_lea.vmem %s10103_s18, 2048  ;;  %p10105_p13 = scmp.lt.s32.totalorder %s10617_s29, %s10103_s18 }
 0x12f   : > { %p10100_p12 = pnand %p10098_p3, %p11801_p11  ;;  %p10106_p8 = scmp.lt.s32.totalorder %s10104_s27, %s10097_s23 }
 0x131   : > { %p10101_p4 = pneg %p10100_p12  ;;  %p10107_p6 = por %p10106_p8, %p10105_p13 }
 0x133   : > { %p10108_p9 = pnand %p10107_p6, %p10101_p4 }
 0x135   : > { %10111 = shalt.err (!%p10108_p9)
}
 0x136   : > { %s10219_s10 = smov 1024   ;;  %p11802_p10 = scmp.ne.s32.totalorder %s11795_s21, 0 }
 0x137   : > { %s11803_s30 = smov 16   ;;  %s11804_s17 = smov 256  }
 0x138   : > { %9118 = dma.hbm_to_vmem [thread:$0]  (!%p11802_p10), %s10615_s15, 1024, %s10617_s29, %s472_s20, %s10219_s10, %s11804_s17, %s11803_s30  }
 0x139   : > { %s8625_s25 = sshll.u32 %s10200_s28, 15  ;;  %s11805_s13 = sshll.u32 %s10460_s22, 11 }
 0x13a   : > { %s515_s2 = scalar_lea.vmem [#allocation7], %s11805_s13  ;;  %s11806_s23 = sld [smem:[#allocation34_spill]] }
 0x13b   : > { %s523_s19 = sshll.u32 %s515_s2, 4  ;;  %s10653_s19 = int_to_ptr.vmem [resolvable:$true] %s523_s19 }
 0x140   : > { %s10651_s0 = scalar_lea.hbm %s11806_s23, %s8625_s25  ;;  %s10117_s29 = scalar_lea.hbm %s11806_s23, 131072 }
 0x141   : > { %s10112_s18 = scalar_lea.hbm %s10651_s0, 32768  ;;  %p10118_p5 = scmp.lt.u32.totalorder %s10651_s0, %s11806_s23 }
 0x142   : > { %p10113_p1 = scmp.ne.s32.totalorder %s10651_s0, %s10112_s18  ;;  %p10119_p7 = scmp.lt.u32.totalorder %s10117_s29, %s10112_s18 }
 0x143   : > { %p10121_p12 = scmp.lt.u32.totalorder %s10112_s18, %s10651_s0 }
 0x144   : > { %p10115_p0 = pnand %p10113_p1, %p11801_p11  ;;  %p10120_p3 = por %p10119_p7, %p10118_p5 }
 0x146   : > { %p10116_p2 = pneg %p10115_p0  ;;  %p10122_p4 = por %p10121_p12, %p10120_p3 }
 0x148   : > { %p10123_p13 = pnand %p10122_p4, %p10116_p2 }
 0x14a   : > { %10126 = shalt.err (!%p10123_p13)
}
 0x14b   : > { %s10127_s27 = scalar_lea.vmem %s10653_s19, 32768  ;;  %s10220_s10 = smov [#allocation7]  }
 0x14c   : > { %p10128_p8 = scmp.ne.s32.totalorder %s10653_s19, %s10127_s27  ;;  %s10132_s30 = sshll.u32 %s10220_s10, 4  ;;  %s10133_s30 = int_to_ptr.vmem [resolvable:$false] %s10132_s30 }
 0x14d   : > { %s10134_s17 = scalar_lea.vmem %s10133_s30, 65536  ;;  %p10135_p1 = scmp.lt.s32.totalorder %s10653_s19, %s10133_s30 }
 0x14e   : > { %p10130_p6 = pnand %p10128_p8, %p11801_p11  ;;  %p10136_p0 = scmp.lt.s32.totalorder %s10134_s17, %s10127_s27 }
 0x150   : > { %p10131_p9 = pneg %p10130_p6  ;;  %p10137_p5 = por %p10136_p0, %p10135_p1 }
 0x152   : > { %p10138_p7 = pnand %p10137_p5, %p10131_p9 }
 0x154   : > { %10141 = shalt.err (!%p10138_p7)
}
 0x155   : > { %s10221_s25 = smov 512   ;;  %s10222_s13 = smov 32  }
 0x156   : > { %9124 = dma.hbm_to_vmem [thread:$0]  (!%p11802_p10), %s10651_s0, 32768, %s10653_s19, %s10477_s16, %s10221_s25, %s10221_s25, %s10222_s13  }
 0x157   : > { %s11807_s6 = sld [smem:[#allocation30_spill]] }
 0x15d   : > { %p11808_p11 = scmp.ne.s32.totalorder %s11807_s6, 0 }
 0x15e   : > { %s537_s2 = sand.u32 (!%p11808_p11), 1, %s10192_s26   ;;  %p11809_p2 = scmp.ne.s32.totalorder (!%p11808_p11), %s11794_s24, 0 }
 0x15f   : > { %535 = sbr.rel (%p11808_p11) target bundleno = 2727 (0xaa7), region = 72  ;;  %s7915_s4 = sshll.u32 (!%p11808_p11), %s537_s2, 6 }
 0x160   : > { %s538_s8 = scalar_lea.sflag (!%p11808_p11), [#allocation4], %s537_s2  ;;  %s10680_s18 = scalar_lea.vmem (!%p11808_p11), [#allocation3], %s7915_s4 }
 0x166   : > { %10159 = dma.done.wait (%p11809_p2), %s538_s8, 1024  }
 0x167   : > { %10161 = vsyncadd (%p11809_p2), %s538_s8, 4294966272  ;;  %s546_s28 = sand.u32 1, %s10318_s14   ;;  %s7916_s21 = sshll.u32 %s537_s2, 2 }
 0x168   : > { %s547_s16 = scalar_lea.sflag [#allocation6], %s546_s28  ;;  %s10687_s19 = scalar_lea.vmem [#allocation5], %s7916_s21 }
 0x169   : > { %10163 = dma.done.wait (%p11809_p2), %s547_s16, 32832  }
 0x16a   : > { %10165 = vsyncadd (%p11809_p2), %s547_s16, 4294934464  ;;  %s7917_s0 = sshll.u32 %s537_s2, 11  ;;  %p11810_p10 = scmp.eq.s32.totalorder %s10318_s14, 0 }
 0x16b   : > { %s10693_s22 = scalar_lea.vmem [#allocation7], %s7917_s0 }
 0x16c   : > { %10167 = dma.done.wait (%p11810_p10), [#allocation9], 32896   ;;  %p11811_p3 = pmov %p11810_p10 }
 0x16e   : > { %10169 = vsyncadd (%p11811_p3), [#allocation9], 4294934400  ;;  %p11812_p12 = pmov %p11811_p3 }
 0x16f   : > { %p11813_p4 = pmov %p11811_p3 }
 0x170   : > { %10171 = dma.done.wait (%p11812_p12), [#allocation12], 8256  }
 0x171   : > { %10173 = vsyncadd (%p11813_p4), [#allocation12], 4294959040  ;;  %p11814_p13 = pmov %p11811_p3 }
 0x172   : > { %p11815_p8 = pmov %p11811_p3 }
 0x173   : > { %10175 = dma.done.wait (%p11814_p13), [#allocation15], 10272  }
 0x174   : > { %10177 = vsyncadd (%p11815_p8), [#allocation15], 4294957024  ;;  %p11816_p6 = pmov %p11811_p3 }
 0x175   : > { %p11817_p9 = pmov %p11811_p3 }
 0x176   : > { %10179 = dma.done.wait (%p11816_p6), [#allocation18], 1040  }
 0x177   : > { %10181 = vsyncadd (%p11817_p9), [#allocation18], 4294966256  ;;  %p11818_p1 = pmov %p11811_p3 }
 0x179   : > { %10183 = dma.done.wait (%p11818_p1), [#allocation21], 16   ;;  %p11819_p0 = pmov %p11818_p1 }
 0x17a   : > { %p11820_p5 = scmp.ne.s32.totalorder %s10318_s14, 0 }
 0x17b   : > { %10185 = vsyncadd (%p11819_p0), [#allocation21], 4294967280  ;;  %v10223_v0 = vmov (!%p11820_p5), 0.0  }
 0x17c   : > { %650 = sbr.rel (%p11820_p5) target bundleno = 420 (0x1a4), region = 124  ;;  %651 = vst [vmem:[#allocation2] sm:$0xff] (!%p11820_p5), %v10223_v0  ;;  %652 = vst [vmem:[#allocation2 + $0x8] sm:$0xff] (!%p11820_p5), %v10223_v0 }
 0x17d   : > { %653 = vst [vmem:[#allocation2 + $0x10] sm:$0xff] (!%p11820_p5), %v10223_v0  ;;  %654 = vst [vmem:[#allocation2 + $0x18] sm:$0xff] (!%p11820_p5), %v10223_v0 }
 0x17e   : > { %655 = vst [vmem:[#allocation2 + $0x20] sm:$0xff] (!%p11820_p5), %v10223_v0  ;;  %656 = vst [vmem:[#allocation2 + $0x28] sm:$0xff] (!%p11820_p5), %v10223_v0 }
 0x17f   : > { %657 = vst [vmem:[#allocation2 + $0x30] sm:$0xff] (!%p11820_p5), %v10223_v0  ;;  %658 = vst [vmem:[#allocation2 + $0x38] sm:$0xff] (!%p11820_p5), %v10223_v0 }
 0x180   : > { %659 = vst [vmem:[#allocation2 + $0x40] sm:$0xff] (!%p11820_p5), %v10223_v0  ;;  %660 = vst [vmem:[#allocation2 + $0x48] sm:$0xff] (!%p11820_p5), %v10223_v0 }
 0x181   : > { %661 = vst [vmem:[#allocation2 + $0x50] sm:$0xff] (!%p11820_p5), %v10223_v0  ;;  %662 = vst [vmem:[#allocation2 + $0x58] sm:$0xff] (!%p11820_p5), %v10223_v0 }
 0x182   : > { %663 = vst [vmem:[#allocation2 + $0x60] sm:$0xff] (!%p11820_p5), %v10223_v0  ;;  %664 = vst [vmem:[#allocation2 + $0x68] sm:$0xff] (!%p11820_p5), %v10223_v0 }
 0x183   : > { %665 = vst [vmem:[#allocation2 + $0x70] sm:$0xff] %v10223_v0  ;;  %666 = vst [vmem:[#allocation2 + $0x78] sm:$0xff] %v10223_v0 }
 0x184   : > { %667 = vst [vmem:[#allocation2 + $0x80] sm:$0xff] %v10223_v0  ;;  %668 = vst [vmem:[#allocation2 + $0x88] sm:$0xff] %v10223_v0 }
 0x185   : > { %669 = vst [vmem:[#allocation2 + $0x90] sm:$0xff] %v10223_v0  ;;  %670 = vst [vmem:[#allocation2 + $0x98] sm:$0xff] %v10223_v0 }
 0x186   : > { %671 = vst [vmem:[#allocation2 + $0xa0] sm:$0xff] %v10223_v0  ;;  %672 = vst [vmem:[#allocation2 + $0xa8] sm:$0xff] %v10223_v0 }
 0x187   : > { %673 = vst [vmem:[#allocation2 + $0xb0] sm:$0xff] %v10223_v0  ;;  %674 = vst [vmem:[#allocation2 + $0xb8] sm:$0xff] %v10223_v0 }
 0x188   : > { %675 = vst [vmem:[#allocation2 + $0xc0] sm:$0xff] %v10223_v0  ;;  %676 = vst [vmem:[#allocation2 + $0xc8] sm:$0xff] %v10223_v0 }
 0x189   : > { %677 = vst [vmem:[#allocation2 + $0xd0] sm:$0xff] %v10223_v0  ;;  %678 = vst [vmem:[#allocation2 + $0xd8] sm:$0xff] %v10223_v0 }
 0x18a   : > { %679 = vst [vmem:[#allocation2 + $0xe0] sm:$0xff] %v10223_v0  ;;  %680 = vst [vmem:[#allocation2 + $0xe8] sm:$0xff] %v10223_v0 }
 0x18b   : > { %681 = vst [vmem:[#allocation2 + $0xf0] sm:$0xff] %v10223_v0  ;;  %682 = vst [vmem:[#allocation2 + $0xf8] sm:$0xff] %v10223_v0 }
 0x18c   : > { %683 = vst [vmem:[#allocation2 + $0x100] sm:$0xff] %v10223_v0  ;;  %684 = vst [vmem:[#allocation2 + $0x108] sm:$0xff] %v10223_v0 }
 0x18d   : > { %685 = vst [vmem:[#allocation2 + $0x110] sm:$0xff] %v10223_v0  ;;  %686 = vst [vmem:[#allocation2 + $0x118] sm:$0xff] %v10223_v0 }
 0x18e   : > { %687 = vst [vmem:[#allocation2 + $0x120] sm:$0xff] %v10223_v0  ;;  %688 = vst [vmem:[#allocation2 + $0x128] sm:$0xff] %v10223_v0 }
 0x18f   : > { %689 = vst [vmem:[#allocation2 + $0x130] sm:$0xff] %v10223_v0  ;;  %690 = vst [vmem:[#allocation2 + $0x138] sm:$0xff] %v10223_v0 }
 0x190   : > { %691 = vst [vmem:[#allocation2 + $0x140] sm:$0xff] %v10223_v0  ;;  %692 = vst [vmem:[#allocation2 + $0x148] sm:$0xff] %v10223_v0 }
 0x191   : > { %693 = vst [vmem:[#allocation2 + $0x150] sm:$0xff] %v10223_v0  ;;  %694 = vst [vmem:[#allocation2 + $0x158] sm:$0xff] %v10223_v0 }
 0x192   : > { %695 = vst [vmem:[#allocation2 + $0x160] sm:$0xff] %v10223_v0  ;;  %696 = vst [vmem:[#allocation2 + $0x168] sm:$0xff] %v10223_v0 }
 0x193   : > { %697 = vst [vmem:[#allocation2 + $0x170] sm:$0xff] %v10223_v0  ;;  %698 = vst [vmem:[#allocation2 + $0x178] sm:$0xff] %v10223_v0 }
 0x194   : > { %699 = vst [vmem:[#allocation2 + $0x180] sm:$0xff] %v10223_v0  ;;  %700 = vst [vmem:[#allocation2 + $0x188] sm:$0xff] %v10223_v0 }
 0x195   : > { %701 = vst [vmem:[#allocation2 + $0x190] sm:$0xff] %v10223_v0  ;;  %702 = vst [vmem:[#allocation2 + $0x198] sm:$0xff] %v10223_v0 }
 0x196   : > { %703 = vst [vmem:[#allocation2 + $0x1a0] sm:$0xff] %v10223_v0  ;;  %704 = vst [vmem:[#allocation2 + $0x1a8] sm:$0xff] %v10223_v0 }
 0x197   : > { %705 = vst [vmem:[#allocation2 + $0x1b0] sm:$0xff] %v10223_v0  ;;  %706 = vst [vmem:[#allocation2 + $0x1b8] sm:$0xff] %v10223_v0 }
 0x198   : > { %707 = vst [vmem:[#allocation2 + $0x1c0] sm:$0xff] %v10223_v0  ;;  %708 = vst [vmem:[#allocation2 + $0x1c8] sm:$0xff] %v10223_v0 }
 0x199   : > { %709 = vst [vmem:[#allocation2 + $0x1d0] sm:$0xff] %v10223_v0  ;;  %710 = vst [vmem:[#allocation2 + $0x1d8] sm:$0xff] %v10223_v0 }
 0x19a   : > { %711 = vst [vmem:[#allocation2 + $0x1e0] sm:$0xff] %v10223_v0  ;;  %712 = vst [vmem:[#allocation2 + $0x1e8] sm:$0xff] %v10223_v0 }
 0x19b   : > { %713 = vst [vmem:[#allocation2 + $0x1f0] sm:$0xff] %v10223_v0  ;;  %714 = vst [vmem:[#allocation2 + $0x1f8] sm:$0xff] %v10223_v0 }
 0x19c   : > { %715 = vst [vmem:[#allocation2 + $0x200] sm:$0xff] %v10223_v0  ;;  %716 = vst [vmem:[#allocation2 + $0x208] sm:$0xff] %v10223_v0 }
 0x19d   : > { %717 = vst [vmem:[#allocation2 + $0x210] sm:$0xff] %v10223_v0  ;;  %718 = vst [vmem:[#allocation2 + $0x218] sm:$0xff] %v10223_v0 }
 0x19e   : > { %719 = vst [vmem:[#allocation2 + $0x220] sm:$0xff] %v10223_v0  ;;  %720 = vst [vmem:[#allocation2 + $0x228] sm:$0xff] %v10223_v0 }
 0x19f   : > { %721 = vst [vmem:[#allocation2 + $0x230] sm:$0xff] %v10223_v0  ;;  %722 = vst [vmem:[#allocation2 + $0x238] sm:$0xff] %v10223_v0 }
 0x1a0   : > { %723 = vst [vmem:[#allocation2 + $0x240] sm:$0xff] %v10223_v0  ;;  %724 = vst [vmem:[#allocation2 + $0x248] sm:$0xff] %v10223_v0 }
 0x1a1   : > { %725 = vst [vmem:[#allocation2 + $0x250] sm:$0xff] %v10223_v0  ;;  %726 = vst [vmem:[#allocation2 + $0x258] sm:$0xff] %v10223_v0 }
 0x1a2   : > { %727 = vst [vmem:[#allocation2 + $0x260] sm:$0xff] %v10223_v0  ;;  %728 = vst [vmem:[#allocation2 + $0x268] sm:$0xff] %v10223_v0 }
 0x1a3   : > { %729 = vst [vmem:[#allocation2 + $0x270] sm:$0xff] %v10223_v0  ;;  %730 = vst [vmem:[#allocation2 + $0x278] sm:$0xff] %v10223_v0 }
 0x1a4 PF: > { %v9198_v1 = vld [vmem:[%s10680_s18 + $0x4] ss:$16 sps:$4 sm:$0xff]   ;;  %v9200_v2 = vld [vmem:[%s10680_s18] ss:$16 sps:$4 sm:$0xff]   ;;  %v10224_v3 = vmov 0   ;;  %s11821_s15 = sld [smem:[#allocation32_spill]] }
 0x1a5   : > { %884 = vmatprep.mubr.bf16.mxu0 %v10224_v3  ;;  %967 = vmatprep.mubr.bf16.mxu1 %v10224_v3  ;;  %v9201_v4 = vld [vmem:[%s10680_s18 + $0x24] ss:$16 sps:$4 sm:$0xff]   ;;  %v9203_v5 = vld [vmem:[%s10680_s18 + $0x20] ss:$16 sps:$4 sm:$0xff]   ;;  %vm836_vm0 = vcmask 261120   ;;  %v1158_v11 = vld [vmem:[%s10693_s22] sm:$0xff] }
 0x1a6   : > { %852 = vmatprep.subr.bf16.mxu0 %v9198_v1  ;;  %v9209_v7 = vld [vmem:[%s10680_s18 + $0xc] ss:$16 sps:$4 sm:$0xff]   ;;  %v9211_v8 = vld [vmem:[%s10680_s18 + $0x8] ss:$16 sps:$4 sm:$0xff]   ;;  %v1159_v15 = vld [vmem:[%s10693_s22 + $0x8] sm:$0xff]  ;;  %p8207_p7 = scmp.ne.s32.totalorder %s10318_s14, 3 }
 0x1a7   : > { %853 = vmatpush1.bf16.msra.mxu0 %v9200_v2  ;;  %v9212_v9 = vld [vmem:[%s10680_s18 + $0x2c] ss:$16 sps:$4 sm:$0xff]   ;;  %935 = vmatprep.subr.bf16.mxu1 %v9209_v7  ;;  %v9214_v10 = vld [vmem:[%s10680_s18 + $0x28] ss:$16 sps:$4 sm:$0xff]   ;;  %v1163_v16 = vld [vmem:[%s10693_s22 + $0x28] sm:$0xff]  ;;  %vm10226_vm1 = vmmov (!%p8207_p7), 0  }
 0x1a8   : > { %854 = vmatprep.subr.bf16.mxu0 %v9201_v4  ;;  %v1162_v12 = vld [vmem:[%s10693_s22 + $0x20] sm:$0xff]  ;;  %936 = vmatpush1.bf16.msra.mxu1 %v9211_v8  ;;  %v7954_v18 = vcombine.high %v1159_v15, %v1163_v16  ;;  %v1167_v22 = vld [vmem:[%s10693_s22 + $0x48] sm:$0xff]  ;;  %v7953_v26 = vcombine.low %v1159_v15, %v1163_v16  ;;  %vm7721_vm2 = vcmask (!%p8207_p7), 39936   ;;  %s11822_s4 = sld [smem:[#allocation39_spill]] (!%p8207_p7) }
 0x1a9   : > { %v7951_v13 = vcombine.low %v1158_v11, %v1162_v12  ;;  %v7952_v14 = vcombine.high %v1158_v11, %v1162_v12  ;;  %v1166_v17 = vld [vmem:[%s10693_s22 + $0x40] sm:$0xff]  ;;  %937 = vmatprep.subr.bf16.mxu1 %v9212_v9  ;;  %v1171_v23 = vld [vmem:[%s10693_s22 + $0x68] sm:$0xff] }
 0x1aa   : > { %v9204_v6 = vld [vmem:[%s11821_s15] sm:$0xff]   ;;  %v1170_v19 = vld [vmem:[%s10693_s22 + $0x60] sm:$0xff]  ;;  %v7962_v28 = vcombine.high %v1167_v22, %v1171_v23  ;;  %v1175_v30 = vld [vmem:[%s10693_s22 + $0x88] sm:$0xff]  ;;  %v7961_v34 = vcombine.low %v1167_v22, %v1171_v23 }
 0x1ab   : > { %855 = vmatpush1.bf16.msra.mxu0 %v9203_v5  ;;  %v9205_v20 = vld [vmem:[%s11821_s15 + $0x8] sm:$0xff]   ;;  %v7960_v21 = vcombine.high %v1166_v17, %v1170_v19  ;;  %v7959_v27 = vcombine.low %v1166_v17, %v1170_v19  ;;  %v1179_v31 = vld [vmem:[%s10693_s22 + $0xa8] sm:$0xff]  ;;  %v9207_v53 = vld [vmem:[%s11821_s15 + $0x18] sm:$0xff]  }
 0x1ac   : > { %2694 = vmatprep.subr.bf16.mxu0 %v7952_v14  ;;  %v1174_v24 = vld [vmem:[%s10693_s22 + $0x80] sm:$0xff]  ;;  %938 = vmatpush1.bf16.msra.mxu1 %v9214_v10  ;;  %v9206_v36 = vld [vmem:[%s11821_s15 + $0x10] sm:$0xff]   ;;  %v7970_v37 = vcombine.high %v1175_v30, %v1179_v31  ;;  %v7969_v43 = vcombine.low %v1175_v30, %v1179_v31  ;;  %v9208_v7 = vld [vmem:[%s11821_s15 + $0x20] sm:$0xff]  }
 0x1ad   : > { %v1178_v25 = vld [vmem:[%s10693_s22 + $0xa0] sm:$0xff]  ;;  %2860 = vmatprep.subr.bf16.mxu1 %v7954_v18  ;;  %v1183_v39 = vld [vmem:[%s10693_s22 + $0xc8] sm:$0xff] }
 0x1ae   : > { %7941 = vmatmul.mubr.msk.bf16.vlgmr.msra.gmra.mrb[0].mxu0 %vm836_vm0, %v9204_v6  ;;  %v7968_v29 = vcombine.high %v1174_v24, %v1178_v25  ;;  %v1182_v32 = vld [vmem:[%s10693_s22 + $0xc0] sm:$0xff]  ;;  %v7967_v35 = vcombine.low %v1174_v24, %v1178_v25  ;;  %v1187_v40 = vld [vmem:[%s10693_s22 + $0xe8] sm:$0xff] }
 0x1af   : > { %894 = vmatprep.mubr.bf16.mxu0 %v10224_v3  ;;  %2695 = vmatpush1.bf16.msra.mxu0 %v7951_v13  ;;  %v1186_v33 = vld [vmem:[%s10693_s22 + $0xe0] sm:$0xff]  ;;  %v7978_v45 = vcombine.high %v1183_v39, %v1187_v40  ;;  %v1191_v47 = vld [vmem:[%s10693_s22 + $0x108] sm:$0xff]  ;;  %v7977_v51 = vcombine.low %v1183_v39, %v1187_v40 }
 0x1b0   : > { %2696 = vmatprep.subr.bf16.mxu0 %v7960_v21  ;;  %7946 = vmatmul.mubr.msk.bf16.vlgmr.msra.gmra.mrb[0].mxu1 %vm836_vm0, %v9204_v6  ;;  %v7976_v38 = vcombine.high %v1182_v32, %v1186_v33  ;;  %v1190_v41 = vld [vmem:[%s10693_s22 + $0x100] sm:$0xff]  ;;  %v7975_v44 = vcombine.low %v1182_v32, %v1186_v33  ;;  %v1195_v48 = vld [vmem:[%s10693_s22 + $0x128] sm:$0xff] }
 0x1b1   : > { %977 = vmatprep.mubr.bf16.mxu1 %v10224_v3  ;;  %2861 = vmatpush1.bf16.msra.mxu1 %v7953_v26  ;;  %v1194_v42 = vld [vmem:[%s10693_s22 + $0x120] sm:$0xff]  ;;  %v7986_v54 = vcombine.high %v1191_v47, %v1195_v48  ;;  %v1199_v56 = vld [vmem:[%s10693_s22 + $0x148] sm:$0xff]  ;;  %v7985_v60 = vcombine.low %v1191_v47, %v1195_v48 }
 0x1b2   : > { %2862 = vmatprep.subr.bf16.mxu1 %v7962_v28  ;;  %v7984_v46 = vcombine.high %v1190_v41, %v1194_v42  ;;  %v1198_v49 = vld [vmem:[%s10693_s22 + $0x140] sm:$0xff]  ;;  %v7983_v52 = vcombine.low %v1190_v41, %v1194_v42  ;;  %v1203_v57 = vld [vmem:[%s10693_s22 + $0x168] sm:$0xff] }
 0x1b3   : > { %2697 = vmatpush1.bf16.msra.mxu0 %v7959_v27  ;;  %v1202_v50 = vld [vmem:[%s10693_s22 + $0x160] sm:$0xff]  ;;  %v7994_v62 = vcombine.high %v1199_v56, %v1203_v57  ;;  %v1207_v0 = vld [vmem:[%s10693_s22 + $0x188] sm:$0xff]  ;;  %v7993_v5 = vcombine.low %v1199_v56, %v1203_v57 }
 0x1b4   : > { %2698 = vmatprep.subr.bf16.mxu0 %v7968_v29  ;;  %v7992_v55 = vcombine.high %v1198_v49, %v1202_v50  ;;  %v1206_v58 = vld [vmem:[%s10693_s22 + $0x180] sm:$0xff]  ;;  %v7991_v61 = vcombine.low %v1198_v49, %v1202_v50  ;;  %v1211_v1 = vld [vmem:[%s10693_s22 + $0x1a8] sm:$0xff] }
 0x1b5   : > { %2863 = vmatpush1.bf16.msra.mxu1 %v7961_v34  ;;  %v1210_v59 = vld [vmem:[%s10693_s22 + $0x1a0] sm:$0xff]  ;;  %v8002_v8 = vcombine.high %v1207_v0, %v1211_v1  ;;  %v1215_v10 = vld [vmem:[%s10693_s22 + $0x1c8] sm:$0xff]  ;;  %v8001_v14 = vcombine.low %v1207_v0, %v1211_v1 }
 0x1b6   : > { %7942 = vmatmul.mubr.msk.bf16.gmra.mrb[4].mxu0 %vm836_vm0, %v9205_v20  ;;  %2864 = vmatprep.subr.bf16.mxu1 %v7970_v37  ;;  %v8000_v63 = vcombine.high %v1206_v58, %v1210_v59  ;;  %v1214_v2 = vld [vmem:[%s10693_s22 + $0x1c0] sm:$0xff]  ;;  %v7999_v6 = vcombine.low %v1206_v58, %v1210_v59  ;;  %v1219_v11 = vld [vmem:[%s10693_s22 + $0x1e8] sm:$0xff] }
 0x1b7   : > { %904 = vmatprep.mubr.bf16.mxu0 %v10224_v3  ;;  %2699 = vmatpush1.bf16.msra.mxu0 %v7967_v35  ;;  %v1218_v4 = vld [vmem:[%s10693_s22 + $0x1e0] sm:$0xff]  ;;  %v8010_v16 = vcombine.high %v1215_v10, %v1219_v11  ;;  %v1223_v18 = vld [vmem:[%s10693_s22 + $0x208] sm:$0xff]  ;;  %v8009_v22 = vcombine.low %v1215_v10, %v1219_v11 }
 0x1b8   : > { %2700 = vmatprep.subr.bf16.mxu0 %v7976_v38  ;;  %7947 = vmatmul.mubr.msk.bf16.gmra.mrb[4].mxu1 %vm836_vm0, %v9205_v20  ;;  %v8008_v9 = vcombine.high %v1214_v2, %v1218_v4  ;;  %v1222_v12 = vld [vmem:[%s10693_s22 + $0x200] sm:$0xff]  ;;  %v8007_v15 = vcombine.low %v1214_v2, %v1218_v4  ;;  %v1227_v19 = vld [vmem:[%s10693_s22 + $0x228] sm:$0xff] }
 0x1b9   : > { %987 = vmatprep.mubr.bf16.mxu1 %v10224_v3  ;;  %2865 = vmatpush1.bf16.msra.mxu1 %v7969_v43  ;;  %v1226_v13 = vld [vmem:[%s10693_s22 + $0x220] sm:$0xff]  ;;  %v8018_v24 = vcombine.high %v1223_v18, %v1227_v19  ;;  %v1231_v26 = vld [vmem:[%s10693_s22 + $0x248] sm:$0xff]  ;;  %v8017_v30 = vcombine.low %v1223_v18, %v1227_v19 }
 0x1ba   : > { %2866 = vmatprep.subr.bf16.mxu1 %v7978_v45  ;;  %v8016_v17 = vcombine.high %v1222_v12, %v1226_v13  ;;  %v1230_v20 = vld [vmem:[%s10693_s22 + $0x240] sm:$0xff]  ;;  %v8015_v23 = vcombine.low %v1222_v12, %v1226_v13  ;;  %v1235_v27 = vld [vmem:[%s10693_s22 + $0x268] sm:$0xff] }
 0x1bb   : > { %2701 = vmatpush1.bf16.msra.mxu0 %v7975_v44  ;;  %v1234_v21 = vld [vmem:[%s10693_s22 + $0x260] sm:$0xff]  ;;  %v8026_v31 = vcombine.high %v1231_v26, %v1235_v27  ;;  %v1239_v33 = vld [vmem:[%s10693_s22 + $0x288] sm:$0xff]  ;;  %v8025_v37 = vcombine.low %v1231_v26, %v1235_v27  ;;  %v749_v27 = vld [vmem:[%s10687_s19] sm:$0xf] }
 0x1bc   : > { %2702 = vmatprep.subr.bf16.mxu0 %v7984_v46  ;;  %v8024_v25 = vcombine.high %v1230_v20, %v1234_v21  ;;  %v1238_v28 = vld [vmem:[%s10693_s22 + $0x280] sm:$0xff]  ;;  %v1243_v34 = vld [vmem:[%s10693_s22 + $0x2a8] sm:$0xff] }
 0x1bd   : > { %2867 = vmatpush1.bf16.msra.mxu1 %v7977_v51  ;;  %v1242_v29 = vld [vmem:[%s10693_s22 + $0x2a0] sm:$0xff]  ;;  %v8034_v39 = vcombine.high %v1239_v33, %v1243_v34  ;;  %v1247_v41 = vld [vmem:[%s10693_s22 + $0x2c8] sm:$0xff]  ;;  %v8033_v45 = vcombine.low %v1239_v33, %v1243_v34 }
 0x1be   : > { %7943 = vmatmul.mubr.msk.bf16.gmra.mrb[8].mxu0 %vm836_vm0, %v9206_v36  ;;  %2868 = vmatprep.subr.bf16.mxu1 %v7986_v54  ;;  %v8032_v32 = vcombine.high %v1238_v28, %v1242_v29  ;;  %v1246_v35 = vld [vmem:[%s10693_s22 + $0x2c0] sm:$0xff]  ;;  %v8031_v38 = vcombine.low %v1238_v28, %v1242_v29  ;;  %v1251_v42 = vld [vmem:[%s10693_s22 + $0x2e8] sm:$0xff] }
 0x1bf   : > { %914 = vmatprep.mubr.bf16.mxu0 %v10224_v3  ;;  %2703 = vmatpush1.bf16.msra.mxu0 %v7983_v52  ;;  %v1254_v43 = vld [vmem:[%s10693_s22 + $0x300] sm:$0xff]  ;;  %v8042_v47 = vcombine.high %v1247_v41, %v1251_v42  ;;  %v1255_v49 = vld [vmem:[%s10693_s22 + $0x308] sm:$0xff] }
 0x1c0   : > { %2704 = vmatprep.subr.bf16.mxu0 %v7992_v55  ;;  %7948 = vmatmul.mubr.msk.bf16.gmra.mrb[8].mxu1 %vm836_vm0, %v9206_v36  ;;  %v1250_v36 = vld [vmem:[%s10693_s22 + $0x2e0] sm:$0xff]  ;;  %v1259_v50 = vld [vmem:[%s10693_s22 + $0x328] sm:$0xff] }
 0x1c1   : > { %997 = vmatprep.mubr.bf16.mxu1 %v10224_v3  ;;  %2869 = vmatpush1.bf16.msra.mxu1 %v7985_v60  ;;  %v8040_v40 = vcombine.high %v1246_v35, %v1250_v36  ;;  %v1258_v44 = vld [vmem:[%s10693_s22 + $0x320] sm:$0xff]  ;;  %v8039_v46 = vcombine.low %v1246_v35, %v1250_v36  ;;  %v8050_v55 = vcombine.high %v1255_v49, %v1259_v50  ;;  %v1263_v57 = vld [vmem:[%s10693_s22 + $0x348] sm:$0xff] }
 0x1c2   : > { %2870 = vmatprep.subr.bf16.mxu1 %v7994_v62  ;;  %v8048_v48 = vcombine.high %v1254_v43, %v1258_v44  ;;  %v1262_v51 = vld [vmem:[%s10693_s22 + $0x340] sm:$0xff]  ;;  %v8047_v54 = vcombine.low %v1254_v43, %v1258_v44  ;;  %v1267_v58 = vld [vmem:[%s10693_s22 + $0x368] sm:$0xff]  ;;  %v8049_v59 = vcombine.low %v1255_v49, %v1259_v50 }
 0x1c3   : > { %2705 = vmatpush1.bf16.msra.mxu0 %v7991_v61  ;;  %v1266_v52 = vld [vmem:[%s10693_s22 + $0x360] sm:$0xff]  ;;  %v8058_v61 = vcombine.high %v1263_v57, %v1267_v58  ;;  %v8057_v62 = vcombine.low %v1263_v57, %v1267_v58  ;;  %v1271_v1 = vld [vmem:[%s10693_s22 + $0x388] sm:$0xff] }
 0x1c4   : > { %2706 = vmatprep.subr.bf16.mxu0 %v8000_v63  ;;  %v8056_v56 = vcombine.high %v1262_v51, %v1266_v52  ;;  %v8055_v60 = vcombine.low %v1262_v51, %v1266_v52  ;;  %v1270_v63 = vld [vmem:[%s10693_s22 + $0x380] sm:$0xff]  ;;  %v1275_v4 = vld [vmem:[%s10693_s22 + $0x3a8] sm:$0xff] }
 0x1c5   : > { %2871 = vmatpush1.bf16.msra.mxu1 %v7993_v5  ;;  %v1274_v0 = vld [vmem:[%s10693_s22 + $0x3a0] sm:$0xff]  ;;  %v1279_v10 = vld [vmem:[%s10693_s22 + $0x3c8] sm:$0xff] }
 0x1c6   : > { %7944 = vmatmul.mubr.msk.bf16.gmra.mrb[12].mxu0 %vm836_vm0, %v9207_v53  ;;  %2872 = vmatprep.subr.bf16.mxu1 %v8002_v8  ;;  %v8064_v2 = vcombine.high %v1270_v63, %v1274_v0  ;;  %v8063_v5 = vcombine.low %v1270_v63, %v1274_v0  ;;  %v1278_v8 = vld [vmem:[%s10693_s22 + $0x3c0] sm:$0xff]  ;;  %v1283_v12 = vld [vmem:[%s10693_s22 + $0x3e8] sm:$0xff] }
 0x1c7   : > { %924 = vmatprep.mubr.bf16.mxu0 %v10224_v3  ;;  %2707 = vmatpush1.bf16.msra.mxu0 %v7999_v6  ;;  %v8065_v6 = vcombine.low %v1271_v1, %v1275_v4  ;;  %v10911_v18 = vld [vmem:[%s10693_s22 + $0x408] sm:$0xff]  ;;  %v1298_v43 = vld [vmem:[%s10693_s22 + $0x460] sm:$0xff] }
 0x1c8   : > { %2708 = vmatprep.subr.bf16.mxu0 %v8008_v9  ;;  %7949 = vmatmul.mubr.msk.bf16.gmra.mrb[12].mxu1 %vm836_vm0, %v9207_v53  ;;  %v8041_v53 = vcombine.low %v1247_v41, %v1251_v42  ;;  %v1282_v9 = vld [vmem:[%s10693_s22 + $0x3e0] sm:$0xff]  ;;  %v10974_v0 = vld [vmem:[%s10693_s22 + $0x488] sm:$0xff] }
 0x1c9   : > { %1007 = vmatprep.mubr.bf16.mxu1 %v10224_v3  ;;  %2873 = vmatpush1.bf16.msra.mxu1 %v8001_v14  ;;  %v8023_v3 = vcombine.low %v1230_v20, %v1234_v21  ;;  %v8072_v11 = vcombine.high %v1278_v8, %v1282_v9  ;;  %v8071_v13 = vcombine.low %v1278_v8, %v1282_v9  ;;  %v10916_v20 = vld [vmem:[%s10693_s22 + $0x428] sm:$0xff]  ;;  %v1294_v42 = vld [vmem:[%s10693_s22 + $0x440] sm:$0xff] }
 0x1ca   : > { %2874 = vmatprep.subr.bf16.mxu1 %v8010_v16  ;;  %v8073_v14 = vcombine.low %v1279_v10, %v1283_v12  ;;  %v10905_v16 = vld [vmem:[%s10693_s22 + $0x400] sm:$0xff]  ;;  %v8087_v52 = vcombine.low %v1294_v42, %v1298_v43 }
 0x1cb   : > { %2709 = vmatpush1.bf16.msra.mxu0 %v8007_v15  ;;  %v8074_v15 = vcombine.high %v1279_v10, %v1283_v12  ;;  %v10964_v57 = vld [vmem:[%s10693_s22 + $0x480] sm:$0xff] }
 0x1cc   : > { %2710 = vmatprep.subr.bf16.mxu0 %v8016_v17  ;;  %v10908_v17 = vld [vmem:[%s10693_s22 + $0x420] sm:$0xff] }
 0x1cd   : > { %2875 = vmatpush1.bf16.msra.mxu1 %v8009_v22  ;;  %v8080_v19 = vcombine.high %v10905_v16, %v10908_v17  ;;  %v8079_v21 = vcombine.low %v10905_v16, %v10908_v17  ;;  %v8081_v22 = vcombine.low %v10911_v18, %v10916_v20  ;;  %v10971_v63 = vld [vmem:[%s10693_s22 + $0x4a0] sm:$0xff] }
 0x1ce   : > { %7945 = vmatmul.mubr.msk.bf16.gmra.mrb[16].mxu0 %vm836_vm0, %v9208_v7  ;;  %2876 = vmatprep.subr.bf16.mxu1 %v8018_v24  ;;  %v751_v24 = vlaneseq }
 0x1cf   : > { %2711 = vmatpush1.bf16.msra.mxu0 %v8015_v23  ;;  %v8082_v23 = vcombine.high %v10911_v18, %v10916_v20 }
 0x1d0   : > { %2712 = vmatprep.subr.bf16.mxu0 %v8024_v25  ;;  %7950 = vmatmul.mubr.msk.bf16.gmra.mrb[16].mxu1 %vm836_vm0, %v9208_v7  ;;  %v8066_v7 = vcombine.high %v1271_v1, %v1275_v4  ;;  %v10924_v25 = vshrl.u32 %v751_v24, 7  ;;  %v10977_v1 = vld [vmem:[%s10693_s22 + $0x4a8] sm:$0xff] }
 0x1d1   : > { %2877 = vmatpush1.bf16.msra.mxu1 %v8017_v30  ;;  %v8098_v20 = vcombine.high %v10974_v0, %v10977_v1  ;;  %v11000_v24 = vld [vmem:[%s10693_s22 + $0x4c8] sm:$0xff] }
 0x1d2   : > { %2878 = vmatprep.subr.bf16.mxu1 %v8026_v31  ;;  %v10927_v26 = vsub.s32 0, %v10924_v25  ;;  %v10931_v28 = vsub.s32 1, %v10924_v25  ;;  %v10941_v33 = vsub.s32 2, %v10924_v25  ;;  %v10945_v36 = vsub.s32 3, %v10924_v25 }
 0x1d3   : > { %2713 = vmatpush1.bf16.msra.mxu0 %v8023_v3 }
 0x1d4   : > { %2714 = vmatprep.subr.bf16.mxu0 %v8032_v32  ;;  %v10934_v29 = vrot.slane %v749_v27, %v10927_v26  ;;  %v10937_v30 = vrot.slane %v749_v27, %v10931_v28  ;;  %v10952_v44 = vrot.slane %v749_v27, %v10941_v33  ;;  %v10957_v49 = vrot.slane %v749_v27, %v10945_v36  ;;  %v11003_v27 = vld [vmem:[%s10693_s22 + $0x4e8] sm:$0xff] }
 0x1d5   : > { %2879 = vmatpush1.bf16.msra.mxu1 %v8025_v37 }
 0x1d6   : > { %2880 = vmatprep.subr.bf16.mxu1 %v8034_v39 }
 0x1d7   : > { %2715 = vmatpush1.bf16.msra.mxu0 %v8031_v38 }
 0x1d8   : > { %2716 = vmatprep.subr.bf16.mxu0 %v8040_v40 }
 0x1d9   : > { %2881 = vmatpush1.bf16.msra.mxu1 %v8033_v45 }
 0x1da   : > { %2882 = vmatprep.subr.bf16.mxu1 %v8042_v47  ;;  %v1295_v47 = vld [vmem:[%s10693_s22 + $0x448] sm:$0xff] }
 0x1db   : > { %2717 = vmatpush1.bf16.msra.mxu0 %v8039_v46 }
 0x1dc   : > { %2718 = vmatprep.subr.bf16.mxu0 %v8048_v48  ;;  %v1299_v48 = vld [vmem:[%s10693_s22 + $0x468] sm:$0xff] }
 0x1dd   : > { %2883 = vmatpush1.bf16.msra.mxu1 %v8041_v53 }
 0x1de   : > { %2884 = vmatprep.subr.bf16.mxu1 %v8050_v55  ;;  %v8088_v55 = vcombine.high %v1294_v42, %v1298_v43  ;;  %v8106_v43 = vcombine.high %v11000_v24, %v11003_v27 }
 0x1df   : > { %2719 = vmatpush1.bf16.msra.mxu0 %v8047_v54 }
 0x1e0   : > { %2720 = vmatprep.subr.bf16.mxu0 %v8056_v56  ;;  %v8090_v56 = vcombine.high %v1295_v47, %v1299_v48 }
 0x1e1   : > { %2885 = vmatpush1.bf16.msra.mxu1 %v8049_v59 }
 0x1e2   : > { %2886 = vmatprep.subr.bf16.mxu1 %v8058_v61 }
 0x1e3   : > { %2721 = vmatpush1.bf16.msra.mxu0 %v8055_v60 }
 0x1e4   : > { %2722 = vmatprep.subr.bf16.mxu0 %v8064_v2 }
 0x1e5   : > { %2887 = vmatpush1.bf16.msra.mxu1 %v8057_v62  ;;  %v8089_v62 = vcombine.low %v1295_v47, %v1299_v48 }
 0x1e6   : > { %2888 = vmatprep.subr.bf16.mxu1 %v8066_v7 }
 0x1e7   : > { %2723 = vmatpush1.bf16.msra.mxu0 %v8063_v5 }
 0x1e8   : > { %2724 = vmatprep.subr.bf16.mxu0 %v8072_v11 }
 0x1e9   : > { %2889 = vmatpush1.bf16.msra.mxu1 %v8065_v6 }
 0x1ea   : > { %2890 = vmatprep.subr.bf16.mxu1 %v8074_v15 }
 0x1eb   : > { %2725 = vmatpush1.bf16.msra.mxu0 %v8071_v13  ;;  %v10986_v13 = vld [vmem:[%s10693_s22 + $0x4c0] sm:$0xff] }
 0x1ec   : > { %2777 = vmatprep.subr.bf16.mxu0 %v8080_v19  ;;  %v8096_v19 = vcombine.high %v10964_v57, %v10971_v63 }
 0x1ed   : > { %2891 = vmatpush1.bf16.msra.mxu1 %v8073_v14  ;;  %v10989_v14 = vld [vmem:[%s10693_s22 + $0x4e0] sm:$0xff] }
 0x1ee   : > { %2943 = vmatprep.subr.bf16.mxu1 %v8082_v23  ;;  %v8095_v23 = vcombine.low %v10964_v57, %v10971_v63 }
 0x281   : > { %v886_v3 = vpop.f32.mrb[0].mxu0 }
 0x282   : > { %v887_v31 = vadd.f32 %v886_v3, %v10934_v29  ;;  %v888_v32 = vpop.f32.mrb[1].mxu0 }
 0x283   : > { %v889_v34 = vadd.f32 %v888_v32, %v10937_v30  ;;  %v890_v35 = vpop.f32.mrb[2].mxu0  ;;  %v969_v54 = vpop.f32.mrb[0].mxu1  ;;  %v8097_v32 = vcombine.low %v10974_v0, %v10977_v1 }
 0x284   : > { %v891_v37 = vadd.f32 %v890_v35, %v10934_v29  ;;  %v892_v38 = vpop.f32.mrb[3].mxu0  ;;  %v1018_v40 = vmax.f32 %v887_v31, 0.0  ;;  %v970_v60 = vadd.f32 %v969_v54, %v10952_v44  ;;  %v971_v61 = vpop.f32.mrb[1].mxu1  ;;  %v11029_v54 = vld [vmem:[%s10693_s22 + $0x520] sm:$0xff] }
 0x285   : > { %v893_v39 = vadd.f32 %v892_v38, %v10937_v30  ;;  %v1019_v45 = vmax.f32 %v889_v34, 0.0  ;;  %v972_v5 = vadd.f32 %v971_v61, %v10957_v49  ;;  %v973_v6 = vpop.f32.mrb[2].mxu1  ;;  %v8103_v34 = vcombine.low %v10986_v13, %v10989_v14 }
 0x286   : > { %v1022_v41 = vmax.f32 %v891_v37, 0.0  ;;  %v1020_v10 = vmax.f32 %v970_v60, 0.0  ;;  %v974_v11 = vadd.f32 %v973_v6, %v10952_v44  ;;  %v975_v12 = vpop.f32.mrb[3].mxu1  ;;  %v8104_v38 = vcombine.high %v10986_v13, %v10989_v14 }
 0x287   : > { %v1023_v46 = vmax.f32 %v893_v39, 0.0  ;;  %v1021_v17 = vmax.f32 %v972_v5, 0.0  ;;  %v976_v18 = vadd.f32 %v975_v12, %v10957_v49  ;;  %v11049_v5 = vld [vmem:[%s10693_s22 + $0x560] sm:$0xff] }
 0x288   : > { %v10959_v50 = vpack.c.bf16 %v1022_v41, %v1018_v40 }
 0x289   : > { %v10961_v51 = vpack.c.bf16 %v1023_v46, %v1019_v45  ;;  %v896_v53 = vpop.f32.mrb[4].mxu0  ;;  %v1025_v31 = vmax.f32 %v976_v18, 0.0  ;;  %v11022_v45 = vld [vmem:[%s10693_s22 + $0x500] sm:$0xff] }
 0x28a   : > { %v897_v58 = vadd.f32 %v896_v53, %v10934_v29  ;;  %v898_v59 = vpop.f32.mrb[5].mxu0  ;;  %v8105_v53 = vcombine.low %v11000_v24, %v11003_v27  ;;  %v8111_v14 = vcombine.low %v11022_v45, %v11029_v54 }
 0x28b   : > { %2726 = vmatprep.mubr.bf16.mxu0 %v10961_v51  ;;  %2892 = vmatprep.mubr.bf16.mxu1 %v10961_v51  ;;  %v899_v2 = vadd.f32 %v898_v59, %v10937_v30  ;;  %v900_v4 = vpop.f32.mrb[6].mxu0  ;;  %v11017_v41 = vpack.c.bf16 %v1025_v31, %v1021_v17  ;;  %v979_v42 = vpop.f32.mrb[4].mxu1 }
 0x28c   : > { %2727 = vmatmul.mubr.bf16.vlgmr.msra.gmra.mrb[20].mxu0 %v10959_v50  ;;  %2893 = vmatmul.mubr.bf16.vlgmr.msra.gmra.mrb[20].mxu1 %v10959_v50  ;;  %v1026_v7 = vmax.f32 %v897_v58, 0.0  ;;  %v901_v8 = vadd.f32 %v900_v4, %v10934_v29  ;;  %v902_v9 = vpop.f32.mrb[7].mxu0  ;;  %v980_v48 = vadd.f32 %v979_v42, %v10952_v44  ;;  %v11046_v4 = vld [vmem:[%s10693_s22 + $0x540] sm:$0xff] }
 0x28d   : > { %2778 = vmatpush1.bf16.msra.mxu0 %v8079_v21  ;;  %2944 = vmatpush1.bf16.msra.mxu1 %v8081_v22  ;;  %v1027_v15 = vmax.f32 %v899_v2, 0.0  ;;  %v903_v16 = vadd.f32 %v902_v9, %v10937_v30  ;;  %v1024_v22 = vmax.f32 %v974_v11, 0.0 }
 0x28e   : > { %2779 = vmatprep.subr.bf16.mxu0 %v8088_v55  ;;  %2945 = vmatprep.subr.bf16.mxu1 %v8090_v56  ;;  %v1030_v21 = vmax.f32 %v901_v8, 0.0  ;;  %v11032_v55 = vld [vmem:[%s10693_s22 + $0x508] sm:$0xff]  ;;  %v1028_v0 = vmax.f32 %v980_v48, 0.0 }
 0x28f   : > { %v1031_v3 = vmax.f32 %v903_v16, 0.0  ;;  %v11011_v37 = vpack.c.bf16 %v1024_v22, %v1020_v10  ;;  %v11035_v56 = vld [vmem:[%s10693_s22 + $0x528] sm:$0xff]  ;;  %v8112_v10 = vcombine.high %v11022_v45, %v11029_v54 }
 0x290   : > { %v11009_v35 = vpack.c.bf16 %v1030_v21, %v1026_v7  ;;  %v8114_v11 = vcombine.high %v11032_v55, %v11035_v56  ;;  %v11063_v16 = vld [vmem:[%s10693_s22 + $0x568] sm:$0xff] }
 0x291   : > { %2780 = vmatpush1.bf16.msra.mxu0 %v8087_v52  ;;  %2946 = vmatpush1.bf16.msra.mxu1 %v8089_v62  ;;  %v11015_v39 = vpack.c.bf16 %v1031_v3, %v1027_v15  ;;  %v906_v40 = vpop.f32.mrb[8].mxu0  ;;  %v981_v52 = vpop.f32.mrb[5].mxu1  ;;  %v11060_v15 = vld [vmem:[%s10693_s22 + $0x548] sm:$0xff] }
 0x292   : > { %2781 = vmatprep.subr.bf16.mxu0 %v8096_v19  ;;  %2947 = vmatprep.subr.bf16.mxu1 %v8098_v20  ;;  %v907_v46 = vadd.f32 %v906_v40, %v10934_v29  ;;  %v908_v47 = vpop.f32.mrb[9].mxu0  ;;  %v982_v59 = vadd.f32 %v981_v52, %v10957_v49  ;;  %v983_v60 = vpop.f32.mrb[6].mxu1  ;;  %v8113_v19 = vcombine.low %v11032_v55, %v11035_v56  ;;  %v11095_v48 = vld [vmem:[%s10693_s22 + $0x5a8] sm:$0xff] }
 0x293   : > { %v909_v57 = vadd.f32 %v908_v47, %v10937_v30  ;;  %v910_v58 = vpop.f32.mrb[10].mxu0  ;;  %2736 = vmatprep.mubr.bf16.mxu0 %v11015_v39  ;;  %2902 = vmatprep.mubr.bf16.mxu1 %v11015_v39  ;;  %v984_v1 = vadd.f32 %v983_v60, %v10952_v44  ;;  %v985_v2 = vpop.f32.mrb[7].mxu1  ;;  %v8119_v20 = vcombine.low %v11046_v4, %v11049_v5  ;;  %v11092_v47 = vld [vmem:[%s10693_s22 + $0x588] sm:$0xff] }
 0x294   : > { %v1034_v61 = vmax.f32 %v907_v46, 0.0  ;;  %v911_v62 = vadd.f32 %v910_v58, %v10934_v29  ;;  %v912_v63 = vpop.f32.mrb[11].mxu0  ;;  %2737 = vmatmul.mubr.bf16.gmra.mrb[24].mxu0 %v11009_v35  ;;  %2903 = vmatmul.mubr.bf16.gmra.mrb[24].mxu1 %v11009_v35  ;;  %v1029_v8 = vmax.f32 %v982_v59, 0.0  ;;  %v986_v9 = vadd.f32 %v985_v2, %v10957_v49  ;;  %v989_v31 = vpop.f32.mrb[8].mxu1  ;;  %v11089_v46 = vld [vmem:[%s10693_s22 + $0x5a0] sm:$0xff] }
 0x295   : > { %2782 = vmatpush1.bf16.msra.mxu0 %v8095_v23  ;;  %2948 = vmatpush1.bf16.msra.mxu1 %v8097_v32  ;;  %v1035_v6 = vmax.f32 %v909_v57, 0.0  ;;  %v913_v7 = vadd.f32 %v912_v63, %v10937_v30  ;;  %v1032_v13 = vmax.f32 %v984_v1, 0.0  ;;  %v8120_v23 = vcombine.high %v11046_v4, %v11049_v5  ;;  %v11109_v63 = vld [vmem:[%s10693_s22 + $0x5e0] sm:$0xff] }
 0x296   : > { %2783 = vmatprep.subr.bf16.mxu0 %v8104_v38  ;;  %2949 = vmatprep.subr.bf16.mxu1 %v8106_v43  ;;  %v1038_v12 = vmax.f32 %v911_v62, 0.0  ;;  %v1033_v18 = vmax.f32 %v986_v9, 0.0  ;;  %v8122_v32 = vcombine.high %v11060_v15, %v11063_v16  ;;  %v11082_v38 = vld [vmem:[%s10693_s22 + $0x580] sm:$0xff]  ;;  %v990_v42 = vadd.f32 %v989_v31, %v10952_v44  ;;  %v991_v43 = vpop.f32.mrb[9].mxu1 }
 0x297   : > { %v1039_v17 = vmax.f32 %v913_v7, 0.0  ;;  %v11071_v22 = vpack.c.bf16 %v1032_v13, %v1028_v0  ;;  %v8121_v45 = vcombine.low %v11060_v15, %v11063_v16  ;;  %v992_v54 = vadd.f32 %v991_v43, %v10957_v49  ;;  %v993_v55 = vpop.f32.mrb[10].mxu1  ;;  %v11106_v62 = vld [vmem:[%s10693_s22 + $0x5c0] sm:$0xff] }
 0x298   : > { %v11069_v21 = vpack.c.bf16 %v1038_v12, %v1034_v61  ;;  %v11077_v3 = vpack.c.bf16 %v1033_v18, %v1029_v8  ;;  %v1036_v59 = vmax.f32 %v990_v42, 0.0  ;;  %v994_v60 = vadd.f32 %v993_v55, %v10952_v44  ;;  %v995_v61 = vpop.f32.mrb[11].mxu1 }
 0x299   : > { %2784 = vmatpush1.bf16.msra.mxu0 %v8103_v34  ;;  %2950 = vmatpush1.bf16.msra.mxu1 %v8105_v53  ;;  %v11075_v24 = vpack.c.bf16 %v1039_v17, %v1035_v6  ;;  %v916_v27 = vpop.f32.mrb[12].mxu0  ;;  %v1037_v2 = vmax.f32 %v992_v54, 0.0  ;;  %v996_v4 = vadd.f32 %v995_v61, %v10957_v49  ;;  %v8128_v5 = vcombine.high %v11082_v38, %v11089_v46 }
 0x29a   : > { %2785 = vmatprep.subr.bf16.mxu0 %v8112_v10  ;;  %2951 = vmatprep.subr.bf16.mxu1 %v8114_v11  ;;  %v917_v34 = vadd.f32 %v916_v27, %v10934_v29  ;;  %v918_v40 = vpop.f32.mrb[13].mxu0  ;;  %v8130_v6 = vcombine.high %v11092_v47, %v11095_v48  ;;  %v1040_v8 = vmax.f32 %v994_v60, 0.0  ;;  %v8127_v9 = vcombine.low %v11082_v38, %v11089_v46  ;;  %v11120_v10 = vld [vmem:[%s10693_s22 + $0x5c8] sm:$0xff]  ;;  %v11139_v38 = vld [vmem:[%s10693_s22 + $0x600] sm:$0xff] }
 0x29b   : > { %v919_v52 = vadd.f32 %v918_v40, %v10937_v30  ;;  %v920_v53 = vpop.f32.mrb[14].mxu0  ;;  %2746 = vmatprep.mubr.bf16.mxu0 %v11075_v24  ;;  %2912 = vmatprep.mubr.bf16.mxu1 %v11075_v24  ;;  %v1347_v11 = vld [vmem:[%s10693_s22 + $0x5e8] sm:$0xff]  ;;  %v1041_v13 = vmax.f32 %v996_v4, 0.0  ;;  %v8135_v15 = vcombine.low %v11106_v62, %v11109_v63  ;;  %v8136_v18 = vcombine.high %v11106_v62, %v11109_v63  ;;  %v999_v31 = vpop.f32.mrb[12].mxu1 }
 0x29c   : > { %v1042_v56 = vmax.f32 %v917_v34, 0.0  ;;  %v921_v57 = vadd.f32 %v920_v53, %v10934_v29  ;;  %v922_v58 = vpop.f32.mrb[15].mxu0  ;;  %2747 = vmatmul.mubr.bf16.gmra.mrb[28].mxu0 %v11069_v21  ;;  %2913 = vmatmul.mubr.bf16.gmra.mrb[28].mxu1 %v11069_v21  ;;  %v11129_v17 = vpack.c.bf16 %v1040_v8, %v1036_v59  ;;  %v1000_v40 = vadd.f32 %v999_v31, %v10952_v44  ;;  %v1001_v42 = vpop.f32.mrb[13].mxu1  ;;  %v11148_v46 = vld [vmem:[%s10693_s22 + $0x608] sm:$0xff] }
 0x29d   : > { %2786 = vmatpush1.bf16.msra.mxu0 %v8111_v14  ;;  %2952 = vmatpush1.bf16.msra.mxu1 %v8113_v19  ;;  %v1043_v0 = vmax.f32 %v919_v52, 0.0  ;;  %v923_v1 = vadd.f32 %v922_v58, %v10937_v30  ;;  %v8129_v14 = vcombine.low %v11092_v47, %v11095_v48  ;;  %v11135_v27 = vpack.c.bf16 %v1041_v13, %v1037_v2  ;;  %v1355_v47 = vld [vmem:[%s10693_s22 + $0x628] sm:$0xff]  ;;  %v1003_v54 = vpop.f32.mrb[14].mxu1  ;;  %v1358_v2 = vld [vmem:[%s10693_s22 + $0x640] sm:$0xff] }
 0x29e   : > { %2787 = vmatprep.subr.bf16.mxu0 %v8120_v23  ;;  %2953 = vmatprep.subr.bf16.mxu1 %v8122_v32  ;;  %v1046_v7 = vmax.f32 %v921_v57, 0.0  ;;  %v8138_v32 = vcombine.high %v11120_v10, %v1347_v11  ;;  %v8137_v43 = vcombine.low %v11120_v10, %v1347_v11  ;;  %v1002_v53 = vadd.f32 %v1001_v42, %v10957_v49  ;;  %v1005_v60 = vpop.f32.mrb[15].mxu1  ;;  %v1363_v8 = vld [vmem:[%s10693_s22 + $0x668] sm:$0xff] }
 0x29f   : > { %v1047_v12 = vmax.f32 %v923_v1, 0.0  ;;  %v1044_v58 = vmax.f32 %v1000_v40, 0.0  ;;  %v1004_v59 = vadd.f32 %v1003_v54, %v10952_v44  ;;  %v8146_v1 = vcombine.high %v11148_v46, %v1355_v47  ;;  %v1370_v40 = vld [vmem:[%s10693_s22 + $0x6a0] sm:$0xff]  ;;  %v1367_v42 = vld [vmem:[%s10693_s22 + $0x688] sm:$0xff] }
 0x2a0   : > { %v11127_v16 = vpack.c.bf16 %v1046_v7, %v1042_v56  ;;  %v1045_v63 = vmax.f32 %v1002_v53, 0.0  ;;  %v1359_v7 = vld [vmem:[%s10693_s22 + $0x648] sm:$0xff]  ;;  %v8145_v13 = vcombine.low %v11148_v46, %v1355_v47 }
 0x2a1   : > { %2788 = vmatpush1.bf16.msra.mxu0 %v8119_v20  ;;  %2954 = vmatpush1.bf16.msra.mxu1 %v8121_v45  ;;  %v11133_v19 = vpack.c.bf16 %v1047_v12, %v1043_v0  ;;  %v926_v23 = vpop.f32.mrb[16].mxu0  ;;  %v11145_v45 = vld [vmem:[%s10693_s22 + $0x620] sm:$0xff]  ;;  %v8153_v53 = vcombine.low %v1359_v7, %v1363_v8 }
 0x2a2   : > { %2789 = vmatprep.subr.bf16.mxu0 %v8128_v5  ;;  %2955 = vmatprep.subr.bf16.mxu1 %v8130_v6  ;;  %v927_v20 = vadd.f32 %v926_v23, %v10934_v29  ;;  %v928_v34 = vpop.f32.mrb[17].mxu0  ;;  %v8144_v0 = vcombine.high %v11139_v38, %v11145_v45  ;;  %v1048_v5 = vmax.f32 %v1004_v59, 0.0  ;;  %v1362_v6 = vld [vmem:[%s10693_s22 + $0x660] sm:$0xff] }
 0x2a3   : > { %v929_v48 = vadd.f32 %v928_v34, %v10937_v30  ;;  %v930_v52 = vpop.f32.mrb[18].mxu0  ;;  %2756 = vmatprep.mubr.bf16.mxu0 %v11133_v19  ;;  %2922 = vmatprep.mubr.bf16.mxu1 %v11133_v19  ;;  %v1009_v23 = vpop.f32.mrb[16].mxu1  ;;  %v8152_v31 = vcombine.high %v1358_v2, %v1362_v6 }
 0x2a4   : > { %v1050_v55 = vmax.f32 %v927_v20, 0.0  ;;  %v931_v56 = vadd.f32 %v930_v52, %v10934_v29  ;;  %v932_v57 = vpop.f32.mrb[19].mxu0  ;;  %2757 = vmatmul.mubr.bf16.gmra.mrb[32].mxu0 %v11127_v16  ;;  %2923 = vmatmul.mubr.bf16.gmra.mrb[32].mxu1 %v11127_v16  ;;  %v1006_v29 = vadd.f32 %v1005_v60, %v10957_v49  ;;  %v11172_v12 = vpack.c.bf16 %v1048_v5, %v1044_v58  ;;  %v1011_v34 = vpop.f32.mrb[17].mxu1  ;;  %v1374_v58 = vld [vmem:[%s10693_s22 + $0x6c0] sm:$0xff] }
 0x2a5   : > { %2790 = vmatpush1.bf16.msra.mxu0 %v8127_v9  ;;  %2956 = vmatpush1.bf16.msra.mxu1 %v8129_v14  ;;  %v1051_v61 = vmax.f32 %v929_v48, 0.0  ;;  %v933_v62 = vadd.f32 %v932_v57, %v10937_v30  ;;  %v8143_v30 = vcombine.low %v11139_v38, %v11145_v45  ;;  %v1366_v38 = vld [vmem:[%s10693_s22 + $0x680] sm:$0xff]  ;;  %v1010_v20 = vadd.f32 %v1009_v23, %v10952_v44  ;;  %v1371_v45 = vld [vmem:[%s10693_s22 + $0x6a8] sm:$0xff] }
 0x2a6   : > { %2791 = vmatprep.subr.bf16.mxu0 %v8136_v18  ;;  %2957 = vmatprep.subr.bf16.mxu1 %v8138_v32  ;;  %v1054_v4 = vmax.f32 %v931_v56, 0.0  ;;  %v1049_v10 = vmax.f32 %v1006_v29, 0.0  ;;  %v8154_v32 = vcombine.high %v1359_v7, %v1363_v8  ;;  %v8151_v52 = vcombine.low %v1358_v2, %v1362_v6  ;;  %v1378_v60 = vld [vmem:[%s10693_s22 + $0x6e0] sm:$0xff]  ;;  %v1383_v6 = vld [vmem:[%s10693_s22 + $0x708] sm:$0xff] }
 0x2a7   : > { %v1055_v9 = vmax.f32 %v933_v62, 0.0  ;;  %v1052_v46 = vmax.f32 %v1010_v20, 0.0  ;;  %v8160_v56 = vcombine.high %v1366_v38, %v1370_v40  ;;  %v8162_v57 = vcombine.high %v1367_v42, %v1371_v45  ;;  %v1386_v5 = vld [vmem:[%s10693_s22 + $0x720] sm:$0xff]  ;;  %v1387_v7 = vld [vmem:[%s10693_s22 + $0x728] sm:$0xff] }
 0x2a8   : > { %v11170_v11 = vpack.c.bf16 %v1054_v4, %v1050_v55  ;;  %v11177_v18 = vpack.c.bf16 %v1049_v10, %v1045_v63  ;;  %v8161_v29 = vcombine.low %v1367_v42, %v1371_v45  ;;  %v1382_v4 = vld [vmem:[%s10693_s22 + $0x700] sm:$0xff]  ;;  %v8167_v8 = vcombine.low %v1374_v58, %v1378_v60 }
 0x2a9   : > { %2792 = vmatpush1.bf16.msra.mxu0 %v8135_v15  ;;  %2958 = vmatpush1.bf16.msra.mxu1 %v8137_v43  ;;  %v11175_v14 = vpack.c.bf16 %v1055_v9, %v1051_v61  ;;  %v1012_v15 = vadd.f32 %v1011_v34, %v10957_v49  ;;  %v1013_v43 = vpop.f32.mrb[18].mxu1  ;;  %v1375_v61 = vld [vmem:[%s10693_s22 + $0x6c8] sm:$0xff]  ;;  %v8176_v10 = vcombine.high %v1382_v4, %v1386_v5  ;;  %v1394_v23 = vld [vmem:[%s10693_s22 + $0x760] sm:$0xff] }
 0x2aa   : > { %2793 = vmatprep.subr.bf16.mxu0 %v8144_v0  ;;  %2959 = vmatprep.subr.bf16.mxu1 %v8146_v1  ;;  %v1014_v47 = vadd.f32 %v1013_v43, %v10952_v44  ;;  %v1015_v48 = vpop.f32.mrb[19].mxu1  ;;  %v1379_v44 = vld [vmem:[%s10693_s22 + $0x6e8] sm:$0xff]  ;;  %v8168_v1 = vcombine.high %v1374_v58, %v1378_v60  ;;  %v8177_v20 = vcombine.low %v1383_v6, %v1387_v7  ;;  %v1398_v42 = vld [vmem:[%s10693_s22 + $0x780] sm:$0xff] }
 0x2ab   : > { %2766 = vmatprep.mubr.bf16.mxu0 %v11175_v14  ;;  %2932 = vmatprep.mubr.bf16.mxu1 %v11175_v14  ;;  %v1053_v54 = vmax.f32 %v1012_v15, 0.0  ;;  %v1016_v55 = vadd.f32 %v1015_v48, %v10957_v49  ;;  %v8159_v49 = vcombine.low %v1366_v38, %v1370_v40  ;;  %v8170_v2 = vcombine.high %v1375_v61, %v1379_v44  ;;  %v1402_v45 = vld [vmem:[%s10693_s22 + $0x7a0] sm:$0xff]  ;;  %v1399_v15 = vld [vmem:[%s10693_s22 + $0x788] sm:$0xff] }
 0x2ac   : > { %2767 = vmatmul.mubr.bf16.gmra.mrb[36].mxu0 %v11170_v11  ;;  %2933 = vmatmul.mubr.bf16.gmra.mrb[36].mxu1 %v11170_v11  ;;  %v1056_v59 = vmax.f32 %v1014_v47, 0.0  ;;  %v8169_v9 = vcombine.low %v1375_v61, %v1379_v44  ;;  %v8175_v38 = vcombine.low %v1382_v4, %v1386_v5  ;;  %v1403_v43 = vld [vmem:[%s10693_s22 + $0x7a8] sm:$0xff]  ;;  %v8192_v48 = vcombine.high %v1398_v42, %v1402_v45  ;;  %v1160_v61 = vld [vmem:[%s10693_s22 + $0x10] sm:$0xff] }
 0x2ad   : > { %2794 = vmatpush1.bf16.msra.mxu0 %v8143_v30  ;;  %2960 = vmatpush1.bf16.msra.mxu1 %v8145_v13  ;;  %v1057_v62 = vmax.f32 %v1016_v55, 0.0  ;;  %v8178_v30 = vcombine.high %v1383_v6, %v1387_v7  ;;  %v1390_v13 = vld [vmem:[%s10693_s22 + $0x740] sm:$0xff]  ;;  %v1407_v55 = vld [vmem:[%s10693_s22 + $0x7c8] sm:$0xff]  ;;  %v8193_v58 = vcombine.low %v1399_v15, %v1403_v43  ;;  %v1164_v44 = vld [vmem:[%s10693_s22 + $0x30] sm:$0xff] }
 0x2ae   : > { %2795 = vmatprep.subr.bf16.mxu0 %v8152_v31  ;;  %2961 = vmatprep.subr.bf16.mxu1 %v8154_v32  ;;  %v11197_v63 = vpack.c.bf16 %v1056_v59, %v1052_v46  ;;  %v1391_v31 = vld [vmem:[%s10693_s22 + $0x748] sm:$0xff]  ;;  %v8184_v34 = vcombine.high %v1390_v13, %v1394_v23  ;;  %v8183_v46 = vcombine.low %v1390_v13, %v1394_v23  ;;  %v1168_v5 = vld [vmem:[%s10693_s22 + $0x50] sm:$0xff]  ;;  %v1169_v7 = vld [vmem:[%s10693_s22 + $0x58] sm:$0xff] }
 0x2af   : > { %2809 = vmatprep.mubr.bf16.mxu0 %v11017_v41  ;;  %2975 = vmatprep.mubr.bf16.mxu1 %v11017_v41  ;;  %v11199_v0 = vpack.c.bf16 %v1057_v62, %v1053_v54  ;;  %v1395_v32 = vld [vmem:[%s10693_s22 + $0x768] sm:$0xff]  ;;  %v1410_v54 = vld [vmem:[%s10693_s22 + $0x7e0] sm:$0xff]  ;;  %v1161_v62 = vld [vmem:[%s10693_s22 + $0x18] sm:$0xff] }
 0x2b0   : > { %v8186_v40 = vcombine.high %v1391_v31, %v1395_v32  ;;  %v8185_v47 = vcombine.low %v1391_v31, %v1395_v32  ;;  %v1172_v6 = vld [vmem:[%s10693_s22 + $0x70] sm:$0xff]  ;;  %v1177_v32 = vld [vmem:[%s10693_s22 + $0x98] sm:$0xff] }
 0x2b1   : > { %2796 = vmatpush1.bf16.msra.mxu0 %v8151_v52  ;;  %2962 = vmatpush1.bf16.msra.mxu1 %v8153_v53  ;;  %v8194_v52 = vcombine.high %v1399_v15, %v1403_v43  ;;  %v1406_v53 = vld [vmem:[%s10693_s22 + $0x7c0] sm:$0xff]  ;;  %v1176_v23 = vld [vmem:[%s10693_s22 + $0x90] sm:$0xff]  ;;  %v1185_v43 = vld [vmem:[%s10693_s22 + $0xd8] sm:$0xff] }
 0x2b2   : > { %2797 = vmatprep.subr.bf16.mxu0 %v8160_v56  ;;  %2963 = vmatprep.subr.bf16.mxu1 %v8162_v57  ;;  %v1411_v56 = vld [vmem:[%s10693_s22 + $0x7e8] sm:$0xff]  ;;  %v8191_v57 = vcombine.low %v1398_v42, %v1402_v45  ;;  %v8200_v59 = vcombine.high %v1406_v53, %v1410_v54  ;;  %v1180_v31 = vld [vmem:[%s10693_s22 + $0xb0] sm:$0xff] }
 0x2b3   : > { %v8202_v60 = vcombine.high %v1407_v55, %v1411_v56  ;;  %v1184_v45 = vld [vmem:[%s10693_s22 + $0xd0] sm:$0xff] }
 0x2b4   : > { %v1188_v15 = vld [vmem:[%s10693_s22 + $0xf0] sm:$0xff] }
 0x2b5   : > { %2798 = vmatpush1.bf16.msra.mxu0 %v8159_v49  ;;  %2964 = vmatpush1.bf16.msra.mxu1 %v8161_v29  ;;  %v1165_v49 = vld [vmem:[%s10693_s22 + $0x38] sm:$0xff]  ;;  %v8199_v29 = vcombine.low %v1406_v53, %v1410_v54  ;;  %v1192_v54 = vld [vmem:[%s10693_s22 + $0x110] sm:$0xff] }
 0x2b6   : > { %2799 = vmatprep.subr.bf16.mxu0 %v8168_v1  ;;  %2965 = vmatprep.subr.bf16.mxu1 %v8170_v2  ;;  %v8201_v1 = vcombine.low %v1407_v55, %v1411_v56  ;;  %v7956_v2 = vcombine.high %v1160_v61, %v1164_v44  ;;  %v7958_v4 = vcombine.high %v1161_v62, %v1165_v49  ;;  %v1196_v55 = vld [vmem:[%s10693_s22 + $0x130] sm:$0xff]  ;;  %v1193_v56 = vld [vmem:[%s10693_s22 + $0x118] sm:$0xff] }
 0x2b9   : > { %2800 = vmatpush1.bf16.msra.mxu0 %v8167_v8  ;;  %2966 = vmatpush1.bf16.msra.mxu1 %v8169_v9  ;;  %v1173_v8 = vld [vmem:[%s10693_s22 + $0x78] sm:$0xff]  ;;  %v7955_v9 = vcombine.low %v1160_v61, %v1164_v44  ;;  %v1200_v44 = vld [vmem:[%s10693_s22 + $0x150] sm:$0xff] }
 0x2ba   : > { %2801 = vmatprep.subr.bf16.mxu0 %v8176_v10  ;;  %2967 = vmatprep.subr.bf16.mxu1 %v8178_v30  ;;  %v7957_v10 = vcombine.low %v1161_v62, %v1165_v49  ;;  %v7964_v30 = vcombine.high %v1168_v5, %v1172_v6  ;;  %v7966_v13 = vcombine.high %v1169_v7, %v1173_v8  ;;  %v1204_v62 = vld [vmem:[%s10693_s22 + $0x170] sm:$0xff]  ;;  %v1201_v49 = vld [vmem:[%s10693_s22 + $0x158] sm:$0xff] }
 0x2bd   : > { %2802 = vmatpush1.bf16.msra.mxu0 %v8175_v38  ;;  %2968 = vmatpush1.bf16.msra.mxu1 %v8177_v20  ;;  %v1181_v38 = vld [vmem:[%s10693_s22 + $0xb8] sm:$0xff]  ;;  %v7963_v20 = vcombine.low %v1168_v5, %v1172_v6  ;;  %v1208_v6 = vld [vmem:[%s10693_s22 + $0x190] sm:$0xff] }
 0x2be   : > { %2803 = vmatprep.subr.bf16.mxu0 %v8184_v34  ;;  %2969 = vmatprep.subr.bf16.mxu1 %v8186_v40  ;;  %v7965_v34 = vcombine.low %v1169_v7, %v1173_v8  ;;  %v7972_v40 = vcombine.high %v1176_v23, %v1180_v31  ;;  %v7974_v42 = vcombine.high %v1177_v32, %v1181_v38  ;;  %v1212_v7 = vld [vmem:[%s10693_s22 + $0x1b0] sm:$0xff]  ;;  %v1209_v8 = vld [vmem:[%s10693_s22 + $0x198] sm:$0xff] }
 0x2c1   : > { %2804 = vmatpush1.bf16.msra.mxu0 %v8183_v46  ;;  %2970 = vmatpush1.bf16.msra.mxu1 %v8185_v47  ;;  %v1189_v46 = vld [vmem:[%s10693_s22 + $0xf8] sm:$0xff]  ;;  %v7971_v47 = vcombine.low %v1176_v23, %v1180_v31  ;;  %v1216_v31 = vld [vmem:[%s10693_s22 + $0x1d0] sm:$0xff] }
 0x2c2   : > { %2805 = vmatprep.subr.bf16.mxu0 %v8192_v48  ;;  %2971 = vmatprep.subr.bf16.mxu1 %v8194_v52  ;;  %v7973_v48 = vcombine.low %v1177_v32, %v1181_v38  ;;  %v7980_v52 = vcombine.high %v1184_v45, %v1188_v15  ;;  %v7982_v53 = vcombine.high %v1185_v43, %v1189_v46  ;;  %v1220_v32 = vld [vmem:[%s10693_s22 + $0x1f0] sm:$0xff]  ;;  %v1217_v38 = vld [vmem:[%s10693_s22 + $0x1d8] sm:$0xff] }
 0x2c5   : > { %2806 = vmatpush1.bf16.msra.mxu0 %v8191_v57  ;;  %2972 = vmatpush1.bf16.msra.mxu1 %v8193_v58  ;;  %v1197_v57 = vld [vmem:[%s10693_s22 + $0x138] sm:$0xff]  ;;  %v7979_v58 = vcombine.low %v1184_v45, %v1188_v15  ;;  %v1224_v15 = vld [vmem:[%s10693_s22 + $0x210] sm:$0xff] }
 0x2c6   : > { %2807 = vmatprep.subr.bf16.mxu0 %v8200_v59  ;;  %2973 = vmatprep.subr.bf16.mxu1 %v8202_v60  ;;  %v7981_v59 = vcombine.low %v1185_v43, %v1189_v46  ;;  %v7988_v60 = vcombine.high %v1192_v54, %v1196_v55  ;;  %v7990_v61 = vcombine.high %v1193_v56, %v1197_v57  ;;  %v1228_v43 = vld [vmem:[%s10693_s22 + $0x230] sm:$0xff]  ;;  %v1225_v46 = vld [vmem:[%s10693_s22 + $0x218] sm:$0xff] }
 0x2c9   : > { %2808 = vmatpush1.bf16.msra.mxu0 %v8199_v29  ;;  %2974 = vmatpush1.bf16.msra.mxu1 %v8201_v1  ;;  %v1205_v29 = vld [vmem:[%s10693_s22 + $0x178] sm:$0xff]  ;;  %v7987_v1 = vcombine.low %v1192_v54, %v1196_v55  ;;  %v1232_v55 = vld [vmem:[%s10693_s22 + $0x250] sm:$0xff] }
 0x2ca   : > { %3026 = vmatprep.subr.bf16.mxu0 %v7956_v2  ;;  %3192 = vmatprep.subr.bf16.mxu1 %v7958_v4  ;;  %v7989_v2 = vcombine.low %v1193_v56, %v1197_v57  ;;  %v7996_v4 = vcombine.high %v1200_v44, %v1204_v62  ;;  %v7998_v5 = vcombine.high %v1201_v49, %v1205_v29  ;;  %v1236_v56 = vld [vmem:[%s10693_s22 + $0x270] sm:$0xff]  ;;  %v1233_v57 = vld [vmem:[%s10693_s22 + $0x258] sm:$0xff] }
 0x2cc   : > { %2810 = vmatmul.mubr.bf16.vlgmr.msra.gmra.mrb[20].mxu0 %v11011_v37  ;;  %2976 = vmatmul.mubr.bf16.vlgmr.msra.gmra.mrb[20].mxu1 %v11011_v37 }
 0x2cd   : > { %3027 = vmatpush1.bf16.msra.mxu0 %v7955_v9  ;;  %3193 = vmatpush1.bf16.msra.mxu1 %v7957_v10  ;;  %v1213_v9 = vld [vmem:[%s10693_s22 + $0x1b8] sm:$0xff]  ;;  %v7995_v10 = vcombine.low %v1200_v44, %v1204_v62  ;;  %v1240_v62 = vld [vmem:[%s10693_s22 + $0x290] sm:$0xff] }
 0x2ce   : > { %3028 = vmatprep.subr.bf16.mxu0 %v7964_v30  ;;  %3194 = vmatprep.subr.bf16.mxu1 %v7966_v13  ;;  %v7997_v30 = vcombine.low %v1201_v49, %v1205_v29  ;;  %v8004_v13 = vcombine.high %v1208_v6, %v1212_v7  ;;  %v8006_v23 = vcombine.high %v1209_v8, %v1213_v9  ;;  %v1244_v49 = vld [vmem:[%s10693_s22 + $0x2b0] sm:$0xff]  ;;  %v1241_v29 = vld [vmem:[%s10693_s22 + $0x298] sm:$0xff] }
 0x2cf   : > { %2819 = vmatprep.mubr.bf16.mxu0 %v11077_v3  ;;  %2985 = vmatprep.mubr.bf16.mxu1 %v11077_v3 }
 0x2d1   : > { %3029 = vmatpush1.bf16.msra.mxu0 %v7963_v20  ;;  %3195 = vmatpush1.bf16.msra.mxu1 %v7965_v34  ;;  %v1221_v20 = vld [vmem:[%s10693_s22 + $0x1f8] sm:$0xff]  ;;  %v8003_v34 = vcombine.low %v1208_v6, %v1212_v7  ;;  %v1248_v7 = vld [vmem:[%s10693_s22 + $0x2d0] sm:$0xff] }
 0x2d2   : > { %3030 = vmatprep.subr.bf16.mxu0 %v7972_v40  ;;  %3196 = vmatprep.subr.bf16.mxu1 %v7974_v42  ;;  %v8005_v40 = vcombine.low %v1209_v8, %v1213_v9  ;;  %v8012_v42 = vcombine.high %v1216_v31, %v1220_v32  ;;  %v8014_v45 = vcombine.high %v1217_v38, %v1221_v20  ;;  %v1252_v8 = vld [vmem:[%s10693_s22 + $0x2f0] sm:$0xff]  ;;  %v1249_v9 = vld [vmem:[%s10693_s22 + $0x2d8] sm:$0xff] }
 0x2d4   : > { %2820 = vmatmul.mubr.bf16.gmra.mrb[24].mxu0 %v11071_v22  ;;  %2986 = vmatmul.mubr.bf16.gmra.mrb[24].mxu1 %v11071_v22 }
 0x2d5   : > { %3031 = vmatpush1.bf16.msra.mxu0 %v7971_v47  ;;  %3197 = vmatpush1.bf16.msra.mxu1 %v7973_v48  ;;  %v1229_v47 = vld [vmem:[%s10693_s22 + $0x238] sm:$0xff]  ;;  %v8011_v48 = vcombine.low %v1216_v31, %v1220_v32  ;;  %v1256_v31 = vld [vmem:[%s10693_s22 + $0x310] sm:$0xff] }
 0x2d6   : > { %3032 = vmatprep.subr.bf16.mxu0 %v7980_v52  ;;  %3198 = vmatprep.subr.bf16.mxu1 %v7982_v53  ;;  %v8013_v52 = vcombine.low %v1217_v38, %v1221_v20  ;;  %v8020_v53 = vcombine.high %v1224_v15, %v1228_v43  ;;  %v8022_v54 = vcombine.high %v1225_v46, %v1229_v47  ;;  %v1260_v32 = vld [vmem:[%s10693_s22 + $0x330] sm:$0xff]  ;;  %v1257_v38 = vld [vmem:[%s10693_s22 + $0x318] sm:$0xff] }
 0x2d7   : > { %2829 = vmatprep.mubr.bf16.mxu0 %v11135_v27  ;;  %2995 = vmatprep.mubr.bf16.mxu1 %v11135_v27  ;;  %v1261_v20 = vld [vmem:[%s10693_s22 + $0x338] sm:$0xff] }
 0x2d9   : > { %3033 = vmatpush1.bf16.msra.mxu0 %v7979_v58  ;;  %3199 = vmatpush1.bf16.msra.mxu1 %v7981_v59  ;;  %v1237_v58 = vld [vmem:[%s10693_s22 + $0x278] sm:$0xff]  ;;  %v8019_v59 = vcombine.low %v1224_v15, %v1228_v43  ;;  %v1264_v15 = vld [vmem:[%s10693_s22 + $0x350] sm:$0xff] }
 0x2da   : > { %3034 = vmatprep.subr.bf16.mxu0 %v7988_v60  ;;  %3200 = vmatprep.subr.bf16.mxu1 %v7990_v61  ;;  %v8021_v60 = vcombine.low %v1225_v46, %v1229_v47  ;;  %v8028_v61 = vcombine.high %v1232_v55, %v1236_v56  ;;  %v8030_v44 = vcombine.high %v1233_v57, %v1237_v58  ;;  %v1268_v43 = vld [vmem:[%s10693_s22 + $0x370] sm:$0xff]  ;;  %v1265_v46 = vld [vmem:[%s10693_s22 + $0x358] sm:$0xff] }
 0x2db   : > { %v1269_v47 = vld [vmem:[%s10693_s22 + $0x378] sm:$0xff] }
 0x2dc   : > { %2830 = vmatmul.mubr.bf16.gmra.mrb[28].mxu0 %v11129_v17  ;;  %2996 = vmatmul.mubr.bf16.gmra.mrb[28].mxu1 %v11129_v17 }
 0x2dd   : > { %3035 = vmatpush1.bf16.msra.mxu0 %v7987_v1  ;;  %3201 = vmatpush1.bf16.msra.mxu1 %v7989_v2  ;;  %v1245_v1 = vld [vmem:[%s10693_s22 + $0x2b8] sm:$0xff]  ;;  %v8027_v2 = vcombine.low %v1232_v55, %v1236_v56  ;;  %v1272_v55 = vld [vmem:[%s10693_s22 + $0x390] sm:$0xff] }
 0x2de   : > { %3036 = vmatprep.subr.bf16.mxu0 %v7996_v4  ;;  %3202 = vmatprep.subr.bf16.mxu1 %v7998_v5  ;;  %v8029_v4 = vcombine.low %v1233_v57, %v1237_v58  ;;  %v8036_v5 = vcombine.high %v1240_v62, %v1244_v49  ;;  %v8038_v6 = vcombine.high %v1241_v29, %v1245_v1  ;;  %v1276_v56 = vld [vmem:[%s10693_s22 + $0x3b0] sm:$0xff]  ;;  %v1273_v57 = vld [vmem:[%s10693_s22 + $0x398] sm:$0xff] }
 0x2df   : > { %2839 = vmatprep.mubr.bf16.mxu0 %v11177_v18  ;;  %3005 = vmatprep.mubr.bf16.mxu1 %v11177_v18  ;;  %v1277_v58 = vld [vmem:[%s10693_s22 + $0x3b8] sm:$0xff] }
 0x2e1   : > { %3037 = vmatpush1.bf16.msra.mxu0 %v7995_v10  ;;  %3203 = vmatpush1.bf16.msra.mxu1 %v7997_v30  ;;  %v1253_v10 = vld [vmem:[%s10693_s22 + $0x2f8] sm:$0xff]  ;;  %v8035_v30 = vcombine.low %v1240_v62, %v1244_v49  ;;  %v1280_v62 = vld [vmem:[%s10693_s22 + $0x3d0] sm:$0xff] }
 0x2e2   : > { %3038 = vmatprep.subr.bf16.mxu0 %v8004_v13  ;;  %3204 = vmatprep.subr.bf16.mxu1 %v8006_v23  ;;  %v8037_v13 = vcombine.low %v1241_v29, %v1245_v1  ;;  %v8046_v23 = vcombine.high %v1249_v9, %v1253_v10  ;;  %v1284_v49 = vld [vmem:[%s10693_s22 + $0x3f0] sm:$0xff]  ;;  %v1281_v29 = vld [vmem:[%s10693_s22 + $0x3d8] sm:$0xff] }
 0x2e3   : > { %v1285_v1 = vld [vmem:[%s10693_s22 + $0x3f8] sm:$0xff] }
 0x2e4   : > { %2840 = vmatmul.mubr.bf16.gmra.mrb[32].mxu0 %v11172_v12  ;;  %3006 = vmatmul.mubr.bf16.gmra.mrb[32].mxu1 %v11172_v12 }
 0x2e5   : > { %3039 = vmatpush1.bf16.msra.mxu0 %v8003_v34  ;;  %3205 = vmatpush1.bf16.msra.mxu1 %v8005_v40  ;;  %v8043_v34 = vcombine.low %v1248_v7, %v1252_v8  ;;  %v8045_v40 = vcombine.low %v1249_v9, %v1253_v10  ;;  %v1289_v9 = vld [vmem:[%s10693_s22 + $0x418] sm:$0xff] }
 0x2e6   : > { %3040 = vmatprep.subr.bf16.mxu0 %v8012_v42  ;;  %3206 = vmatprep.subr.bf16.mxu1 %v8014_v45  ;;  %v8052_v42 = vcombine.high %v1256_v31, %v1260_v32  ;;  %v8054_v45 = vcombine.high %v1257_v38, %v1261_v20  ;;  %v1293_v10 = vld [vmem:[%s10693_s22 + $0x438] sm:$0xff] }
 0x2e7   : > { %2849 = vmatprep.mubr.bf16.mxu0 %v11199_v0  ;;  %3015 = vmatprep.mubr.bf16.mxu1 %v11199_v0 }
 0x2e9   : > { %3041 = vmatpush1.bf16.msra.mxu0 %v8011_v48  ;;  %3207 = vmatpush1.bf16.msra.mxu1 %v8013_v52  ;;  %v8051_v48 = vcombine.low %v1256_v31, %v1260_v32  ;;  %v8053_v52 = vcombine.low %v1257_v38, %v1261_v20  ;;  %v1296_v31 = vld [vmem:[%s10693_s22 + $0x450] sm:$0xff]  ;;  %v1297_v38 = vld [vmem:[%s10693_s22 + $0x458] sm:$0xff] }
 0x2ea   : > { %3042 = vmatprep.subr.bf16.mxu0 %v8020_v53  ;;  %3208 = vmatprep.subr.bf16.mxu1 %v8022_v54  ;;  %v8060_v53 = vcombine.high %v1264_v15, %v1268_v43  ;;  %v8062_v54 = vcombine.high %v1265_v46, %v1269_v47  ;;  %v1300_v32 = vld [vmem:[%s10693_s22 + $0x470] sm:$0xff]  ;;  %v1301_v20 = vld [vmem:[%s10693_s22 + $0x478] sm:$0xff] }
 0x2ec   : > { %2850 = vmatmul.mubr.bf16.gmra.mrb[36].mxu0 %v11197_v63  ;;  %3016 = vmatmul.mubr.bf16.gmra.mrb[36].mxu1 %v11197_v63 }
 0x2ed   : > { %3043 = vmatpush1.bf16.msra.mxu0 %v8019_v59  ;;  %3058 = vmatprep.mubr.bf16.mxu0 %v10961_v51  ;;  %v8059_v59 = vcombine.low %v1264_v15, %v1268_v43  ;;  %v1304_v15 = vld [vmem:[%s10693_s22 + $0x490] sm:$0xff] }
 0x2ee   : > { %3209 = vmatpush1.bf16.msra.mxu1 %v8021_v60  ;;  %3224 = vmatprep.mubr.bf16.mxu1 %v10961_v51  ;;  %v8044_v51 = vcombine.high %v1248_v7, %v1252_v8  ;;  %v8061_v60 = vcombine.low %v1265_v46, %v1269_v47  ;;  %v1288_v7 = vld [vmem:[%s10693_s22 + $0x410] sm:$0xff]  ;;  %v1305_v46 = vld [vmem:[%s10693_s22 + $0x498] sm:$0xff] }
 0x2ef   : > { %3044 = vmatprep.subr.bf16.mxu0 %v8028_v61  ;;  %3210 = vmatprep.subr.bf16.mxu1 %v8030_v44  ;;  %v8068_v61 = vcombine.high %v1272_v55, %v1276_v56  ;;  %v8070_v44 = vcombine.high %v1273_v57, %v1277_v58  ;;  %v1292_v8 = vld [vmem:[%s10693_s22 + $0x430] sm:$0xff]  ;;  %v1309_v47 = vld [vmem:[%s10693_s22 + $0x4b8] sm:$0xff] }
 0x2f0   : > { %v1308_v43 = vld [vmem:[%s10693_s22 + $0x4b0] sm:$0xff] }
 0x2f1   : > { %3045 = vmatpush1.bf16.msra.mxu0 %v8027_v2  ;;  %v8067_v2 = vcombine.low %v1272_v55, %v1276_v56  ;;  %v1312_v55 = vld [vmem:[%s10693_s22 + $0x4d0] sm:$0xff] }
 0x2f2   : > { %3211 = vmatpush1.bf16.msra.mxu1 %v8029_v4  ;;  %3046 = vmatprep.subr.bf16.mxu0 %v8036_v5  ;;  %v8069_v4 = vcombine.low %v1273_v57, %v1277_v58  ;;  %v8076_v5 = vcombine.high %v1280_v62, %v1284_v49  ;;  %v1316_v56 = vld [vmem:[%s10693_s22 + $0x4f0] sm:$0xff]  ;;  %v1317_v57 = vld [vmem:[%s10693_s22 + $0x4f8] sm:$0xff]  ;;  %v8099_v58 = vcombine.low %v1304_v15, %v1308_v43 }
 0x2f3   : > { %3212 = vmatprep.subr.bf16.mxu1 %v8038_v6  ;;  %v8078_v6 = vcombine.high %v1281_v29, %v1285_v1 }
 0x2f5   : > { %3047 = vmatpush1.bf16.msra.mxu0 %v8035_v30  ;;  %v8075_v30 = vcombine.low %v1280_v62, %v1284_v49  ;;  %v1321_v62 = vld [vmem:[%s10693_s22 + $0x518] sm:$0xff] }
 0x2f6   : > { %3213 = vmatpush1.bf16.msra.mxu1 %v8037_v13  ;;  %3048 = vmatprep.subr.bf16.mxu0 %v8044_v51  ;;  %v8077_v13 = vcombine.low %v1281_v29, %v1285_v1  ;;  %v8084_v51 = vcombine.high %v1288_v7, %v1292_v8  ;;  %v1325_v49 = vld [vmem:[%s10693_s22 + $0x538] sm:$0xff]  ;;  %v8107_v29 = vcombine.low %v1312_v55, %v1316_v56 }
 0x2f7   : > { %3214 = vmatprep.subr.bf16.mxu1 %v8046_v23  ;;  %v8086_v23 = vcombine.high %v1289_v9, %v1293_v10 }
 0x2f9   : > { %3049 = vmatpush1.bf16.msra.mxu0 %v8043_v34  ;;  %v8083_v34 = vcombine.low %v1288_v7, %v1292_v8  ;;  %v1333_v7 = vld [vmem:[%s10693_s22 + $0x578] sm:$0xff] }
 0x2fa   : > { %3215 = vmatpush1.bf16.msra.mxu1 %v8045_v40  ;;  %3050 = vmatprep.subr.bf16.mxu0 %v8052_v42  ;;  %v8085_v40 = vcombine.low %v1289_v9, %v1293_v10  ;;  %v8092_v42 = vcombine.high %v1296_v31, %v1300_v32 }
 0x2fb   : > { %3216 = vmatprep.subr.bf16.mxu1 %v8054_v45  ;;  %v8094_v45 = vcombine.high %v1297_v38, %v1301_v20 }
 0x2fd   : > { %3051 = vmatpush1.bf16.msra.mxu0 %v8051_v48  ;;  %v8091_v48 = vcombine.low %v1296_v31, %v1300_v32 }
 0x2fe   : > { %3217 = vmatpush1.bf16.msra.mxu1 %v8053_v52  ;;  %3052 = vmatprep.subr.bf16.mxu0 %v8060_v53  ;;  %v8093_v52 = vcombine.low %v1297_v38, %v1301_v20  ;;  %v8100_v53 = vcombine.high %v1304_v15, %v1308_v43 }
 0x2ff   : > { %3218 = vmatprep.subr.bf16.mxu1 %v8062_v54  ;;  %v8102_v54 = vcombine.high %v1305_v46, %v1309_v47 }
 0x301   : > { %3053 = vmatpush1.bf16.msra.mxu0 %v8059_v59  ;;  %v8108_v59 = vcombine.high %v1312_v55, %v1316_v56 }
 0x302   : > { %3219 = vmatpush1.bf16.msra.mxu1 %v8061_v60  ;;  %3054 = vmatprep.subr.bf16.mxu0 %v8068_v61  ;;  %v1320_v61 = vld [vmem:[%s10693_s22 + $0x510] sm:$0xff] }
 0x303   : > { %3220 = vmatprep.subr.bf16.mxu1 %v8070_v44  ;;  %v1324_v44 = vld [vmem:[%s10693_s22 + $0x530] sm:$0xff] }
 0x304   : > { %v8115_v8 = vcombine.low %v1320_v61, %v1324_v44 }
 0x305   : > { %3055 = vmatpush1.bf16.msra.mxu0 %v8067_v2  ;;  %v8116_v2 = vcombine.high %v1320_v61, %v1324_v44  ;;  %v1368_v61 = vld [vmem:[%s10693_s22 + $0x690] sm:$0xff] }
 0x306   : > { %3221 = vmatpush1.bf16.msra.mxu1 %v8069_v4  ;;  %3056 = vmatprep.subr.bf16.mxu0 %v8076_v5  ;;  %v8118_v4 = vcombine.high %v1321_v62, %v1325_v49  ;;  %v1328_v5 = vld [vmem:[%s10693_s22 + $0x550] sm:$0xff] }
 0x307   : > { %3222 = vmatprep.subr.bf16.mxu1 %v8078_v6  ;;  %v1332_v6 = vld [vmem:[%s10693_s22 + $0x570] sm:$0xff] }
 0x308   : > { %v8124_v9 = vcombine.high %v1328_v5, %v1332_v6  ;;  %v8123_v31 = vcombine.low %v1328_v5, %v1332_v6  ;;  %v1372_v44 = vld [vmem:[%s10693_s22 + $0x6b0] sm:$0xff]  ;;  %v1377_v6 = vld [vmem:[%s10693_s22 + $0x6d8] sm:$0xff] }
 0x309   : > { %3057 = vmatpush1.bf16.msra.mxu0 %v8075_v30  ;;  %v1336_v30 = vld [vmem:[%s10693_s22 + $0x590] sm:$0xff] }
 0x30a   : > { %3223 = vmatpush1.bf16.msra.mxu1 %v8077_v13  ;;  %3109 = vmatprep.subr.bf16.mxu0 %v8084_v51  ;;  %v1340_v13 = vld [vmem:[%s10693_s22 + $0x5b0] sm:$0xff]  ;;  %v1337_v51 = vld [vmem:[%s10693_s22 + $0x598] sm:$0xff] }
 0x30b   : > { %3275 = vmatprep.subr.bf16.mxu1 %v8086_v23  ;;  %v1341_v23 = vld [vmem:[%s10693_s22 + $0x5b8] sm:$0xff]  ;;  %v8132_v38 = vcombine.high %v1336_v30, %v1340_v13  ;;  %v1380_v5 = vld [vmem:[%s10693_s22 + $0x6f0] sm:$0xff] }
 0x30c   : > { %3059 = vmatmul.mubr.bf16.vlgmr.msra.gmra.mrb[40].mxu0 %v10959_v50  ;;  %v8134_v20 = vcombine.high %v1337_v51, %v1341_v23 }
 0x30d   : > { %3225 = vmatmul.mubr.bf16.vlgmr.msra.gmra.mrb[40].mxu1 %v10959_v50  ;;  %3068 = vmatprep.mubr.bf16.mxu0 %v11015_v39  ;;  %v1313_v50 = vld [vmem:[%s10693_s22 + $0x4d8] sm:$0xff] }
 0x30e   : > { %3110 = vmatpush1.bf16.msra.mxu0 %v8083_v34  ;;  %3234 = vmatprep.mubr.bf16.mxu1 %v11015_v39  ;;  %v8101_v39 = vcombine.low %v1305_v46, %v1309_v47  ;;  %v8110_v60 = vcombine.high %v1313_v50, %v1317_v57  ;;  %v8109_v1 = vcombine.low %v1313_v50, %v1317_v57  ;;  %v1344_v34 = vld [vmem:[%s10693_s22 + $0x5d0] sm:$0xff] }
 0x30f   : > { %3276 = vmatpush1.bf16.msra.mxu1 %v8085_v40  ;;  %3111 = vmatprep.subr.bf16.mxu0 %v8092_v42  ;;  %v1348_v40 = vld [vmem:[%s10693_s22 + $0x5f0] sm:$0xff]  ;;  %v1349_v42 = vld [vmem:[%s10693_s22 + $0x5f8] sm:$0xff] }
 0x310   : > { %3277 = vmatprep.subr.bf16.mxu1 %v8094_v45  ;;  %v8131_v45 = vcombine.low %v1336_v30, %v1340_v13  ;;  %v8140_v15 = vcombine.high %v1344_v34, %v1348_v40  ;;  %v1352_v46 = vld [vmem:[%s10693_s22 + $0x610] sm:$0xff]  ;;  %v1385_v30 = vld [vmem:[%s10693_s22 + $0x718] sm:$0xff] }
 0x311   : > { %v1356_v47 = vld [vmem:[%s10693_s22 + $0x630] sm:$0xff]  ;;  %v1389_v13 = vld [vmem:[%s10693_s22 + $0x738] sm:$0xff] }
 0x312   : > { %3112 = vmatpush1.bf16.msra.mxu0 %v8091_v48  ;;  %v1353_v48 = vld [vmem:[%s10693_s22 + $0x618] sm:$0xff]  ;;  %v8148_v55 = vcombine.high %v1352_v46, %v1356_v47  ;;  %v1360_v50 = vld [vmem:[%s10693_s22 + $0x650] sm:$0xff] }
 0x313   : > { %3278 = vmatpush1.bf16.msra.mxu1 %v8093_v52  ;;  %3113 = vmatprep.subr.bf16.mxu0 %v8100_v53  ;;  %v1357_v52 = vld [vmem:[%s10693_s22 + $0x638] sm:$0xff]  ;;  %v8139_v53 = vcombine.low %v1344_v34, %v1348_v40  ;;  %v1364_v57 = vld [vmem:[%s10693_s22 + $0x670] sm:$0xff] }
 0x314   : > { %3069 = vmatmul.mubr.bf16.gmra.mrb[44].mxu0 %v11009_v35  ;;  %3279 = vmatprep.subr.bf16.mxu1 %v8102_v54  ;;  %v8150_v56 = vcombine.high %v1353_v48, %v1357_v52  ;;  %v1393_v34 = vld [vmem:[%s10693_s22 + $0x758] sm:$0xff] }
 0x315   : > { %3235 = vmatmul.mubr.bf16.gmra.mrb[44].mxu1 %v11009_v35  ;;  %3078 = vmatprep.mubr.bf16.mxu0 %v11075_v24  ;;  %v1329_v35 = vld [vmem:[%s10693_s22 + $0x558] sm:$0xff] }
 0x316   : > { %3114 = vmatpush1.bf16.msra.mxu0 %v8099_v58  ;;  %3244 = vmatprep.mubr.bf16.mxu1 %v11075_v24  ;;  %v8117_v24 = vcombine.low %v1321_v62, %v1325_v49  ;;  %v8126_v10 = vcombine.high %v1329_v35, %v1333_v7  ;;  %v8125_v32 = vcombine.low %v1329_v35, %v1333_v7  ;;  %v1365_v58 = vld [vmem:[%s10693_s22 + $0x678] sm:$0xff] }
 0x317   : > { %3280 = vmatpush1.bf16.msra.mxu1 %v8101_v39  ;;  %3115 = vmatprep.subr.bf16.mxu0 %v8108_v59  ;;  %v8147_v39 = vcombine.low %v1352_v46, %v1356_v47  ;;  %v8156_v59 = vcombine.high %v1360_v50, %v1364_v57  ;;  %v1369_v62 = vld [vmem:[%s10693_s22 + $0x698] sm:$0xff]  ;;  %v8163_v7 = vcombine.low %v1368_v61, %v1372_v44 }
 0x318   : > { %3281 = vmatprep.subr.bf16.mxu1 %v8110_v60  ;;  %v1373_v49 = vld [vmem:[%s10693_s22 + $0x6b8] sm:$0xff] }
 0x319   : > { %v1381_v35 = vld [vmem:[%s10693_s22 + $0x6f8] sm:$0xff] }
 0x31a   : > { %3116 = vmatpush1.bf16.msra.mxu0 %v8107_v29  ;;  %v8155_v29 = vcombine.low %v1360_v50, %v1364_v57  ;;  %v1397_v40 = vld [vmem:[%s10693_s22 + $0x778] sm:$0xff] }
 0x31b   : > { %3282 = vmatpush1.bf16.msra.mxu1 %v8109_v1  ;;  %3117 = vmatprep.subr.bf16.mxu0 %v8116_v2  ;;  %v8164_v2 = vcombine.high %v1368_v61, %v1372_v44  ;;  %v1401_v46 = vld [vmem:[%s10693_s22 + $0x798] sm:$0xff] }
 0x31c   : > { %3079 = vmatmul.mubr.bf16.gmra.mrb[48].mxu0 %v11069_v21  ;;  %3283 = vmatprep.subr.bf16.mxu1 %v8118_v4  ;;  %v8166_v4 = vcombine.high %v1369_v62, %v1373_v49  ;;  %v1405_v47 = vld [vmem:[%s10693_s22 + $0x7b8] sm:$0xff] }
 0x31d   : > { %3245 = vmatmul.mubr.bf16.gmra.mrb[48].mxu1 %v11069_v21  ;;  %3088 = vmatprep.mubr.bf16.mxu0 %v11133_v19  ;;  %v1345_v21 = vld [vmem:[%s10693_s22 + $0x5d8] sm:$0xff] }
 0x31e   : > { %3118 = vmatpush1.bf16.msra.mxu0 %v8115_v8  ;;  %3254 = vmatprep.mubr.bf16.mxu1 %v11133_v19  ;;  %v8133_v19 = vcombine.low %v1337_v51, %v1341_v23  ;;  %v8142_v43 = vcombine.high %v1345_v21, %v1349_v42  ;;  %v8141_v54 = vcombine.low %v1345_v21, %v1349_v42  ;;  %v1409_v50 = vld [vmem:[%s10693_s22 + $0x7d8] sm:$0xff] }
 0x31f   : > { %3284 = vmatpush1.bf16.msra.mxu1 %v8117_v24  ;;  %3119 = vmatprep.subr.bf16.mxu0 %v8124_v9  ;;  %v8174_v24 = vcombine.high %v1377_v6, %v1381_v35  ;;  %v1384_v9 = vld [vmem:[%s10693_s22 + $0x710] sm:$0xff]  ;;  %v8173_v23 = vcombine.low %v1377_v6, %v1381_v35  ;;  %v8181_v42 = vcombine.low %v1385_v30, %v1389_v13  ;;  %v1413_v57 = vld [vmem:[%s10693_s22 + $0x7f8] sm:$0xff] }
 0x320   : > { %3285 = vmatprep.subr.bf16.mxu1 %v8126_v10  ;;  %v1388_v10 = vld [vmem:[%s10693_s22 + $0x730] sm:$0xff]  ;;  %v1086_v44 = vld [vmem:[#allocation2 + $0x40] sm:$0xff] }
 0x321   : > { %v8179_v21 = vcombine.low %v1384_v9, %v1388_v10 }
 0x322   : > { %3120 = vmatpush1.bf16.msra.mxu0 %v8123_v31  ;;  %v8180_v31 = vcombine.high %v1384_v9, %v1388_v10  ;;  %v1096_v9 = vld [vmem:[#allocation2 + $0x90] sm:$0xff]  ;;  %v1095_v10 = vld [vmem:[#allocation2 + $0x88] sm:$0xff] }
 0x323   : > { %3286 = vmatpush1.bf16.msra.mxu1 %v8125_v32  ;;  %3121 = vmatprep.subr.bf16.mxu0 %v8132_v38  ;;  %v8182_v32 = vcombine.high %v1385_v30, %v1389_v13  ;;  %v1392_v38 = vld [vmem:[%s10693_s22 + $0x750] sm:$0xff] }
 0x324   : > { %3089 = vmatmul.mubr.bf16.gmra.mrb[52].mxu0 %v11127_v16  ;;  %3287 = vmatprep.subr.bf16.mxu1 %v8134_v20  ;;  %v1396_v20 = vld [vmem:[%s10693_s22 + $0x770] sm:$0xff] }
 0x325   : > { %3255 = vmatmul.mubr.bf16.gmra.mrb[52].mxu1 %v11127_v16  ;;  %3098 = vmatprep.mubr.bf16.mxu0 %v11175_v14  ;;  %v1361_v16 = vld [vmem:[%s10693_s22 + $0x658] sm:$0xff]  ;;  %v1097_v30 = vld [vmem:[#allocation2 + $0x98] sm:$0xff] }
 0x326   : > { %3122 = vmatpush1.bf16.msra.mxu0 %v8131_v45  ;;  %3264 = vmatprep.mubr.bf16.mxu1 %v11175_v14  ;;  %v8149_v14 = vcombine.low %v1353_v48, %v1357_v52  ;;  %v8158_v60 = vcombine.high %v1361_v16, %v1365_v58  ;;  %v8157_v1 = vcombine.low %v1361_v16, %v1365_v58 }
 0x327   : > { %3288 = vmatpush1.bf16.msra.mxu1 %v8133_v19  ;;  %3123 = vmatprep.subr.bf16.mxu0 %v8140_v15  ;;  %v8188_v45 = vcombine.high %v1392_v38, %v1396_v20  ;;  %v8190_v19 = vcombine.high %v1393_v34, %v1397_v40  ;;  %v1400_v15 = vld [vmem:[%s10693_s22 + $0x790] sm:$0xff]  ;;  %v8187_v48 = vcombine.low %v1392_v38, %v1396_v20 }
 0x328   : > { %3289 = vmatprep.subr.bf16.mxu1 %v8142_v43  ;;  %v1404_v43 = vld [vmem:[%s10693_s22 + $0x7b0] sm:$0xff]  ;;  %v8189_v52 = vcombine.low %v1393_v34, %v1397_v40  ;;  %v8197_v58 = vcombine.low %v1401_v46, %v1405_v47  ;;  %v1103_v40 = vld [vmem:[#allocation2 + $0xc8] sm:$0xff] }
 0x329   : > { %v8195_v16 = vcombine.low %v1400_v15, %v1404_v43 }
 0x32a   : > { %3124 = vmatpush1.bf16.msra.mxu0 %v8139_v53  ;;  %v8196_v53 = vcombine.high %v1400_v15, %v1404_v43 }
 0x32b   : > { %3290 = vmatpush1.bf16.msra.mxu1 %v8141_v54  ;;  %3125 = vmatprep.subr.bf16.mxu0 %v8148_v55  ;;  %v8198_v54 = vcombine.high %v1401_v46, %v1405_v47  ;;  %v1408_v55 = vld [vmem:[%s10693_s22 + $0x7d0] sm:$0xff] }
 0x32c   : > { %3099 = vmatmul.mubr.bf16.gmra.mrb[56].mxu0 %v11170_v11  ;;  %3291 = vmatprep.subr.bf16.mxu1 %v8150_v56  ;;  %v1412_v56 = vld [vmem:[%s10693_s22 + $0x7f0] sm:$0xff] }
 0x32d   : > { %3265 = vmatmul.mubr.bf16.gmra.mrb[56].mxu1 %v11170_v11  ;;  %3141 = vmatprep.mubr.bf16.mxu0 %v11017_v41  ;;  %v1376_v11 = vld [vmem:[%s10693_s22 + $0x6d0] sm:$0xff] }
 0x32e   : > { %3126 = vmatpush1.bf16.msra.mxu0 %v8147_v39  ;;  %3307 = vmatprep.mubr.bf16.mxu1 %v11017_v41  ;;  %v8165_v41 = vcombine.low %v1369_v62, %v1373_v49  ;;  %v8172_v8 = vcombine.high %v1376_v11, %v1380_v5  ;;  %v8171_v51 = vcombine.low %v1376_v11, %v1380_v5 }
 0x32f   : > { %3292 = vmatpush1.bf16.msra.mxu1 %v8149_v14  ;;  %3127 = vmatprep.subr.bf16.mxu0 %v8156_v59  ;;  %v8204_v39 = vcombine.high %v1408_v55, %v1412_v56  ;;  %v8206_v14 = vcombine.high %v1409_v50, %v1413_v57  ;;  %v8203_v59 = vcombine.low %v1408_v55, %v1412_v56  ;;  %v1112_v55 = vld [vmem:[#allocation2 + $0x110] sm:$0xff]  ;;  %v1111_v56 = vld [vmem:[#allocation2 + $0x108] sm:$0xff] }
 0x330   : > { %3293 = vmatprep.subr.bf16.mxu1 %v8158_v60  ;;  %v8205_v60 = vcombine.low %v1409_v50, %v1413_v57  ;;  %v1113_v50 = vld [vmem:[#allocation2 + $0x118] sm:$0xff] }
 0x332   : > { %3128 = vmatpush1.bf16.msra.mxu0 %v8155_v29 }
 0x333   : > { %3294 = vmatpush1.bf16.msra.mxu1 %v8157_v1  ;;  %3129 = vmatprep.subr.bf16.mxu0 %v8164_v2  ;;  %v1087_v1 = vld [vmem:[#allocation2 + $0x48] sm:$0xff]  ;;  %v1089_v2 = vld [vmem:[#allocation2 + $0x58] sm:$0xff] }
 0x334   : > { %3295 = vmatprep.subr.bf16.mxu1 %v8166_v4 }
 0x336   : > { %3130 = vmatpush1.bf16.msra.mxu0 %v8163_v7 }
 0x337   : > { %3296 = vmatpush1.bf16.msra.mxu1 %v8165_v41  ;;  %3131 = vmatprep.subr.bf16.mxu0 %v8172_v8 }
 0x338   : > { %3297 = vmatprep.subr.bf16.mxu1 %v8174_v24  ;;  %v1094_v24 = vld [vmem:[#allocation2 + $0x80] sm:$0xff] }
 0x33a   : > { %3132 = vmatpush1.bf16.msra.mxu0 %v8171_v51 }
 0x33b   : > { %3298 = vmatpush1.bf16.msra.mxu1 %v8173_v23  ;;  %3133 = vmatprep.subr.bf16.mxu0 %v8180_v31  ;;  %v1102_v23 = vld [vmem:[#allocation2 + $0xc0] sm:$0xff]  ;;  %v1104_v31 = vld [vmem:[#allocation2 + $0xd0] sm:$0xff] }
 0x33c   : > { %3299 = vmatprep.subr.bf16.mxu1 %v8182_v32 }
 0x33e   : > { %3134 = vmatpush1.bf16.msra.mxu0 %v8179_v21  ;;  %v1105_v21 = vld [vmem:[#allocation2 + $0xd8] sm:$0xff] }
 0x33f   : > { %3300 = vmatpush1.bf16.msra.mxu1 %v8181_v42  ;;  %3135 = vmatprep.subr.bf16.mxu0 %v8188_v45 }
 0x340   : > { %3301 = vmatprep.subr.bf16.mxu1 %v8190_v19 }
 0x342   : > { %3136 = vmatpush1.bf16.msra.mxu0 %v8187_v48 }
 0x343   : > { %3302 = vmatpush1.bf16.msra.mxu1 %v8189_v52  ;;  %3137 = vmatprep.subr.bf16.mxu0 %v8196_v53 }
 0x344   : > { %3303 = vmatprep.subr.bf16.mxu1 %v8198_v54  ;;  %v1110_v54 = vld [vmem:[#allocation2 + $0x100] sm:$0xff] }
 0x346   : > { %3138 = vmatpush1.bf16.msra.mxu0 %v8195_v16 }
 0x347   : > { %3304 = vmatpush1.bf16.msra.mxu1 %v8197_v58  ;;  %3139 = vmatprep.subr.bf16.mxu0 %v8204_v39  ;;  %v1118_v58 = vld [vmem:[#allocation2 + $0x140] sm:$0xff]  ;;  %v1120_v39 = vld [vmem:[#allocation2 + $0x150] sm:$0xff] }
 0x348   : > { %3305 = vmatprep.subr.bf16.mxu1 %v8206_v14 }
 0x34a   : > { %3140 = vmatpush1.bf16.msra.mxu0 %v8203_v59 }
 0x34b   : > { %3306 = vmatpush1.bf16.msra.mxu1 %v8205_v60 }
 0x34d   : > { %3142 = vmatmul.mubr.bf16.vlgmr.msra.gmra.mrb[40].mxu0 %v11011_v37 }
 0x34e   : > { %3308 = vmatmul.mubr.bf16.vlgmr.msra.gmra.mrb[40].mxu1 %v11011_v37  ;;  %3151 = vmatprep.mubr.bf16.mxu0 %v11077_v3  ;;  %v1078_v37 = vld [vmem:[#allocation2] sm:$0xff] }
 0x34f   : > { %3317 = vmatprep.mubr.bf16.mxu1 %v11077_v3  ;;  %v1079_v3 = vld [vmem:[#allocation2 + $0x8] sm:$0xff] }
 0x355   : > { %3152 = vmatmul.mubr.bf16.gmra.mrb[44].mxu0 %v11071_v22 }
 0x356   : > { %3318 = vmatmul.mubr.bf16.gmra.mrb[44].mxu1 %v11071_v22  ;;  %3161 = vmatprep.mubr.bf16.mxu0 %v11135_v27  ;;  %v1080_v22 = vld [vmem:[#allocation2 + $0x10] sm:$0xff] }
 0x357   : > { %3327 = vmatprep.mubr.bf16.mxu1 %v11135_v27 }
 0x35d   : > { %3162 = vmatmul.mubr.bf16.gmra.mrb[48].mxu0 %v11129_v17 }
 0x35e   : > { %3328 = vmatmul.mubr.bf16.gmra.mrb[48].mxu1 %v11129_v17  ;;  %3171 = vmatprep.mubr.bf16.mxu0 %v11177_v18  ;;  %v1081_v17 = vld [vmem:[#allocation2 + $0x18] sm:$0xff] }
 0x35f   : > { %3337 = vmatprep.mubr.bf16.mxu1 %v11177_v18  ;;  %v1088_v18 = vld [vmem:[#allocation2 + $0x50] sm:$0xff] }
 0x365   : > { %3172 = vmatmul.mubr.bf16.gmra.mrb[52].mxu0 %v11172_v12 }
 0x366   : > { %3338 = vmatmul.mubr.bf16.gmra.mrb[52].mxu1 %v11172_v12  ;;  %3181 = vmatprep.mubr.bf16.mxu0 %v11199_v0 }
 0x367   : > { %3347 = vmatprep.mubr.bf16.mxu1 %v11199_v0 }
 0x36d   : > { %3182 = vmatmul.mubr.bf16.gmra.mrb[56].mxu0 %v11197_v63 }
 0x36e   : > { %3348 = vmatmul.mubr.bf16.gmra.mrb[56].mxu1 %v11197_v63 }
 0x39f   : > { %v2811_v27 = vpop.f32.mrb[20].mxu0  ;;  %v2977_v61 = vpop.f32.mrb[20].mxu1 }
 0x3a0   : > { %v3358_v62 = vadd.f32 %v2811_v27, %v1078_v37  ;;  %v3360_v49 = vadd.f32 %v2977_v61, %v1080_v22  ;;  %v2813_v29 = vpop.f32.mrb[21].mxu0  ;;  %v2979_v12 = vpop.f32.mrb[21].mxu1  ;;  %v1119_v22 = vld [vmem:[#allocation2 + $0x148] sm:$0xff] }
 0x3a1   : > { %v3359_v4 = vadd.f32 %v2813_v29, %v1079_v3  ;;  %v3361_v0 = vadd.f32 %v2979_v12, %v1081_v17  ;;  %v2815_v11 = vpop.f32.mrb[22].mxu0  ;;  %v2981_v5 = vpop.f32.mrb[22].mxu1  ;;  %v1121_v3 = vld [vmem:[#allocation2 + $0x158] sm:$0xff] }
 0x3a2   : > { %3438 = vst [vmem:[#allocation2] sm:$0xff] %v3358_v62  ;;  %3440 = vst [vmem:[#allocation2 + $0x10] sm:$0xff] %v3360_v49  ;;  %v3366_v63 = vadd.f32 %v2815_v11, %v1086_v44  ;;  %v3368_v6 = vadd.f32 %v2981_v5, %v1088_v18  ;;  %v2817_v35 = vpop.f32.mrb[23].mxu0  ;;  %v2983_v7 = vpop.f32.mrb[23].mxu1  ;;  %v1129_v11 = vld [vmem:[#allocation2 + $0x198] sm:$0xff] }
 0x3a3   : > { %3439 = vst [vmem:[#allocation2 + $0x8] sm:$0xff] %v3359_v4  ;;  %3441 = vst [vmem:[#allocation2 + $0x18] sm:$0xff] %v3361_v0  ;;  %v3367_v41 = vadd.f32 %v2817_v35, %v1087_v1  ;;  %v3369_v8 = vadd.f32 %v2983_v7, %v1089_v2  ;;  %v1126_v2 = vld [vmem:[#allocation2 + $0x180] sm:$0xff]  ;;  %v1128_v4 = vld [vmem:[#allocation2 + $0x190] sm:$0xff] }
 0x3a4   : > { %3446 = vst [vmem:[#allocation2 + $0x40] sm:$0xff] %v3366_v63  ;;  %3448 = vst [vmem:[#allocation2 + $0x50] sm:$0xff] %v3368_v6  ;;  %v1127_v0 = vld [vmem:[#allocation2 + $0x188] sm:$0xff]  ;;  %v1134_v6 = vld [vmem:[#allocation2 + $0x1c0] sm:$0xff] }
 0x3a5   : > { %3447 = vst [vmem:[#allocation2 + $0x48] sm:$0xff] %v3367_v41  ;;  %3449 = vst [vmem:[#allocation2 + $0x58] sm:$0xff] %v3369_v8  ;;  %v1136_v35 = vld [vmem:[#allocation2 + $0x1d0] sm:$0xff] }
 0x3a7   : > { %v2821_v13 = vpop.f32.mrb[24].mxu0  ;;  %v2987_v51 = vpop.f32.mrb[24].mxu1 }
 0x3a8   : > { %v3374_v32 = vadd.f32 %v2821_v13, %v1094_v24  ;;  %v3376_v38 = vadd.f32 %v2987_v51, %v1096_v9  ;;  %v2823_v20 = vpop.f32.mrb[25].mxu0  ;;  %v2989_v34 = vpop.f32.mrb[25].mxu1  ;;  %v1135_v9 = vld [vmem:[#allocation2 + $0x1c8] sm:$0xff] }
 0x3a9   : > { %v3375_v42 = vadd.f32 %v2823_v20, %v1095_v10  ;;  %v3377_v45 = vadd.f32 %v2989_v34, %v1097_v30  ;;  %v2825_v19 = vpop.f32.mrb[26].mxu0  ;;  %v2991_v15 = vpop.f32.mrb[26].mxu1  ;;  %v1137_v10 = vld [vmem:[#allocation2 + $0x1d8] sm:$0xff] }
 0x3aa   : > { %3454 = vst [vmem:[#allocation2 + $0x80] sm:$0xff] %v3374_v32  ;;  %3456 = vst [vmem:[#allocation2 + $0x90] sm:$0xff] %v3376_v38  ;;  %v3382_v43 = vadd.f32 %v2825_v19, %v1102_v23  ;;  %v3384_v46 = vadd.f32 %v2991_v15, %v1104_v31  ;;  %v2827_v47 = vpop.f32.mrb[27].mxu0  ;;  %v2993_v48 = vpop.f32.mrb[27].mxu1  ;;  %v1145_v19 = vld [vmem:[#allocation2 + $0x218] sm:$0xff] }
 0x3ab   : > { %3455 = vst [vmem:[#allocation2 + $0x88] sm:$0xff] %v3375_v42  ;;  %3457 = vst [vmem:[#allocation2 + $0x98] sm:$0xff] %v3377_v45  ;;  %v3383_v52 = vadd.f32 %v2827_v47, %v1103_v40  ;;  %v3385_v53 = vadd.f32 %v2993_v48, %v1105_v21  ;;  %v1142_v21 = vld [vmem:[#allocation2 + $0x200] sm:$0xff]  ;;  %v1144_v42 = vld [vmem:[#allocation2 + $0x210] sm:$0xff] }
 0x3ac   : > { %3462 = vst [vmem:[#allocation2 + $0xc0] sm:$0xff] %v3382_v43  ;;  %3464 = vst [vmem:[#allocation2 + $0xd0] sm:$0xff] %v3384_v46  ;;  %v1143_v45 = vld [vmem:[#allocation2 + $0x208] sm:$0xff]  ;;  %v1150_v46 = vld [vmem:[#allocation2 + $0x240] sm:$0xff] }
 0x3ad   : > { %3463 = vst [vmem:[#allocation2 + $0xc8] sm:$0xff] %v3383_v52  ;;  %3465 = vst [vmem:[#allocation2 + $0xd8] sm:$0xff] %v3385_v53  ;;  %v1152_v47 = vld [vmem:[#allocation2 + $0x250] sm:$0xff] }
 0x3af   : > { %v2831_v57 = vpop.f32.mrb[28].mxu0  ;;  %v2997_v16 = vpop.f32.mrb[28].mxu1 }
 0x3b0   : > { %v3390_v14 = vadd.f32 %v2831_v57, %v1110_v54  ;;  %v3392_v59 = vadd.f32 %v2997_v16, %v1112_v55  ;;  %v2833_v60 = vpop.f32.mrb[29].mxu0  ;;  %v2999_v37 = vpop.f32.mrb[29].mxu1  ;;  %v1151_v55 = vld [vmem:[#allocation2 + $0x248] sm:$0xff] }
 0x3b1   : > { %v3391_v17 = vadd.f32 %v2833_v60, %v1111_v56  ;;  %v3393_v27 = vadd.f32 %v2999_v37, %v1113_v50  ;;  %v2835_v61 = vpop.f32.mrb[30].mxu0  ;;  %v3001_v44 = vpop.f32.mrb[30].mxu1  ;;  %v1153_v56 = vld [vmem:[#allocation2 + $0x258] sm:$0xff] }
 0x3b2   : > { %3470 = vst [vmem:[#allocation2 + $0x100] sm:$0xff] %v3390_v14  ;;  %3472 = vst [vmem:[#allocation2 + $0x110] sm:$0xff] %v3392_v59  ;;  %v3398_v18 = vadd.f32 %v2835_v61, %v1118_v58  ;;  %v3400_v62 = vadd.f32 %v3001_v44, %v1120_v39  ;;  %v2837_v49 = vpop.f32.mrb[31].mxu0  ;;  %v3003_v29 = vpop.f32.mrb[31].mxu1  ;;  %v1085_v44 = vld [vmem:[#allocation2 + $0x38] sm:$0xff] }
 0x3b3   : > { %3471 = vst [vmem:[#allocation2 + $0x108] sm:$0xff] %v3391_v17  ;;  %3473 = vst [vmem:[#allocation2 + $0x118] sm:$0xff] %v3393_v27  ;;  %v3399_v12 = vadd.f32 %v2837_v49, %v1119_v22  ;;  %v3401_v1 = vadd.f32 %v3003_v29, %v1121_v3  ;;  %v1082_v3 = vld [vmem:[#allocation2 + $0x20] sm:$0xff]  ;;  %v1084_v17 = vld [vmem:[#allocation2 + $0x30] sm:$0xff] }
 0x3b4   : > { %3478 = vst [vmem:[#allocation2 + $0x140] sm:$0xff] %v3398_v18  ;;  %3480 = vst [vmem:[#allocation2 + $0x150] sm:$0xff] %v3400_v62  ;;  %v1083_v27 = vld [vmem:[#allocation2 + $0x28] sm:$0xff]  ;;  %v1090_v18 = vld [vmem:[#allocation2 + $0x60] sm:$0xff] }
 0x3b5   : > { %3479 = vst [vmem:[#allocation2 + $0x148] sm:$0xff] %v3399_v12  ;;  %3481 = vst [vmem:[#allocation2 + $0x158] sm:$0xff] %v3401_v1  ;;  %v1092_v12 = vld [vmem:[#allocation2 + $0x70] sm:$0xff]  ;;  %v1091_v1 = vld [vmem:[#allocation2 + $0x68] sm:$0xff] }
 0x3b7   : > { %v2841_v5 = vpop.f32.mrb[32].mxu0  ;;  %v3007_v63 = vpop.f32.mrb[32].mxu1 }
 0x3b8   : > { %v3406_v7 = vadd.f32 %v2841_v5, %v1126_v2  ;;  %v3408_v41 = vadd.f32 %v3007_v63, %v1128_v4  ;;  %v2843_v8 = vpop.f32.mrb[33].mxu0  ;;  %v3009_v24 = vpop.f32.mrb[33].mxu1  ;;  %v1093_v5 = vld [vmem:[#allocation2 + $0x78] sm:$0xff] }
 0x3b9   : > { %v3407_v30 = vadd.f32 %v2843_v8, %v1127_v0  ;;  %v3409_v13 = vadd.f32 %v3009_v24, %v1129_v11  ;;  %v2845_v51 = vpop.f32.mrb[34].mxu0  ;;  %v3011_v23 = vpop.f32.mrb[34].mxu1 }
 0x3ba   : > { %3486 = vst [vmem:[#allocation2 + $0x180] sm:$0xff] %v3406_v7  ;;  %3488 = vst [vmem:[#allocation2 + $0x190] sm:$0xff] %v3408_v41  ;;  %v3414_v31 = vadd.f32 %v2845_v51, %v1134_v6  ;;  %v3416_v32 = vadd.f32 %v3011_v23, %v1136_v35  ;;  %v2847_v38 = vpop.f32.mrb[35].mxu0  ;;  %v3013_v20 = vpop.f32.mrb[35].mxu1  ;;  %v1101_v23 = vld [vmem:[#allocation2 + $0xb8] sm:$0xff] }
 0x3bb   : > { %3487 = vst [vmem:[#allocation2 + $0x188] sm:$0xff] %v3407_v30  ;;  %3489 = vst [vmem:[#allocation2 + $0x198] sm:$0xff] %v3409_v13  ;;  %v3415_v34 = vadd.f32 %v2847_v38, %v1135_v9  ;;  %v3417_v40 = vadd.f32 %v3013_v20, %v1137_v10  ;;  %v1098_v10 = vld [vmem:[#allocation2 + $0xa0] sm:$0xff]  ;;  %v1100_v30 = vld [vmem:[#allocation2 + $0xb0] sm:$0xff] }
 0x3bc   : > { %3494 = vst [vmem:[#allocation2 + $0x1c0] sm:$0xff] %v3414_v31  ;;  %3496 = vst [vmem:[#allocation2 + $0x1d0] sm:$0xff] %v3416_v32  ;;  %v1099_v13 = vld [vmem:[#allocation2 + $0xa8] sm:$0xff]  ;;  %v1106_v31 = vld [vmem:[#allocation2 + $0xe0] sm:$0xff] }
 0x3bd   : > { %3495 = vst [vmem:[#allocation2 + $0x1c8] sm:$0xff] %v3415_v34  ;;  %3497 = vst [vmem:[#allocation2 + $0x1d8] sm:$0xff] %v3417_v40  ;;  %v1108_v34 = vld [vmem:[#allocation2 + $0xf0] sm:$0xff]  ;;  %v1107_v40 = vld [vmem:[#allocation2 + $0xe8] sm:$0xff] }
 0x3bf   : > { %v2851_v15 = vpop.f32.mrb[36].mxu0  ;;  %v3017_v43 = vpop.f32.mrb[36].mxu1 }
 0x3c0   : > { %v3422_v48 = vadd.f32 %v2851_v15, %v1142_v21  ;;  %v3424_v52 = vadd.f32 %v3017_v43, %v1144_v42  ;;  %v2853_v53 = vpop.f32.mrb[37].mxu0  ;;  %v3019_v54 = vpop.f32.mrb[37].mxu1  ;;  %v1109_v15 = vld [vmem:[#allocation2 + $0xf8] sm:$0xff] }
 0x3c1   : > { %v3423_v50 = vadd.f32 %v2853_v53, %v1143_v45  ;;  %v3425_v57 = vadd.f32 %v3019_v54, %v1145_v19  ;;  %v2855_v16 = vpop.f32.mrb[38].mxu0  ;;  %v3021_v58 = vpop.f32.mrb[38].mxu1 }
 0x3c2   : > { %3502 = vst [vmem:[#allocation2 + $0x200] sm:$0xff] %v3422_v48  ;;  %3504 = vst [vmem:[#allocation2 + $0x210] sm:$0xff] %v3424_v52  ;;  %v3430_v39 = vadd.f32 %v2855_v16, %v1150_v46  ;;  %v3432_v14 = vadd.f32 %v3021_v58, %v1152_v47  ;;  %v2857_v59 = vpop.f32.mrb[39].mxu0  ;;  %v3023_v60 = vpop.f32.mrb[39].mxu1  ;;  %v1117_v58 = vld [vmem:[#allocation2 + $0x138] sm:$0xff] }
 0x3c3   : > { %3503 = vst [vmem:[#allocation2 + $0x208] sm:$0xff] %v3423_v50  ;;  %3505 = vst [vmem:[#allocation2 + $0x218] sm:$0xff] %v3425_v57  ;;  %v3431_v37 = vadd.f32 %v2857_v59, %v1151_v55  ;;  %v3433_v22 = vadd.f32 %v3023_v60, %v1153_v56  ;;  %v1114_v56 = vld [vmem:[#allocation2 + $0x120] sm:$0xff]  ;;  %v1116_v50 = vld [vmem:[#allocation2 + $0x130] sm:$0xff] }
 0x3c4   : > { %3510 = vst [vmem:[#allocation2 + $0x240] sm:$0xff] %v3430_v39  ;;  %3512 = vst [vmem:[#allocation2 + $0x250] sm:$0xff] %v3432_v14  ;;  %v1115_v57 = vld [vmem:[#allocation2 + $0x128] sm:$0xff]  ;;  %v1122_v39 = vld [vmem:[#allocation2 + $0x160] sm:$0xff] }
 0x3c5   : > { %3511 = vst [vmem:[#allocation2 + $0x248] sm:$0xff] %v3431_v37  ;;  %3513 = vst [vmem:[#allocation2 + $0x258] sm:$0xff] %v3433_v22  ;;  %v1124_v37 = vld [vmem:[#allocation2 + $0x170] sm:$0xff]  ;;  %v1123_v22 = vld [vmem:[#allocation2 + $0x168] sm:$0xff] }
 0x420   : > { %v3143_v61 = vpop.f32.mrb[40].mxu0 }
 0x421   : > { %v3362_v62 = vadd.f32 %v3143_v61, %v1082_v3  ;;  %v3309_v49 = vpop.f32.mrb[40].mxu1  ;;  %v3145_v29 = vpop.f32.mrb[41].mxu0 }
 0x422   : > { %v3364_v2 = vadd.f32 %v3309_v49, %v1084_v17  ;;  %v3363_v4 = vadd.f32 %v3145_v29, %v1083_v27  ;;  %v3311_v0 = vpop.f32.mrb[41].mxu1  ;;  %v3147_v11 = vpop.f32.mrb[42].mxu0 }
 0x423   : > { %3442 = vst [vmem:[#allocation2 + $0x20] sm:$0xff] %v3362_v62  ;;  %v3365_v63 = vadd.f32 %v3311_v0, %v1085_v44  ;;  %v3370_v6 = vadd.f32 %v3147_v11, %v1090_v18  ;;  %v3313_v35 = vpop.f32.mrb[42].mxu1  ;;  %v3149_v7 = vpop.f32.mrb[43].mxu0  ;;  %v1125_v44 = vld [vmem:[#allocation2 + $0x178] sm:$0xff]  ;;  %v1130_v0 = vld [vmem:[#allocation2 + $0x1a0] sm:$0xff]  ;;  %v1132_v11 = vld [vmem:[#allocation2 + $0x1b0] sm:$0xff] }
 0x424   : > { %3444 = vst [vmem:[#allocation2 + $0x30] sm:$0xff] %v3364_v2  ;;  %3443 = vst [vmem:[#allocation2 + $0x28] sm:$0xff] %v3363_v4  ;;  %v3372_v41 = vadd.f32 %v3313_v35, %v1092_v12  ;;  %v3371_v8 = vadd.f32 %v3149_v7, %v1091_v1  ;;  %v3315_v24 = vpop.f32.mrb[43].mxu1  ;;  %v1138_v35 = vld [vmem:[#allocation2 + $0x1e0] sm:$0xff] }
 0x425   : > { %3445 = vst [vmem:[#allocation2 + $0x38] sm:$0xff] %v3365_v63  ;;  %3450 = vst [vmem:[#allocation2 + $0x60] sm:$0xff] %v3370_v6  ;;  %v3373_v9 = vadd.f32 %v3315_v24, %v1093_v5  ;;  %v1131_v5 = vld [vmem:[#allocation2 + $0x1a8] sm:$0xff]  ;;  %v1133_v6 = vld [vmem:[#allocation2 + $0x1b8] sm:$0xff] }
 0x426   : > { %3452 = vst [vmem:[#allocation2 + $0x70] sm:$0xff] %v3372_v41  ;;  %3451 = vst [vmem:[#allocation2 + $0x68] sm:$0xff] %v3371_v8  ;;  %v1140_v24 = vld [vmem:[#allocation2 + $0x1f0] sm:$0xff] }
 0x427   : > { %3453 = vst [vmem:[#allocation2 + $0x78] sm:$0xff] %v3373_v9  ;;  %v1139_v9 = vld [vmem:[#allocation2 + $0x1e8] sm:$0xff] }
 0x428   : > { %v3153_v51 = vpop.f32.mrb[44].mxu0 }
 0x429   : > { %v3378_v32 = vadd.f32 %v3153_v51, %v1098_v10  ;;  %v3319_v38 = vpop.f32.mrb[44].mxu1  ;;  %v3155_v20 = vpop.f32.mrb[45].mxu0 }
 0x42a   : > { %v3380_v21 = vadd.f32 %v3319_v38, %v1100_v30  ;;  %v3379_v42 = vadd.f32 %v3155_v20, %v1099_v13  ;;  %v3321_v45 = vpop.f32.mrb[45].mxu1  ;;  %v3157_v19 = vpop.f32.mrb[46].mxu0 }
 0x42b   : > { %3458 = vst [vmem:[#allocation2 + $0xa0] sm:$0xff] %v3378_v32  ;;  %v3381_v43 = vadd.f32 %v3321_v45, %v1101_v23  ;;  %v3386_v46 = vadd.f32 %v3157_v19, %v1106_v31  ;;  %v3323_v47 = vpop.f32.mrb[46].mxu1  ;;  %v3159_v48 = vpop.f32.mrb[47].mxu0  ;;  %v1141_v23 = vld [vmem:[#allocation2 + $0x1f8] sm:$0xff]  ;;  %v1146_v45 = vld [vmem:[#allocation2 + $0x220] sm:$0xff]  ;;  %v1148_v19 = vld [vmem:[#allocation2 + $0x230] sm:$0xff] }
 0x42c   : > { %3460 = vst [vmem:[#allocation2 + $0xb0] sm:$0xff] %v3380_v21  ;;  %3459 = vst [vmem:[#allocation2 + $0xa8] sm:$0xff] %v3379_v42  ;;  %v3388_v52 = vadd.f32 %v3323_v47, %v1108_v34  ;;  %v3387_v53 = vadd.f32 %v3159_v48, %v1107_v40  ;;  %v3325_v54 = vpop.f32.mrb[47].mxu1  ;;  %v1154_v47 = vld [vmem:[#allocation2 + $0x260] sm:$0xff] }
 0x42d   : > { %3461 = vst [vmem:[#allocation2 + $0xb8] sm:$0xff] %v3381_v43  ;;  %3466 = vst [vmem:[#allocation2 + $0xe0] sm:$0xff] %v3386_v46  ;;  %v3389_v55 = vadd.f32 %v3325_v54, %v1109_v15  ;;  %v1147_v15 = vld [vmem:[#allocation2 + $0x228] sm:$0xff]  ;;  %v1149_v46 = vld [vmem:[#allocation2 + $0x238] sm:$0xff] }
 0x42e   : > { %3468 = vst [vmem:[#allocation2 + $0xf0] sm:$0xff] %v3388_v52  ;;  %3467 = vst [vmem:[#allocation2 + $0xe8] sm:$0xff] %v3387_v53  ;;  %v1156_v54 = vld [vmem:[#allocation2 + $0x270] sm:$0xff] }
 0x42f   : > { %3469 = vst [vmem:[#allocation2 + $0xf8] sm:$0xff] %v3389_v55  ;;  %v1155_v55 = vld [vmem:[#allocation2 + $0x268] sm:$0xff] }
 0x430   : > { %v3163_v16 = vpop.f32.mrb[48].mxu0 }
 0x431   : > { %v3394_v14 = vadd.f32 %v3163_v16, %v1114_v56  ;;  %v3329_v59 = vpop.f32.mrb[48].mxu1  ;;  %v3165_v60 = vpop.f32.mrb[49].mxu0 }
 0x432   : > { %v3396_v3 = vadd.f32 %v3329_v59, %v1116_v50  ;;  %v3395_v17 = vadd.f32 %v3165_v60, %v1115_v57  ;;  %v3331_v27 = vpop.f32.mrb[49].mxu1  ;;  %v3167_v61 = vpop.f32.mrb[50].mxu0 }
 0x433   : > { %3474 = vst [vmem:[#allocation2 + $0x120] sm:$0xff] %v3394_v14  ;;  %v3397_v18 = vadd.f32 %v3331_v27, %v1117_v58  ;;  %v3402_v62 = vadd.f32 %v3167_v61, %v1122_v39  ;;  %v3333_v49 = vpop.f32.mrb[50].mxu1  ;;  %v3169_v29 = vpop.f32.mrb[51].mxu0  ;;  %v1157_v58 = vld [vmem:[#allocation2 + $0x278] sm:$0xff]  ;;  %v9215_v27 = vld [vmem:[#allocation10 + $0x4] ss:$16 sps:$4 sm:$0xff] (!%p8207_p7)  }
 0x434   : > { %3476 = vst [vmem:[#allocation2 + $0x130] sm:$0xff] %v3396_v3  ;;  %3475 = vst [vmem:[#allocation2 + $0x128] sm:$0xff] %v3395_v17  ;;  %v3404_v12 = vadd.f32 %v3333_v49, %v1124_v37  ;;  %v3403_v1 = vadd.f32 %v3169_v29, %v1123_v22  ;;  %v3335_v2 = vpop.f32.mrb[51].mxu1  ;;  %v9217_v61 = vld [vmem:[#allocation10 + $0xc] ss:$16 sps:$4 sm:$0xff] (!%p8207_p7)   ;;  %5402 = vmatprep.subr.bf16.mxu0 (!%p8207_p7), %v9215_v27 }
 0x435   : > { %3477 = vst [vmem:[#allocation2 + $0x138] sm:$0xff] %v3397_v18  ;;  %3482 = vst [vmem:[#allocation2 + $0x160] sm:$0xff] %v3402_v62  ;;  %v3405_v4 = vadd.f32 %v3335_v2, %v1125_v44  ;;  %v9219_v44 = vld [vmem:[#allocation10] ss:$16 sps:$4 sm:$0xff] (!%p8207_p7)   ;;  %v9220_v18 = vld [vmem:[#allocation10 + $0x8] ss:$16 sps:$4 sm:$0xff] (!%p8207_p7)   ;;  %5734 = vmatprep.subr.bf16.mxu1 (!%p8207_p7), %v9217_v61 }
 0x436   : > { %3484 = vst [vmem:[#allocation2 + $0x170] sm:$0xff] %v3404_v12  ;;  %3483 = vst [vmem:[#allocation2 + $0x168] sm:$0xff] %v3403_v1  ;;  %v9221_v62 = vld [vmem:[#allocation10 + $0x24] ss:$16 sps:$4 sm:$0xff] (!%p8207_p7)   ;;  %5403 = vmatpush1.bf16.msra.mxu0 (!%p8207_p7), %v9219_v44  ;;  %5735 = vmatpush1.bf16.msra.mxu1 (!%p8207_p7), %v9220_v18  ;;  %v9223_v49 = vld [vmem:[#allocation10 + $0x2c] ss:$16 sps:$4 sm:$0xff] (!%p8207_p7)  }
 0x437   : > { %3485 = vst [vmem:[#allocation2 + $0x178] sm:$0xff] %v3405_v4  ;;  %v9225_v29 = vld [vmem:[#allocation10 + $0x20] ss:$16 sps:$4 sm:$0xff] (!%p8207_p7)   ;;  %5404 = vmatprep.subr.bf16.mxu0 (!%p8207_p7), %v9221_v62  ;;  %v9226_v12 = vld [vmem:[#allocation10 + $0x28] ss:$16 sps:$4 sm:$0xff] (!%p8207_p7)   ;;  %5736 = vmatprep.subr.bf16.mxu1 (!%p8207_p7), %v9223_v49 }
 0x438   : > { %v3173_v63 = vpop.f32.mrb[52].mxu0  ;;  %v9227_v1 = vld [vmem:[#allocation10 + $0x44] ss:$16 sps:$4 sm:$0xff] (!%p8207_p7)   ;;  %v9229_v2 = vld [vmem:[#allocation10 + $0x4c] ss:$16 sps:$4 sm:$0xff] (!%p8207_p7)  }
 0x439   : > { %v3410_v7 = vadd.f32 %v3173_v63, %v1130_v0  ;;  %v3339_v41 = vpop.f32.mrb[52].mxu1  ;;  %v3175_v8 = vpop.f32.mrb[53].mxu0  ;;  %v9231_v4 = vld [vmem:[#allocation10 + $0x40] ss:$16 sps:$4 sm:$0xff] (!%p8207_p7)   ;;  %v9232_v0 = vld [vmem:[#allocation10 + $0x48] ss:$16 sps:$4 sm:$0xff] (!%p8207_p7)  }
 0x43a   : > { %v3412_v10 = vadd.f32 %v3339_v41, %v1132_v11  ;;  %v3411_v30 = vadd.f32 %v3175_v8, %v1131_v5  ;;  %v3341_v13 = vpop.f32.mrb[53].mxu1  ;;  %v3177_v51 = vpop.f32.mrb[54].mxu0  ;;  %5405 = vmatpush1.bf16.msra.mxu0 (!%p8207_p7), %v9225_v29  ;;  %5737 = vmatpush1.bf16.msra.mxu1 (!%p8207_p7), %v9226_v12  ;;  %v9233_v11 = vld [vmem:[#allocation10 + $0x64] ss:$16 sps:$4 sm:$0xff] (!%p8207_p7)   ;;  %v9235_v5 = vld [vmem:[#allocation10 + $0x6c] ss:$16 sps:$4 sm:$0xff] (!%p8207_p7)  }
 0x43b   : > { %3490 = vst [vmem:[#allocation2 + $0x1a0] sm:$0xff] %v3410_v7  ;;  %v3413_v31 = vadd.f32 %v3341_v13, %v1133_v6  ;;  %v3418_v32 = vadd.f32 %v3177_v51, %v1138_v35  ;;  %v3343_v38 = vpop.f32.mrb[54].mxu1  ;;  %v3179_v20 = vpop.f32.mrb[55].mxu0  ;;  %5406 = vmatprep.subr.bf16.mxu0 (!%p8207_p7), %v9227_v1  ;;  %5738 = vmatprep.subr.bf16.mxu1 (!%p8207_p7), %v9229_v2  ;;  %v9237_v63 = vld [vmem:[#allocation10 + $0x60] ss:$16 sps:$4 sm:$0xff] (!%p8207_p7)  }
 0x43c   : > { %3492 = vst [vmem:[#allocation2 + $0x1b0] sm:$0xff] %v3412_v10  ;;  %3491 = vst [vmem:[#allocation2 + $0x1a8] sm:$0xff] %v3411_v30  ;;  %v3420_v34 = vadd.f32 %v3343_v38, %v1140_v24  ;;  %v3419_v40 = vadd.f32 %v3179_v20, %v1139_v9  ;;  %v3345_v21 = vpop.f32.mrb[55].mxu1  ;;  %v9238_v6 = vld [vmem:[#allocation10 + $0x68] ss:$16 sps:$4 sm:$0xff] (!%p8207_p7)   ;;  %v3522_v12 = vld [vmem:[#allocation2] sm:$0xff] (!%p8207_p7) }
 0x43d   : > { %3493 = vst [vmem:[#allocation2 + $0x1b8] sm:$0xff] %v3413_v31  ;;  %3498 = vst [vmem:[#allocation2 + $0x1e0] sm:$0xff] %v3418_v32  ;;  %v3421_v42 = vadd.f32 %v3345_v21, %v1141_v23  ;;  %v9239_v35 = vld [vmem:[#allocation10 + $0x84] ss:$16 sps:$4 sm:$0xff] (!%p8207_p7)   ;;  %v9241_v7 = vld [vmem:[#allocation10 + $0x8c] ss:$16 sps:$4 sm:$0xff] (!%p8207_p7)  }
 0x43e   : > { %3500 = vst [vmem:[#allocation2 + $0x1f0] sm:$0xff] %v3420_v34  ;;  %3499 = vst [vmem:[#allocation2 + $0x1e8] sm:$0xff] %v3419_v40  ;;  %5407 = vmatpush1.bf16.msra.mxu0 (!%p8207_p7), %v9231_v4  ;;  %5739 = vmatpush1.bf16.msra.mxu1 (!%p8207_p7), %v9232_v0  ;;  %v9243_v41 = vld [vmem:[#allocation10 + $0x80] ss:$16 sps:$4 sm:$0xff] (!%p8207_p7)   ;;  %v9244_v8 = vld [vmem:[#allocation10 + $0x88] ss:$16 sps:$4 sm:$0xff] (!%p8207_p7)  }
 0x43f   : > { %3501 = vst [vmem:[#allocation2 + $0x1f8] sm:$0xff] %v3421_v42  ;;  %5408 = vmatprep.subr.bf16.mxu0 (!%p8207_p7), %v9233_v11  ;;  %5740 = vmatprep.subr.bf16.mxu1 (!%p8207_p7), %v9235_v5  ;;  %v9245_v24 = vld [vmem:[#allocation10 + $0xa4] ss:$16 sps:$4 sm:$0xff] (!%p8207_p7)   ;;  %v9247_v9 = vld [vmem:[#allocation10 + $0xac] ss:$16 sps:$4 sm:$0xff] (!%p8207_p7)  }
 0x440   : > { %v3183_v43 = vpop.f32.mrb[56].mxu0  ;;  %v9249_v10 = vld [vmem:[#allocation10 + $0xa0] ss:$16 sps:$4 sm:$0xff] (!%p8207_p7)   ;;  %v9250_v30 = vld [vmem:[#allocation10 + $0xa8] ss:$16 sps:$4 sm:$0xff] (!%p8207_p7)  }
 0x441   : > { %v3426_v48 = vadd.f32 %v3183_v43, %v1146_v45  ;;  %v3349_v52 = vpop.f32.mrb[56].mxu1  ;;  %v3185_v53 = vpop.f32.mrb[57].mxu0  ;;  %3521 = sbr.rel (%p8207_p7) target bundleno = 2727 (0xaa7), region = 128  ;;  %v9251_v13 = vld [vmem:[#allocation10 + $0xc4] ss:$16 sps:$4 sm:$0xff] (!%p8207_p7)  }
 0x442   : > { %v3428_v56 = vadd.f32 %v3349_v52, %v1148_v19  ;;  %v3427_v50 = vadd.f32 %v3185_v53, %v1147_v15  ;;  %v3351_v57 = vpop.f32.mrb[57].mxu1  ;;  %v3187_v16 = vpop.f32.mrb[58].mxu0  ;;  %5409 = vmatpush1.bf16.msra.mxu0 (!%p8207_p7), %v9237_v63  ;;  %5741 = vmatpush1.bf16.msra.mxu1 (!%p8207_p7), %v9238_v6  ;;  %v9253_v51 = vld [vmem:[#allocation10 + $0xcc] ss:$16 sps:$4 sm:$0xff] (!%p8207_p7)   ;;  %v9255_v23 = vld [vmem:[#allocation10 + $0xc0] ss:$16 sps:$4 sm:$0xff] (!%p8207_p7)  }
 0x443   : > { %3506 = vst [vmem:[#allocation2 + $0x220] sm:$0xff] %v3426_v48  ;;  %v3429_v39 = vadd.f32 %v3351_v57, %v1149_v46  ;;  %v3434_v14 = vadd.f32 %v3187_v16, %v1154_v47  ;;  %v3353_v59 = vpop.f32.mrb[58].mxu1  ;;  %v3189_v60 = vpop.f32.mrb[59].mxu0  ;;  %5410 = vmatprep.subr.bf16.mxu0 (!%p8207_p7), %v9239_v35  ;;  %5742 = vmatprep.subr.bf16.mxu1 (!%p8207_p7), %v9241_v7  ;;  %v9256_v31 = vld [vmem:[#allocation10 + $0xc8] ss:$16 sps:$4 sm:$0xff] (!%p8207_p7)   ;;  %v3530_v1 = vld [vmem:[#allocation2 + $0x40] sm:$0xff] (!%p8207_p7) }
 0x444   : > { %3508 = vst [vmem:[#allocation2 + $0x230] sm:$0xff] %v3428_v56  ;;  %3507 = vst [vmem:[#allocation2 + $0x228] sm:$0xff] %v3427_v50  ;;  %v3436_v37 = vadd.f32 %v3353_v59, %v1156_v54  ;;  %v3435_v22 = vadd.f32 %v3189_v60, %v1155_v55  ;;  %v3355_v3 = vpop.f32.mrb[59].mxu1  ;;  %v9257_v32 = vld [vmem:[#allocation10 + $0xe4] ss:$16 sps:$4 sm:$0xff] (!%p8207_p7)   ;;  %v3523_v50 = vld [vmem:[#allocation2 + $0x8] sm:$0xff] (!%p8207_p7) }
 0x445   : > { %3509 = vst [vmem:[#allocation2 + $0x238] sm:$0xff] %v3429_v39  ;;  %3514 = vst [vmem:[#allocation2 + $0x260] sm:$0xff] %v3434_v14  ;;  %v3437_v17 = vadd.f32 %v3355_v3, %v1157_v58  ;;  %v9259_v38 = vld [vmem:[#allocation10 + $0xec] ss:$16 sps:$4 sm:$0xff] (!%p8207_p7)   ;;  %v9261_v20 = vld [vmem:[#allocation10 + $0xe0] ss:$16 sps:$4 sm:$0xff] (!%p8207_p7)  }
 0x446   : > { %3516 = vst [vmem:[#allocation2 + $0x270] sm:$0xff] %v3436_v37  ;;  %3515 = vst [vmem:[#allocation2 + $0x268] sm:$0xff] %v3435_v22  ;;  %5411 = vmatpush1.bf16.msra.mxu0 (!%p8207_p7), %v9243_v41  ;;  %5743 = vmatpush1.bf16.msra.mxu1 (!%p8207_p7), %v9244_v8  ;;  %v9262_v34 = vld [vmem:[#allocation10 + $0xe8] ss:$16 sps:$4 sm:$0xff] (!%p8207_p7)   ;;  %v9263_v40 = vld [vmem:[#allocation10 + $0x104] ss:$16 sps:$4 sm:$0xff] (!%p8207_p7)  }
 0x447   : > { %3517 = vst [vmem:[#allocation2 + $0x278] sm:$0xff] %v3437_v17  ;;  %5412 = vmatprep.subr.bf16.mxu0 (!%p8207_p7), %v9245_v24  ;;  %5744 = vmatprep.subr.bf16.mxu1 (!%p8207_p7), %v9247_v9  ;;  %v9265_v21 = vld [vmem:[#allocation10 + $0x10c] ss:$16 sps:$4 sm:$0xff] (!%p8207_p7)   ;;  %v9267_v42 = vld [vmem:[#allocation10 + $0x100] ss:$16 sps:$4 sm:$0xff] (!%p8207_p7)  }
 0x448   : > { %v9268_v45 = vld [vmem:[#allocation10 + $0x108] ss:$16 sps:$4 sm:$0xff]   ;;  %v9269_v19 = vld [vmem:[#allocation10 + $0x124] ss:$16 sps:$4 sm:$0xff]   ;;  %v9271_v15 = vld [vmem:[#allocation10 + $0x12c] ss:$16 sps:$4 sm:$0xff]  }
 0x449   : > { %v9273_v43 = vld [vmem:[#allocation10 + $0x120] ss:$16 sps:$4 sm:$0xff]   ;;  %v9274_v46 = vld [vmem:[#allocation10 + $0x128] ss:$16 sps:$4 sm:$0xff]   ;;  %v9275_v47 = vld [vmem:[#allocation10 + $0x144] ss:$16 sps:$4 sm:$0xff]  }
 0x44a   : > { %5413 = vmatpush1.bf16.msra.mxu0 %v9249_v10  ;;  %5745 = vmatpush1.bf16.msra.mxu1 %v9250_v30  ;;  %v9277_v48 = vld [vmem:[#allocation10 + $0x14c] ss:$16 sps:$4 sm:$0xff]   ;;  %v9279_v52 = vld [vmem:[#allocation10 + $0x140] ss:$16 sps:$4 sm:$0xff]   ;;  %v9280_v53 = vld [vmem:[#allocation10 + $0x148] ss:$16 sps:$4 sm:$0xff]  }
 0x44b   : > { %5414 = vmatprep.subr.bf16.mxu0 %v9251_v13  ;;  %5746 = vmatprep.subr.bf16.mxu1 %v9253_v51  ;;  %v9281_v54 = vld [vmem:[#allocation10 + $0x164] ss:$16 sps:$4 sm:$0xff]   ;;  %v9283_v55 = vld [vmem:[#allocation10 + $0x16c] ss:$16 sps:$4 sm:$0xff]   ;;  %v9285_v56 = vld [vmem:[#allocation10 + $0x160] ss:$16 sps:$4 sm:$0xff]  }
 0x44c   : > { %v3531_v57 = vld [vmem:[#allocation2 + $0x48] sm:$0xff]  ;;  %v9287_v39 = vld [vmem:[#allocation10 + $0x184] ss:$16 sps:$4 sm:$0xff]   ;;  %v9291_v22 = vld [vmem:[#allocation10 + $0x180] ss:$16 sps:$4 sm:$0xff]  }
 0x44d   : > { %v11404_v16 = vld [vmem:[#allocation8] sm:$0xff]  ;;  %v9293_v61 = vld [vmem:[#allocation10 + $0x1a4] ss:$16 sps:$4 sm:$0xff]   ;;  %v9297_v18 = vld [vmem:[#allocation10 + $0x1a0] ss:$16 sps:$4 sm:$0xff]  }
 0x44e   : > { %5415 = vmatpush1.bf16.msra.mxu0 %v9255_v23  ;;  %5747 = vmatpush1.bf16.msra.mxu1 %v9256_v31  ;;  %v9286_v58 = vld [vmem:[#allocation10 + $0x168] ss:$16 sps:$4 sm:$0xff]   ;;  %v11408_v14 = vrot.slane %v11404_v16, %v10931_v28  ;;  %v9289_v59 = vld [vmem:[#allocation10 + $0x18c] ss:$16 sps:$4 sm:$0xff]   ;;  %v11414_v29 = vrot.slane %v11404_v16, %v10927_v26  ;;  %v9299_v2 = vld [vmem:[#allocation10 + $0x1c4] ss:$16 sps:$4 sm:$0xff]  }
 0x44f   : > { %5416 = vmatprep.subr.bf16.mxu0 %v9257_v32  ;;  %5748 = vmatprep.subr.bf16.mxu1 %v9259_v38  ;;  %v9292_v3 = vld [vmem:[#allocation10 + $0x188] ss:$16 sps:$4 sm:$0xff]   ;;  %v9295_v44 = vld [vmem:[#allocation10 + $0x1ac] ss:$16 sps:$4 sm:$0xff]   ;;  %v9303_v5 = vld [vmem:[#allocation10 + $0x1c0] ss:$16 sps:$4 sm:$0xff]  }
 0x450   : > { %v3645_v60 = vadd.f32 %v11408_v14, %v3523_v50  ;;  %v3653_v37 = vadd.f32 %v11408_v14, %v3531_v57  ;;  %v9298_v49 = vld [vmem:[#allocation10 + $0x1a8] ss:$16 sps:$4 sm:$0xff]   ;;  %v9301_v4 = vld [vmem:[#allocation10 + $0x1cc] ss:$16 sps:$4 sm:$0xff]   ;;  %v3644_v0 = vadd.f32 %v11414_v29, %v3522_v12  ;;  %v3652_v11 = vadd.f32 %v11414_v29, %v3530_v1  ;;  %v9305_v6 = vld [vmem:[#allocation10 + $0x1e4] ss:$16 sps:$4 sm:$0xff]  }
 0x451   : > { %v9304_v63 = vld [vmem:[#allocation10 + $0x1c8] ss:$16 sps:$4 sm:$0xff]   ;;  %v9307_v35 = vld [vmem:[#allocation10 + $0x1ec] ss:$16 sps:$4 sm:$0xff]   ;;  %v9309_v8 = vld [vmem:[#allocation10 + $0x1e0] ss:$16 sps:$4 sm:$0xff]  }
 0x452   : > { %5417 = vmatpush1.bf16.msra.mxu0 %v9261_v20  ;;  %5749 = vmatpush1.bf16.msra.mxu1 %v9262_v34  ;;  %v3725_v17 = vmax.f32 %v3645_v60, 0.0  ;;  %v3733_v27 = vmax.f32 %v3653_v37, 0.0  ;;  %v3724_v7 = vmax.f32 %v3644_v0, 0.0  ;;  %v3732_v41 = vmax.f32 %v3652_v11, 0.0  ;;  %v9310_v24 = vld [vmem:[#allocation10 + $0x1e8] ss:$16 sps:$4 sm:$0xff]  }
 0x453   : > { %5418 = vmatprep.subr.bf16.mxu0 %v9263_v40  ;;  %5750 = vmatprep.subr.bf16.mxu1 %v9265_v21  ;;  %v9313_v9 = vld [vmem:[#allocation10 + $0x204] ss:$16 sps:$4 sm:$0xff]   ;;  %v9316_v10 = vld [vmem:[#allocation10 + $0x20c] ss:$16 sps:$4 sm:$0xff]   ;;  %v9311_v13 = vld [vmem:[#allocation10 + $0x200] ss:$16 sps:$4 sm:$0xff]  }
 0x454   : > { %v3805_v62 = vpack.c.bf16 %v3733_v27, %v3725_v17  ;;  %v3804_v30 = vpack.c.bf16 %v3732_v41, %v3724_v7  ;;  %v9314_v51 = vld [vmem:[#allocation10 + $0x208] ss:$16 sps:$4 sm:$0xff]   ;;  %v9319_v23 = vld [vmem:[#allocation10 + $0x224] ss:$16 sps:$4 sm:$0xff]   ;;  %v9322_v31 = vld [vmem:[#allocation10 + $0x22c] ss:$16 sps:$4 sm:$0xff]  }
 0x455   : > { %v3539_v32 = vld [vmem:[#allocation2 + $0x88] sm:$0xff]  ;;  %v9317_v20 = vld [vmem:[#allocation10 + $0x220] ss:$16 sps:$4 sm:$0xff]   ;;  %v9337_v17 = vld [vmem:[#allocation10 + $0x284] ss:$16 sps:$4 sm:$0xff]  }
 0x456   : > { %5419 = vmatpush1.bf16.msra.mxu0 %v9267_v42  ;;  %5751 = vmatpush1.bf16.msra.mxu1 %v9268_v45  ;;  %v3547_v38 = vld [vmem:[#allocation2 + $0xc8] sm:$0xff]  ;;  %v3661_v40 = vadd.f32 %v11408_v14, %v3539_v32  ;;  %v9325_v42 = vld [vmem:[#allocation10 + $0x244] ss:$16 sps:$4 sm:$0xff]  }
 0x457   : > { %5420 = vmatprep.subr.bf16.mxu0 %v9269_v19  ;;  %5752 = vmatprep.subr.bf16.mxu1 %v9271_v15  ;;  %v9320_v34 = vld [vmem:[#allocation10 + $0x228] ss:$16 sps:$4 sm:$0xff]   ;;  %v3669_v21 = vadd.f32 %v11408_v14, %v3547_v38  ;;  %v9328_v45 = vld [vmem:[#allocation10 + $0x24c] ss:$16 sps:$4 sm:$0xff]  }
 0x458   : > { %5434 = vmatprep.mubr.bf16.mxu0 %v3805_v62  ;;  %5766 = vmatprep.mubr.bf16.mxu1 %v3805_v62  ;;  %v3741_v19 = vmax.f32 %v3661_v40, 0.0  ;;  %v9340_v62 = vld [vmem:[#allocation10 + $0x28c] ss:$16 sps:$4 sm:$0xff]  }
 0x459   : > { %v3749_v15 = vmax.f32 %v3669_v21, 0.0  ;;  %v9352_v38 = vld [vmem:[#allocation10 + $0x2cc] ss:$16 sps:$4 sm:$0xff]  }
 0x45a   : > { %5421 = vmatpush1.bf16.msra.mxu0 %v9273_v43  ;;  %5753 = vmatpush1.bf16.msra.mxu1 %v9274_v46  ;;  %v3538_v43 = vld [vmem:[#allocation2 + $0x80] sm:$0xff] }
 0x45b   : > { %5422 = vmatprep.subr.bf16.mxu0 %v9275_v47  ;;  %5754 = vmatprep.subr.bf16.mxu1 %v9277_v48  ;;  %v3546_v46 = vld [vmem:[#allocation2 + $0xc0] sm:$0xff]  ;;  %v3660_v48 = vadd.f32 %v11414_v29, %v3538_v43 }
 0x45c   : > { %v9323_v47 = vld [vmem:[#allocation10 + $0x240] ss:$16 sps:$4 sm:$0xff]  }
 0x45d   : > { %v3740_v50 = vmax.f32 %v3660_v48, 0.0 }
 0x45e   : > { %5423 = vmatpush1.bf16.msra.mxu0 %v9279_v52  ;;  %5755 = vmatpush1.bf16.msra.mxu1 %v9280_v53  ;;  %v3668_v52 = vadd.f32 %v11414_v29, %v3546_v46  ;;  %v9326_v53 = vld [vmem:[#allocation10 + $0x248] ss:$16 sps:$4 sm:$0xff]  }
 0x45f   : > { %5424 = vmatprep.subr.bf16.mxu0 %v9281_v54  ;;  %5756 = vmatprep.subr.bf16.mxu1 %v9283_v55  ;;  %v3813_v54 = vpack.c.bf16 %v3749_v15, %v3741_v19  ;;  %v9331_v55 = vld [vmem:[#allocation10 + $0x264] ss:$16 sps:$4 sm:$0xff]   ;;  %v9350_v19 = vld [vmem:[#allocation10 + $0x2c8] ss:$16 sps:$4 sm:$0xff]  }
 0x460   : > { %v3748_v57 = vmax.f32 %v3668_v52, 0.0  ;;  %v9355_v15 = vld [vmem:[#allocation10 + $0x2e4] ss:$16 sps:$4 sm:$0xff]  }
 0x462   : > { %5425 = vmatpush1.bf16.msra.mxu0 %v9285_v56  ;;  %5757 = vmatpush1.bf16.msra.mxu1 %v9286_v58  ;;  %v9334_v56 = vld [vmem:[#allocation10 + $0x26c] ss:$16 sps:$4 sm:$0xff]   ;;  %v3812_v60 = vpack.c.bf16 %v3748_v57, %v3740_v50 }
 0x463   : > { %5426 = vmatprep.subr.bf16.mxu0 %v9287_v39  ;;  %5758 = vmatprep.subr.bf16.mxu1 %v9289_v59  ;;  %v3555_v58 = vld [vmem:[#allocation2 + $0x108] sm:$0xff]  ;;  %v9329_v59 = vld [vmem:[#allocation10 + $0x260] ss:$16 sps:$4 sm:$0xff]  }
 0x464   : > { %v3563_v39 = vld [vmem:[#allocation2 + $0x148] sm:$0xff]  ;;  %v3677_v37 = vadd.f32 %v11408_v14, %v3555_v58  ;;  %v11436_v58 = vrot.slane %v11404_v16, %v10945_v36 }
 0x466   : > { %5427 = vmatpush1.bf16.msra.mxu0 %v9291_v22  ;;  %5759 = vmatpush1.bf16.msra.mxu1 %v9292_v3  ;;  %v3685_v22 = vadd.f32 %v11408_v14, %v3563_v39  ;;  %v9332_v3 = vld [vmem:[#allocation10 + $0x268] ss:$16 sps:$4 sm:$0xff]   ;;  %v3757_v27 = vmax.f32 %v3677_v37, 0.0 }
 0x467   : > { %5428 = vmatprep.subr.bf16.mxu0 %v9293_v61  ;;  %5760 = vmatprep.subr.bf16.mxu1 %v9295_v44  ;;  %v3554_v44 = vld [vmem:[#allocation2 + $0x100] sm:$0xff] }
 0x468   : > { %v3765_v61 = vmax.f32 %v3685_v22, 0.0 }
 0x46a   : > { %5429 = vmatpush1.bf16.msra.mxu0 %v9297_v18  ;;  %5761 = vmatpush1.bf16.msra.mxu1 %v9298_v49  ;;  %v3562_v18 = vld [vmem:[#allocation2 + $0x140] sm:$0xff]  ;;  %v3676_v49 = vadd.f32 %v11414_v29, %v3554_v44  ;;  %v3821_v1 = vpack.c.bf16 %v3765_v61, %v3757_v27  ;;  %v9362_v44 = vld [vmem:[#allocation10 + $0x308] ss:$16 sps:$4 sm:$0xff]  }
 0x46b   : > { %5430 = vmatprep.subr.bf16.mxu0 %v9299_v2  ;;  %5762 = vmatprep.subr.bf16.mxu1 %v9301_v4  ;;  %v3684_v12 = vadd.f32 %v11414_v29, %v3562_v18  ;;  %v9335_v2 = vld [vmem:[#allocation10 + $0x280] ss:$16 sps:$4 sm:$0xff]   ;;  %v9338_v4 = vld [vmem:[#allocation10 + $0x288] ss:$16 sps:$4 sm:$0xff]   ;;  %v9367_v18 = vld [vmem:[#allocation10 + $0x324] ss:$16 sps:$4 sm:$0xff]  }
 0x46c   : > { %v3756_v0 = vmax.f32 %v3676_v49, 0.0  ;;  %v9359_v27 = vld [vmem:[#allocation10 + $0x300] ss:$16 sps:$4 sm:$0xff]  }
 0x46d   : > { %v3764_v11 = vmax.f32 %v3684_v12, 0.0 }
 0x46e   : > { %5431 = vmatpush1.bf16.msra.mxu0 %v9303_v5  ;;  %5763 = vmatpush1.bf16.msra.mxu1 %v9304_v63  ;;  %v3571_v5 = vld [vmem:[#allocation2 + $0x188] sm:$0xff] }
 0x46f   : > { %5432 = vmatprep.subr.bf16.mxu0 %v9305_v6  ;;  %5764 = vmatprep.subr.bf16.mxu1 %v9307_v35  ;;  %v3579_v63 = vld [vmem:[#allocation2 + $0x1c8] sm:$0xff]  ;;  %v9343_v6 = vld [vmem:[#allocation10 + $0x2a4] ss:$16 sps:$4 sm:$0xff]   ;;  %v3693_v7 = vadd.f32 %v11408_v14, %v3571_v5 }
 0x470   : > { %v9346_v35 = vld [vmem:[#allocation10 + $0x2ac] ss:$16 sps:$4 sm:$0xff]   ;;  %v3701_v41 = vadd.f32 %v11408_v14, %v3579_v63  ;;  %v9371_v63 = vld [vmem:[#allocation10 + $0x340] ss:$16 sps:$4 sm:$0xff]  }
 0x471   : > { %v9376_v5 = vld [vmem:[#allocation10 + $0x34c] ss:$16 sps:$4 sm:$0xff]  }
 0x472   : > { %5433 = vmatpush1.bf16.msra.mxu0 %v9309_v8  ;;  %5765 = vmatpush1.bf16.msra.mxu1 %v9310_v24  ;;  %v9341_v8 = vld [vmem:[#allocation10 + $0x2a0] ss:$16 sps:$4 sm:$0xff]   ;;  %v3820_v24 = vpack.c.bf16 %v3764_v11, %v3756_v0  ;;  %v9368_v0 = vld [vmem:[#allocation10 + $0x328] ss:$16 sps:$4 sm:$0xff]   ;;  %v9373_v11 = vld [vmem:[#allocation10 + $0x344] ss:$16 sps:$4 sm:$0xff]  }
 0x473   : > { %5485 = vmatprep.subr.bf16.mxu0 %v9313_v9  ;;  %5817 = vmatprep.subr.bf16.mxu1 %v9316_v10  ;;  %v9344_v9 = vld [vmem:[#allocation10 + $0x2a8] ss:$16 sps:$4 sm:$0xff]   ;;  %v3773_v10 = vmax.f32 %v3693_v7, 0.0  ;;  %v9382_v7 = vld [vmem:[#allocation10 + $0x36c] ss:$16 sps:$4 sm:$0xff]  }
 0x475   : > { %5435 = vmatmul.mubr.bf16.vlgmr.msra.gmra.mrb[0].mxu0 %v3804_v30  ;;  %5767 = vmatmul.mubr.bf16.vlgmr.msra.gmra.mrb[0].mxu1 %v3804_v30  ;;  %v3781_v30 = vmax.f32 %v3701_v41, 0.0  ;;  %v9377_v41 = vld [vmem:[#allocation10 + $0x360] ss:$16 sps:$4 sm:$0xff]  }
 0x476   : > { %5486 = vmatpush1.bf16.msra.mxu0 %v9311_v13  ;;  %5818 = vmatpush1.bf16.msra.mxu1 %v9314_v51  ;;  %v3570_v13 = vld [vmem:[#allocation2 + $0x180] sm:$0xff] }
 0x477   : > { %5487 = vmatprep.subr.bf16.mxu0 %v9319_v23  ;;  %5819 = vmatprep.subr.bf16.mxu1 %v9322_v31  ;;  %v3578_v51 = vld [vmem:[#allocation2 + $0x1c0] sm:$0xff]  ;;  %v3692_v31 = vadd.f32 %v11414_v29, %v3570_v13 }
 0x478   : > { %5444 = vmatprep.mubr.bf16.mxu0 %v3813_v54  ;;  %5776 = vmatprep.mubr.bf16.mxu1 %v3813_v54  ;;  %v9349_v23 = vld [vmem:[#allocation10 + $0x2c4] ss:$16 sps:$4 sm:$0xff]   ;;  %v3700_v32 = vadd.f32 %v11414_v29, %v3578_v51  ;;  %v9394_v51 = vld [vmem:[#allocation10 + $0x3ac] ss:$16 sps:$4 sm:$0xff]  }
 0x479   : > { %v3772_v40 = vmax.f32 %v3692_v31, 0.0  ;;  %v3586_v54 = vld [vmem:[#allocation2 + $0x200] sm:$0xff]  ;;  %v9392_v31 = vld [vmem:[#allocation10 + $0x3a8] ss:$16 sps:$4 sm:$0xff]  }
 0x47a   : > { %5488 = vmatpush1.bf16.msra.mxu0 %v9317_v20  ;;  %5820 = vmatpush1.bf16.msra.mxu1 %v9320_v34  ;;  %v3829_v20 = vpack.c.bf16 %v3781_v30, %v3773_v10  ;;  %v9347_v34 = vld [vmem:[#allocation10 + $0x2c0] ss:$16 sps:$4 sm:$0xff]   ;;  %v3780_v21 = vmax.f32 %v3700_v32, 0.0  ;;  %v3708_v50 = vadd.f32 %v11414_v29, %v3586_v54  ;;  %v9386_v30 = vld [vmem:[#allocation10 + $0x388] ss:$16 sps:$4 sm:$0xff]   ;;  %v11442_v32 = vrot.slane %v11404_v16, %v10941_v33 }
 0x47b   : > { %5489 = vmatprep.subr.bf16.mxu0 %v9325_v42  ;;  %5821 = vmatprep.subr.bf16.mxu1 %v9328_v45  ;;  %v3587_v42 = vld [vmem:[#allocation2 + $0x208] sm:$0xff]  ;;  %v9383_v10 = vld [vmem:[#allocation10 + $0x380] ss:$16 sps:$4 sm:$0xff]   ;;  %v9391_v13 = vld [vmem:[#allocation10 + $0x3a4] ss:$16 sps:$4 sm:$0xff]  }
 0x47c   : > { %v3595_v45 = vld [vmem:[#allocation2 + $0x248] sm:$0xff]  ;;  %v3709_v43 = vadd.f32 %v11408_v14, %v3587_v42  ;;  %v3828_v48 = vpack.c.bf16 %v3780_v21, %v3772_v40  ;;  %v3788_v37 = vmax.f32 %v3708_v50, 0.0  ;;  %v3541_v21 = vld [vmem:[#allocation2 + $0x98] sm:$0xff]  ;;  %v9403_v16 = vld [vmem:[#allocation10 + $0x3e4] ss:$16 sps:$4 sm:$0xff]  }
 0x47d   : > { %5445 = vmatmul.mubr.bf16.gmra.mrb[4].mxu0 %v3812_v60  ;;  %5777 = vmatmul.mubr.bf16.gmra.mrb[4].mxu1 %v3812_v60  ;;  %v3717_v46 = vadd.f32 %v11408_v14, %v3595_v45  ;;  %v9356_v14 = vld [vmem:[#allocation10 + $0x2e8] ss:$16 sps:$4 sm:$0xff]   ;;  %v9364_v60 = vld [vmem:[#allocation10 + $0x30c] ss:$16 sps:$4 sm:$0xff]   ;;  %v3548_v50 = vld [vmem:[#allocation2 + $0xd0] sm:$0xff] }
 0x47e   : > { %5490 = vmatpush1.bf16.msra.mxu0 %v9323_v47  ;;  %5822 = vmatpush1.bf16.msra.mxu1 %v9326_v53  ;;  %v9358_v47 = vld [vmem:[#allocation10 + $0x2ec] ss:$16 sps:$4 sm:$0xff]   ;;  %v3789_v52 = vmax.f32 %v3709_v43, 0.0  ;;  %v9398_v43 = vld [vmem:[#allocation10 + $0x3c8] ss:$16 sps:$4 sm:$0xff]  }
 0x47f   : > { %5491 = vmatprep.subr.bf16.mxu0 %v9331_v55  ;;  %5823 = vmatprep.subr.bf16.mxu1 %v9334_v56  ;;  %v3797_v53 = vmax.f32 %v3717_v46, 0.0  ;;  %v3594_v55 = vld [vmem:[#allocation2 + $0x240] sm:$0xff]  ;;  %v9400_v40 = vld [vmem:[#allocation10 + $0x3cc] ss:$16 sps:$4 sm:$0xff]  }
 0x480   : > { %5454 = vmatprep.mubr.bf16.mxu0 %v3821_v1  ;;  %5786 = vmatprep.mubr.bf16.mxu1 %v3821_v1  ;;  %v9353_v56 = vld [vmem:[#allocation10 + $0x2e0] ss:$16 sps:$4 sm:$0xff]   ;;  %v3716_v57 = vadd.f32 %v11414_v29, %v3594_v55  ;;  %v9406_v46 = vld [vmem:[#allocation10 + $0x3ec] ss:$16 sps:$4 sm:$0xff]  }
 0x481   : > { %v3837_v39 = vpack.c.bf16 %v3797_v53, %v3789_v52  ;;  %v9401_v52 = vld [vmem:[#allocation10 + $0x3e0] ss:$16 sps:$4 sm:$0xff]   ;;  %v9404_v53 = vld [vmem:[#allocation10 + $0x3e8] ss:$16 sps:$4 sm:$0xff]  }
 0x482   : > { %5492 = vmatpush1.bf16.msra.mxu0 %v9329_v59  ;;  %5824 = vmatpush1.bf16.msra.mxu1 %v9332_v3  ;;  %v9361_v59 = vld [vmem:[#allocation10 + $0x304] ss:$16 sps:$4 sm:$0xff]   ;;  %v3796_v22 = vmax.f32 %v3716_v57, 0.0  ;;  %v3525_v3 = vld [vmem:[#allocation2 + $0x18] sm:$0xff] }
 0x483   : > { %5493 = vmatprep.subr.bf16.mxu0 %v9337_v17  ;;  %5825 = vmatprep.subr.bf16.mxu1 %v9340_v62  ;;  %v3533_v17 = vld [vmem:[#allocation2 + $0x58] sm:$0xff]  ;;  %v3647_v29 = vadd.f32 %v11436_v58, %v3525_v3  ;;  %v9409_v57 = vld [vmem:[#allocation10 + $0x404] ss:$16 sps:$4 sm:$0xff]  }
 0x484   : > { %v3655_v61 = vadd.f32 %v11436_v58, %v3533_v17  ;;  %v9370_v62 = vld [vmem:[#allocation10 + $0x32c] ss:$16 sps:$4 sm:$0xff]   ;;  %v3836_v1 = vpack.c.bf16 %v3796_v22, %v3788_v37  ;;  %v9410_v37 = vld [vmem:[#allocation10 + $0x408] ss:$16 sps:$4 sm:$0xff]   ;;  %v3670_v17 = vadd.f32 %v11442_v32, %v3548_v50 }
 0x485   : > { %5455 = vmatmul.mubr.bf16.gmra.mrb[8].mxu0 %v3820_v24  ;;  %5787 = vmatmul.mubr.bf16.gmra.mrb[8].mxu1 %v3820_v24  ;;  %v3727_v49 = vmax.f32 %v3647_v29, 0.0  ;;  %v9385_v24 = vld [vmem:[#allocation10 + $0x384] ss:$16 sps:$4 sm:$0xff]   ;;  %v3565_v29 = vld [vmem:[#allocation2 + $0x158] sm:$0xff] }
 0x486   : > { %5494 = vmatpush1.bf16.msra.mxu0 %v9335_v2  ;;  %5826 = vmatpush1.bf16.msra.mxu1 %v9338_v4  ;;  %v3735_v12 = vmax.f32 %v3655_v61, 0.0  ;;  %v9365_v4 = vld [vmem:[#allocation10 + $0x320] ss:$16 sps:$4 sm:$0xff]   ;;  %v9415_v61 = vld [vmem:[#allocation10 + $0x424] ss:$16 sps:$4 sm:$0xff]  }
 0x487   : > { %5495 = vmatprep.subr.bf16.mxu0 %v9343_v6  ;;  %5827 = vmatprep.subr.bf16.mxu1 %v9346_v35  ;;  %v9374_v6 = vld [vmem:[#allocation10 + $0x348] ss:$16 sps:$4 sm:$0xff]   ;;  %v9379_v35 = vld [vmem:[#allocation10 + $0x364] ss:$16 sps:$4 sm:$0xff]   ;;  %v9442_v50 = vld [vmem:[#allocation10 + $0x4ac] ss:$16 sps:$4 sm:$0xff]  }
 0x488   : > { %5464 = vmatprep.mubr.bf16.mxu0 %v3829_v20  ;;  %5796 = vmatprep.mubr.bf16.mxu1 %v3829_v20  ;;  %v3807_v2 = vpack.c.bf16 %v3735_v12, %v3727_v49  ;;  %v3532_v20 = vld [vmem:[#allocation2 + $0x50] sm:$0xff] }
 0x489   : > { %v3654_v45 = vadd.f32 %v11442_v32, %v3532_v20 }
 0x48a   : > { %5496 = vmatpush1.bf16.msra.mxu0 %v9341_v8  ;;  %5828 = vmatpush1.bf16.msra.mxu1 %v9344_v9  ;;  %v9380_v8 = vld [vmem:[#allocation10 + $0x368] ss:$16 sps:$4 sm:$0xff]   ;;  %v9388_v9 = vld [vmem:[#allocation10 + $0x38c] ss:$16 sps:$4 sm:$0xff]  }
 0x48b   : > { %5497 = vmatprep.subr.bf16.mxu0 %v9349_v23  ;;  %5829 = vmatprep.subr.bf16.mxu1 %v9352_v38  ;;  %v9389_v23 = vld [vmem:[#allocation10 + $0x3a0] ss:$16 sps:$4 sm:$0xff]   ;;  %v3734_v55 = vmax.f32 %v3654_v45, 0.0 }
 0x48c   : > { %v3524_v38 = vld [vmem:[#allocation2 + $0x10] sm:$0xff] }
 0x48d   : > { %5465 = vmatmul.mubr.bf16.gmra.mrb[12].mxu0 %v3828_v48  ;;  %5797 = vmatmul.mubr.bf16.gmra.mrb[12].mxu1 %v3828_v48  ;;  %v3646_v42 = vadd.f32 %v11442_v32, %v3524_v38  ;;  %v3580_v45 = vld [vmem:[#allocation2 + $0x1d0] sm:$0xff] }
 0x48e   : > { %5498 = vmatpush1.bf16.msra.mxu0 %v9347_v34  ;;  %5830 = vmatpush1.bf16.msra.mxu1 %v9350_v19  ;;  %v9397_v34 = vld [vmem:[#allocation10 + $0x3c4] ss:$16 sps:$4 sm:$0xff]   ;;  %v3549_v19 = vld [vmem:[#allocation2 + $0xd8] sm:$0xff] }
 0x48f   : > { %5499 = vmatprep.subr.bf16.mxu0 %v9355_v15  ;;  %5831 = vmatprep.subr.bf16.mxu1 %v9358_v47  ;;  %v9395_v15 = vld [vmem:[#allocation10 + $0x3c0] ss:$16 sps:$4 sm:$0xff]   ;;  %v3663_v47 = vadd.f32 %v11436_v58, %v3541_v21  ;;  %v3671_v48 = vadd.f32 %v11436_v58, %v3549_v19  ;;  %v3726_v54 = vmax.f32 %v3646_v42, 0.0  ;;  %v9433_v19 = vld [vmem:[#allocation10 + $0x484] ss:$16 sps:$4 sm:$0xff]  }
 0x490   : > { %5474 = vmatprep.mubr.bf16.mxu0 %v3837_v39  ;;  %5806 = vmatprep.mubr.bf16.mxu1 %v3837_v39  ;;  %v9407_v39 = vld [vmem:[#allocation10 + $0x400] ss:$16 sps:$4 sm:$0xff]  }
 0x491   : > { %v3806_v22 = vpack.c.bf16 %v3734_v55, %v3726_v54  ;;  %v3572_v42 = vld [vmem:[#allocation2 + $0x190] sm:$0xff]  ;;  %v9434_v55 = vld [vmem:[#allocation10 + $0x488] ss:$16 sps:$4 sm:$0xff]  }
 0x492   : > { %5500 = vmatpush1.bf16.msra.mxu0 %v9353_v56  ;;  %5832 = vmatpush1.bf16.msra.mxu1 %v9356_v14  ;;  %v3540_v56 = vld [vmem:[#allocation2 + $0x90] sm:$0xff]  ;;  %v9412_v14 = vld [vmem:[#allocation10 + $0x40c] ss:$16 sps:$4 sm:$0xff]  }
 0x493   : > { %5501 = vmatprep.subr.bf16.mxu0 %v9361_v59  ;;  %5833 = vmatprep.subr.bf16.mxu1 %v9364_v60  ;;  %v3743_v59 = vmax.f32 %v3663_v47, 0.0  ;;  %v3751_v60 = vmax.f32 %v3671_v48, 0.0  ;;  %v3662_v3 = vadd.f32 %v11442_v32, %v3540_v56  ;;  %v3694_v48 = vadd.f32 %v11442_v32, %v3572_v42  ;;  %v9431_v54 = vld [vmem:[#allocation10 + $0x480] ss:$16 sps:$4 sm:$0xff]   ;;  %v9439_v56 = vld [vmem:[#allocation10 + $0x4a4] ss:$16 sps:$4 sm:$0xff]  }
 0x494   : > { %v9469_v42 = vld [vmem:[#allocation10 + $0x544] ss:$16 sps:$4 sm:$0xff]  }
 0x495   : > { %5475 = vmatmul.mubr.bf16.gmra.mrb[16].mxu0 %v3836_v1  ;;  %5807 = vmatmul.mubr.bf16.gmra.mrb[16].mxu1 %v3836_v1  ;;  %v3815_v49 = vpack.c.bf16 %v3751_v60, %v3743_v59  ;;  %v3687_v1 = vadd.f32 %v11436_v58, %v3565_v29  ;;  %v3626_v60 = vsub.s32 5, %v10924_v25  ;;  %v3596_v29 = vld [vmem:[#allocation2 + $0x250] sm:$0xff] }
 0x496   : > { %5502 = vmatpush1.bf16.msra.mxu0 %v9359_v27  ;;  %5834 = vmatpush1.bf16.msra.mxu1 %v9362_v44  ;;  %v3557_v27 = vld [vmem:[#allocation2 + $0x118] sm:$0xff] }
 0x497   : > { %5503 = vmatprep.subr.bf16.mxu0 %v9367_v18  ;;  %5835 = vmatprep.subr.bf16.mxu1 %v9370_v62  ;;  %v9418_v44 = vld [vmem:[#allocation10 + $0x42c] ss:$16 sps:$4 sm:$0xff]   ;;  %v9413_v18 = vld [vmem:[#allocation10 + $0x420] ss:$16 sps:$4 sm:$0xff]   ;;  %v9416_v62 = vld [vmem:[#allocation10 + $0x428] ss:$16 sps:$4 sm:$0xff]   ;;  %v3679_v12 = vadd.f32 %v11436_v58, %v3557_v27 }
 0x498   : > { %5517 = vmatprep.mubr.bf16.mxu0 %v3807_v2  ;;  %5849 = vmatprep.mubr.bf16.mxu1 %v3807_v2  ;;  %v9421_v2 = vld [vmem:[#allocation10 + $0x444] ss:$16 sps:$4 sm:$0xff]  }
 0x499   : > { %v3588_v27 = vld [vmem:[#allocation2 + $0x210] sm:$0xff] }
 0x49a   : > { %5504 = vmatpush1.bf16.msra.mxu0 %v9365_v4  ;;  %5836 = vmatpush1.bf16.msra.mxu1 %v9368_v0  ;;  %v3742_v4 = vmax.f32 %v3662_v3, 0.0  ;;  %v3750_v0 = vmax.f32 %v3670_v17, 0.0  ;;  %v9445_v17 = vld [vmem:[#allocation10 + $0x4c4] ss:$16 sps:$4 sm:$0xff]  }
 0x49b   : > { %5505 = vmatprep.subr.bf16.mxu0 %v9373_v11  ;;  %5837 = vmatprep.subr.bf16.mxu1 %v9376_v5  ;;  %v3556_v11 = vld [vmem:[#allocation2 + $0x110] sm:$0xff] }
 0x49c   : > { %v3564_v5 = vld [vmem:[#allocation2 + $0x150] sm:$0xff] }
 0x49e   : > { %5506 = vmatpush1.bf16.msra.mxu0 %v9371_v63  ;;  %5838 = vmatpush1.bf16.msra.mxu1 %v9374_v6  ;;  %v9424_v63 = vld [vmem:[#allocation10 + $0x44c] ss:$16 sps:$4 sm:$0xff]   ;;  %v9419_v6 = vld [vmem:[#allocation10 + $0x440] ss:$16 sps:$4 sm:$0xff]  }
 0x49f   : > { %5507 = vmatprep.subr.bf16.mxu0 %v9379_v35  ;;  %5839 = vmatprep.subr.bf16.mxu1 %v9382_v7  ;;  %v3759_v35 = vmax.f32 %v3679_v12, 0.0  ;;  %v3767_v7 = vmax.f32 %v3687_v1, 0.0  ;;  %v9446_v12 = vld [vmem:[#allocation10 + $0x4c8] ss:$16 sps:$4 sm:$0xff]  }
 0x4a2   : > { %5508 = vmatpush1.bf16.msra.mxu0 %v9377_v41  ;;  %5840 = vmatpush1.bf16.msra.mxu1 %v9380_v8  ;;  %v3573_v41 = vld [vmem:[#allocation2 + $0x198] sm:$0xff]  ;;  %v3814_v8 = vpack.c.bf16 %v3750_v0, %v3742_v4  ;;  %v3718_v4 = vadd.f32 %v11442_v32, %v3596_v29  ;;  %v3527_v0 = vld [vmem:[#allocation2 + $0x28] sm:$0xff] }
 0x4a3   : > { %5509 = vmatprep.subr.bf16.mxu0 %v9385_v24  ;;  %5841 = vmatprep.subr.bf16.mxu1 %v9388_v9  ;;  %v3678_v24 = vadd.f32 %v11442_v32, %v3556_v11  ;;  %v3686_v9 = vadd.f32 %v11442_v32, %v3564_v5  ;;  %v3695_v38 = vadd.f32 %v11436_v58, %v3573_v41  ;;  %v3535_v11 = vld [vmem:[#allocation2 + $0x68] sm:$0xff]  ;;  %v9451_v5 = vld [vmem:[#allocation10 + $0x4e4] ss:$16 sps:$4 sm:$0xff]  }
 0x4a4   : > { %v3551_v29 = vld [vmem:[#allocation2 + $0xe8] sm:$0xff] }
 0x4a5   : > { %v3766_v21 = vmax.f32 %v3686_v9, 0.0  ;;  %v3798_v9 = vmax.f32 %v3718_v4, 0.0  ;;  %v9500_v4 = vld [vmem:[#allocation10 + $0x5e8] ss:$16 sps:$4 sm:$0xff]  }
 0x4a6   : > { %5510 = vmatpush1.bf16.msra.mxu0 %v9383_v10  ;;  %5842 = vmatpush1.bf16.msra.mxu1 %v9386_v30  ;;  %v3581_v10 = vld [vmem:[#allocation2 + $0x1d8] sm:$0xff] }
 0x4a7   : > { %5511 = vmatprep.subr.bf16.mxu0 %v9391_v13  ;;  %5843 = vmatprep.subr.bf16.mxu1 %v9394_v51  ;;  %v9422_v30 = vld [vmem:[#allocation10 + $0x448] ss:$16 sps:$4 sm:$0xff]   ;;  %v9427_v13 = vld [vmem:[#allocation10 + $0x464] ss:$16 sps:$4 sm:$0xff]   ;;  %v9430_v51 = vld [vmem:[#allocation10 + $0x46c] ss:$16 sps:$4 sm:$0xff]   ;;  %v3703_v20 = vadd.f32 %v11436_v58, %v3581_v10 }
 0x4a8   : > { %v9460_v10 = vld [vmem:[#allocation10 + $0x50c] ss:$16 sps:$4 sm:$0xff]  }
 0x4aa   : > { %5512 = vmatpush1.bf16.msra.mxu0 %v9389_v23  ;;  %5844 = vmatpush1.bf16.msra.mxu1 %v9392_v31  ;;  %v9425_v23 = vld [vmem:[#allocation10 + $0x460] ss:$16 sps:$4 sm:$0xff]   ;;  %v3823_v31 = vpack.c.bf16 %v3767_v7, %v3759_v35 }
 0x4ab   : > { %5513 = vmatprep.subr.bf16.mxu0 %v9397_v34  ;;  %5845 = vmatprep.subr.bf16.mxu1 %v9400_v40  ;;  %v9428_v34 = vld [vmem:[#allocation10 + $0x468] ss:$16 sps:$4 sm:$0xff]   ;;  %v3758_v40 = vmax.f32 %v3678_v24, 0.0 }
 0x4ad   : > { %v3822_v47 = vpack.c.bf16 %v3766_v21, %v3758_v40  ;;  %v9461_v40 = vld [vmem:[#allocation10 + $0x520] ss:$16 sps:$4 sm:$0xff]   ;;  %v9464_v21 = vld [vmem:[#allocation10 + $0x528] ss:$16 sps:$4 sm:$0xff]  }
 0x4ae   : > { %5514 = vmatpush1.bf16.msra.mxu0 %v9395_v15  ;;  %5846 = vmatpush1.bf16.msra.mxu1 %v9398_v43  ;;  %v9436_v15 = vld [vmem:[#allocation10 + $0x48c] ss:$16 sps:$4 sm:$0xff]   ;;  %v3775_v43 = vmax.f32 %v3695_v38, 0.0  ;;  %v9463_v38 = vld [vmem:[#allocation10 + $0x524] ss:$16 sps:$4 sm:$0xff]  }
 0x4af   : > { %5515 = vmatprep.subr.bf16.mxu0 %v9403_v16  ;;  %5847 = vmatprep.subr.bf16.mxu1 %v9406_v46  ;;  %v3783_v16 = vmax.f32 %v3703_v20, 0.0  ;;  %v3589_v46 = vld [vmem:[#allocation2 + $0x218] sm:$0xff] }
 0x4b0   : > { %v9466_v20 = vld [vmem:[#allocation10 + $0x52c] ss:$16 sps:$4 sm:$0xff]  }
 0x4b2   : > { %5516 = vmatpush1.bf16.msra.mxu0 %v9401_v52  ;;  %5848 = vmatpush1.bf16.msra.mxu1 %v9404_v53  ;;  %v3702_v52 = vadd.f32 %v11442_v32, %v3580_v45  ;;  %v3597_v53 = vld [vmem:[#allocation2 + $0x258] sm:$0xff] }
 0x4b3   : > { %5568 = vmatprep.subr.bf16.mxu0 %v9409_v57  ;;  %5900 = vmatprep.subr.bf16.mxu1 %v9412_v14  ;;  %v9437_v57 = vld [vmem:[#allocation10 + $0x4a0] ss:$16 sps:$4 sm:$0xff]   ;;  %v3831_v14 = vpack.c.bf16 %v3783_v16, %v3775_v43  ;;  %v3719_v59 = vadd.f32 %v11436_v58, %v3597_v53  ;;  %v9472_v45 = vld [vmem:[#allocation10 + $0x54c] ss:$16 sps:$4 sm:$0xff]   ;;  %v9475_v43 = vld [vmem:[#allocation10 + $0x564] ss:$16 sps:$4 sm:$0xff]  }
 0x4b4   : > { %v3782_v3 = vmax.f32 %v3702_v52, 0.0  ;;  %v9478_v16 = vld [vmem:[#allocation10 + $0x56c] ss:$16 sps:$4 sm:$0xff]   ;;  %v9479_v53 = vld [vmem:[#allocation10 + $0x580] ss:$16 sps:$4 sm:$0xff]  }
 0x4b5   : > { %5518 = vmatmul.mubr.bf16.vlgmr.msra.gmra.mrb[0].mxu0 %v3806_v22  ;;  %5850 = vmatmul.mubr.bf16.vlgmr.msra.gmra.mrb[0].mxu1 %v3806_v22  ;;  %v3774_v22 = vmax.f32 %v3694_v48, 0.0  ;;  %v9481_v48 = vld [vmem:[#allocation10 + $0x584] ss:$16 sps:$4 sm:$0xff]   ;;  %v9484_v52 = vld [vmem:[#allocation10 + $0x58c] ss:$16 sps:$4 sm:$0xff]  }
 0x4b6   : > { %5569 = vmatpush1.bf16.msra.mxu0 %v9407_v39  ;;  %5901 = vmatpush1.bf16.msra.mxu1 %v9410_v37  ;;  %v3711_v39 = vadd.f32 %v11436_v58, %v3589_v46  ;;  %v9440_v37 = vld [vmem:[#allocation10 + $0x4a8] ss:$16 sps:$4 sm:$0xff]   ;;  %v3799_v58 = vmax.f32 %v3719_v59, 0.0  ;;  %v9473_v46 = vld [vmem:[#allocation10 + $0x560] ss:$16 sps:$4 sm:$0xff]  }
 0x4b7   : > { %5570 = vmatprep.subr.bf16.mxu0 %v9415_v61  ;;  %5902 = vmatprep.subr.bf16.mxu1 %v9418_v44  ;;  %v9448_v61 = vld [vmem:[#allocation10 + $0x4cc] ss:$16 sps:$4 sm:$0xff]   ;;  %v9443_v44 = vld [vmem:[#allocation10 + $0x4c0] ss:$16 sps:$4 sm:$0xff]   ;;  %v3830_v1 = vpack.c.bf16 %v3782_v3, %v3774_v22 }
 0x4b8   : > { %5527 = vmatprep.mubr.bf16.mxu0 %v3815_v49  ;;  %5859 = vmatprep.mubr.bf16.mxu1 %v3815_v49  ;;  %v3526_v59 = vld [vmem:[#allocation2 + $0x20] sm:$0xff]  ;;  %v9496_v22 = vld [vmem:[#allocation10 + $0x5cc] ss:$16 sps:$4 sm:$0xff]  }
 0x4b9   : > { %v3543_v3 = vld [vmem:[#allocation2 + $0xa8] sm:$0xff] }
 0x4ba   : > { %5571 = vmatpush1.bf16.msra.mxu0 %v9413_v18  ;;  %5903 = vmatpush1.bf16.msra.mxu1 %v9416_v62  ;;  %v3791_v18 = vmax.f32 %v3711_v39, 0.0  ;;  %v11461_v62 = vld [vmem:[#allocation8] sm:$0xff] }
 0x4bb   : > { %5572 = vmatprep.subr.bf16.mxu0 %v9421_v2  ;;  %5904 = vmatprep.subr.bf16.mxu1 %v9424_v63  ;;  %v11464_v49 = vrot.slane %v11461_v62, %v3626_v60  ;;  %v3710_v2 = vadd.f32 %v11442_v32, %v3588_v27  ;;  %v9454_v63 = vld [vmem:[#allocation10 + $0x4ec] ss:$16 sps:$4 sm:$0xff]   ;;  %v9457_v32 = vld [vmem:[#allocation10 + $0x504] ss:$16 sps:$4 sm:$0xff]  }
 0x4bc   : > { %v3839_v35 = vpack.c.bf16 %v3799_v58, %v3791_v18  ;;  %v3534_v60 = vld [vmem:[#allocation2 + $0x60] sm:$0xff]  ;;  %v9502_v58 = vld [vmem:[#allocation10 + $0x5ec] ss:$16 sps:$4 sm:$0xff]  }
 0x4bd   : > { %5528 = vmatmul.mubr.bf16.gmra.mrb[4].mxu0 %v3814_v8  ;;  %5860 = vmatmul.mubr.bf16.gmra.mrb[4].mxu1 %v3814_v8  ;;  %v3649_v7 = vadd.f32 %v11464_v49, %v3527_v0  ;;  %v3657_v41 = vadd.f32 %v11464_v49, %v3535_v11  ;;  %v9452_v8 = vld [vmem:[#allocation10 + $0x4e8] ss:$16 sps:$4 sm:$0xff]   ;;  %v3790_v24 = vmax.f32 %v3710_v2, 0.0  ;;  %v9499_v18 = vld [vmem:[#allocation10 + $0x5e4] ss:$16 sps:$4 sm:$0xff]   ;;  %v3673_v2 = vadd.f32 %v11464_v49, %v3551_v29 }
 0x4be   : > { %5573 = vmatpush1.bf16.msra.mxu0 %v9419_v6  ;;  %5905 = vmatpush1.bf16.msra.mxu1 %v9422_v30  ;;  %v9449_v6 = vld [vmem:[#allocation10 + $0x4e0] ss:$16 sps:$4 sm:$0xff]  }
 0x4bf   : > { %5574 = vmatprep.subr.bf16.mxu0 %v9427_v13  ;;  %5906 = vmatprep.subr.bf16.mxu1 %v9430_v51  ;;  %v3729_v30 = vmax.f32 %v3649_v7, 0.0  ;;  %v3737_v13 = vmax.f32 %v3657_v41, 0.0  ;;  %v9455_v51 = vld [vmem:[#allocation10 + $0x500] ss:$16 sps:$4 sm:$0xff]  }
 0x4c0   : > { %5537 = vmatprep.mubr.bf16.mxu0 %v3823_v31  ;;  %5869 = vmatprep.mubr.bf16.mxu1 %v3823_v31  ;;  %v3838_v31 = vpack.c.bf16 %v3798_v9, %v3790_v24  ;;  %v9503_v7 = vld [vmem:[#allocation10 + $0x600] ss:$16 sps:$4 sm:$0xff]  }
 0x4c1   : > { %v3574_v29 = vld [vmem:[#allocation2 + $0x1a0] sm:$0xff] }
 0x4c2   : > { %5575 = vmatpush1.bf16.msra.mxu0 %v9425_v23  ;;  %5907 = vmatpush1.bf16.msra.mxu1 %v9428_v34  ;;  %v9458_v23 = vld [vmem:[#allocation10 + $0x508] ss:$16 sps:$4 sm:$0xff]   ;;  %v3809_v34 = vpack.c.bf16 %v3737_v13, %v3729_v30 }
 0x4c3   : > { %5576 = vmatprep.subr.bf16.mxu0 %v9433_v19  ;;  %5908 = vmatprep.subr.bf16.mxu1 %v9436_v15  ;;  %v9467_v19 = vld [vmem:[#allocation10 + $0x540] ss:$16 sps:$4 sm:$0xff]   ;;  %v9470_v15 = vld [vmem:[#allocation10 + $0x548] ss:$16 sps:$4 sm:$0xff]  }
 0x4c4   : > { %v3567_v30 = vld [vmem:[#allocation2 + $0x168] sm:$0xff] }
 0x4c5   : > { %5538 = vmatmul.mubr.bf16.gmra.mrb[8].mxu0 %v3822_v47  ;;  %5870 = vmatmul.mubr.bf16.gmra.mrb[8].mxu1 %v3822_v47  ;;  %v9476_v47 = vld [vmem:[#allocation10 + $0x568] ss:$16 sps:$4 sm:$0xff]  }
 0x4c6   : > { %5577 = vmatpush1.bf16.msra.mxu0 %v9431_v54  ;;  %5909 = vmatpush1.bf16.msra.mxu1 %v9434_v55  ;;  %v3622_v54 = vsub.s32 4, %v10924_v25  ;;  %v9482_v55 = vld [vmem:[#allocation10 + $0x588] ss:$16 sps:$4 sm:$0xff]  }
 0x4c7   : > { %5578 = vmatprep.subr.bf16.mxu0 %v9439_v56  ;;  %5910 = vmatprep.subr.bf16.mxu1 %v9442_v50  ;;  %v9487_v56 = vld [vmem:[#allocation10 + $0x5a4] ss:$16 sps:$4 sm:$0xff]   ;;  %v9490_v50 = vld [vmem:[#allocation10 + $0x5ac] ss:$16 sps:$4 sm:$0xff]   ;;  %v9506_v13 = vld [vmem:[#allocation10 + $0x608] ss:$16 sps:$4 sm:$0xff]  }
 0x4c8   : > { %5547 = vmatprep.mubr.bf16.mxu0 %v3831_v14  ;;  %5879 = vmatprep.mubr.bf16.mxu1 %v3831_v14  ;;  %v9488_v14 = vld [vmem:[#allocation10 + $0x5a8] ss:$16 sps:$4 sm:$0xff]   ;;  %v11472_v39 = vrot.slane %v11461_v62, %v3622_v54 }
 0x4c9   : > { %v3583_v54 = vld [vmem:[#allocation2 + $0x1e8] sm:$0xff] }
 0x4ca   : > { %5579 = vmatpush1.bf16.msra.mxu0 %v9437_v57  ;;  %5911 = vmatpush1.bf16.msra.mxu1 %v9440_v37  ;;  %v9485_v57 = vld [vmem:[#allocation10 + $0x5a0] ss:$16 sps:$4 sm:$0xff]   ;;  %v9493_v37 = vld [vmem:[#allocation10 + $0x5c4] ss:$16 sps:$4 sm:$0xff]   ;;  %v3656_v27 = vadd.f32 %v11472_v39, %v3534_v60 }
 0x4cb   : > { %5580 = vmatprep.subr.bf16.mxu0 %v9445_v17  ;;  %5912 = vmatprep.subr.bf16.mxu1 %v9448_v61  ;;  %v3648_v17 = vadd.f32 %v11472_v39, %v3526_v59  ;;  %v9491_v61 = vld [vmem:[#allocation10 + $0x5c0] ss:$16 sps:$4 sm:$0xff]   ;;  %v9524_v59 = vld [vmem:[#allocation10 + $0x668] ss:$16 sps:$4 sm:$0xff]  }
 0x4cc   : > { %v3736_v11 = vmax.f32 %v3656_v27, 0.0 }
 0x4cd   : > { %5548 = vmatmul.mubr.bf16.gmra.mrb[12].mxu0 %v3830_v1  ;;  %5880 = vmatmul.mubr.bf16.gmra.mrb[12].mxu1 %v3830_v1  ;;  %v3665_v1 = vadd.f32 %v11464_v49, %v3543_v3  ;;  %v3728_v0 = vmax.f32 %v3648_v17, 0.0  ;;  %v9529_v3 = vld [vmem:[#allocation10 + $0x684] ss:$16 sps:$4 sm:$0xff]  }
 0x4ce   : > { %5581 = vmatpush1.bf16.msra.mxu0 %v9443_v44  ;;  %5913 = vmatpush1.bf16.msra.mxu1 %v9446_v12  ;;  %v9494_v44 = vld [vmem:[#allocation10 + $0x5c8] ss:$16 sps:$4 sm:$0xff]   ;;  %v9497_v12 = vld [vmem:[#allocation10 + $0x5e0] ss:$16 sps:$4 sm:$0xff]  }
 0x4cf   : > { %5582 = vmatprep.subr.bf16.mxu0 %v9451_v5  ;;  %5914 = vmatprep.subr.bf16.mxu1 %v9454_v63  ;;  %v3542_v5 = vld [vmem:[#allocation2 + $0xa0] sm:$0xff]  ;;  %v3745_v41 = vmax.f32 %v3665_v1, 0.0  ;;  %v3808_v24 = vpack.c.bf16 %v3736_v11, %v3728_v0  ;;  %v3591_v1 = vld [vmem:[#allocation2 + $0x228] sm:$0xff] }
 0x4d0   : > { %5557 = vmatprep.mubr.bf16.mxu0 %v3839_v35  ;;  %5889 = vmatprep.mubr.bf16.mxu1 %v3839_v35  ;;  %v3550_v63 = vld [vmem:[#allocation2 + $0xe0] sm:$0xff]  ;;  %v9508_v35 = vld [vmem:[#allocation10 + $0x60c] ss:$16 sps:$4 sm:$0xff]   ;;  %v3664_v9 = vadd.f32 %v11472_v39, %v3542_v5  ;;  %v9530_v5 = vld [vmem:[#allocation10 + $0x688] ss:$16 sps:$4 sm:$0xff]  }
 0x4d1   : > { %v3599_v11 = vld [vmem:[#allocation2 + $0x268] sm:$0xff] }
 0x4d2   : > { %5583 = vmatpush1.bf16.msra.mxu0 %v9449_v6  ;;  %5915 = vmatpush1.bf16.msra.mxu1 %v9452_v8  ;;  %v9505_v6 = vld [vmem:[#allocation10 + $0x604] ss:$16 sps:$4 sm:$0xff]   ;;  %v3753_v8 = vmax.f32 %v3673_v2, 0.0 }
 0x4d3   : > { %5584 = vmatprep.subr.bf16.mxu0 %v9457_v32  ;;  %5916 = vmatprep.subr.bf16.mxu1 %v9460_v10  ;;  %v3672_v32 = vadd.f32 %v11472_v39, %v3550_v63  ;;  %v3559_v10 = vld [vmem:[#allocation2 + $0x128] sm:$0xff]  ;;  %v9535_v63 = vld [vmem:[#allocation10 + $0x6a4] ss:$16 sps:$4 sm:$0xff]  }
 0x4d5   : > { %5558 = vmatmul.mubr.bf16.gmra.mrb[16].mxu0 %v3838_v31  ;;  %5890 = vmatmul.mubr.bf16.gmra.mrb[16].mxu1 %v3838_v31  ;;  %v3817_v31 = vpack.c.bf16 %v3753_v8, %v3745_v41  ;;  %v3713_v41 = vadd.f32 %v11464_v49, %v3591_v1  ;;  %v3721_v8 = vadd.f32 %v11464_v49, %v3599_v11  ;;  %v9559_v1 = vld [vmem:[#allocation10 + $0x724] ss:$16 sps:$4 sm:$0xff]   ;;  %v3585_v11 = vld [vmem:[#allocation2 + $0x1f8] sm:$0xff] }
 0x4d6   : > { %5585 = vmatpush1.bf16.msra.mxu0 %v9455_v51  ;;  %5917 = vmatpush1.bf16.msra.mxu1 %v9458_v23  ;;  %v9511_v51 = vld [vmem:[#allocation10 + $0x624] ss:$16 sps:$4 sm:$0xff]   ;;  %v9514_v23 = vld [vmem:[#allocation10 + $0x62c] ss:$16 sps:$4 sm:$0xff]  }
 0x4d7   : > { %5586 = vmatprep.subr.bf16.mxu0 %v9463_v38  ;;  %5918 = vmatprep.subr.bf16.mxu1 %v9466_v20  ;;  %v3681_v38 = vadd.f32 %v11464_v49, %v3559_v10  ;;  %v3689_v20 = vadd.f32 %v11464_v49, %v3567_v30  ;;  %v3590_v30 = vld [vmem:[#allocation2 + $0x220] sm:$0xff] }
 0x4d8   : > { %5600 = vmatprep.mubr.bf16.mxu0 %v3809_v34  ;;  %5932 = vmatprep.mubr.bf16.mxu1 %v3809_v34  ;;  %v9509_v34 = vld [vmem:[#allocation10 + $0x620] ss:$16 sps:$4 sm:$0xff]  }
 0x4da   : > { %5587 = vmatpush1.bf16.msra.mxu0 %v9461_v40  ;;  %5919 = vmatpush1.bf16.msra.mxu1 %v9464_v21  ;;  %v3744_v40 = vmax.f32 %v3664_v9, 0.0  ;;  %v3752_v21 = vmax.f32 %v3672_v32, 0.0  ;;  %v9536_v9 = vld [vmem:[#allocation10 + $0x6a8] ss:$16 sps:$4 sm:$0xff]  }
 0x4db   : > { %5588 = vmatprep.subr.bf16.mxu0 %v9469_v42  ;;  %5920 = vmatprep.subr.bf16.mxu1 %v9472_v45  ;;  %v9512_v42 = vld [vmem:[#allocation10 + $0x628] ss:$16 sps:$4 sm:$0xff]   ;;  %v3558_v45 = vld [vmem:[#allocation2 + $0x120] sm:$0xff] }
 0x4de   : > { %5589 = vmatpush1.bf16.msra.mxu0 %v9467_v19  ;;  %5921 = vmatpush1.bf16.msra.mxu1 %v9470_v15  ;;  %v3566_v19 = vld [vmem:[#allocation2 + $0x160] sm:$0xff] }
 0x4df   : > { %5590 = vmatprep.subr.bf16.mxu0 %v9475_v43  ;;  %5922 = vmatprep.subr.bf16.mxu1 %v9478_v16  ;;  %v9517_v15 = vld [vmem:[#allocation10 + $0x644] ss:$16 sps:$4 sm:$0xff]   ;;  %v9520_v43 = vld [vmem:[#allocation10 + $0x64c] ss:$16 sps:$4 sm:$0xff]   ;;  %v3761_v16 = vmax.f32 %v3681_v38, 0.0 }
 0x4e0   : > { %v9539_v38 = vld [vmem:[#allocation10 + $0x6c0] ss:$16 sps:$4 sm:$0xff]  }
 0x4e2   : > { %5591 = vmatpush1.bf16.msra.mxu0 %v9473_v46  ;;  %5923 = vmatpush1.bf16.msra.mxu1 %v9476_v47  ;;  %v3769_v46 = vmax.f32 %v3689_v20, 0.0  ;;  %v3816_v47 = vpack.c.bf16 %v3752_v21, %v3744_v40  ;;  %v3801_v20 = vmax.f32 %v3721_v8, 0.0 }
 0x4e3   : > { %5592 = vmatprep.subr.bf16.mxu0 %v9481_v48  ;;  %5924 = vmatprep.subr.bf16.mxu1 %v9484_v52  ;;  %v3680_v48 = vadd.f32 %v11472_v39, %v3558_v45  ;;  %v3688_v52 = vadd.f32 %v11472_v39, %v3566_v19  ;;  %v3537_v19 = vld [vmem:[#allocation2 + $0x78] sm:$0xff] }
 0x4e4   : > { %v3825_v60 = vpack.c.bf16 %v3769_v46, %v3761_v16  ;;  %v3528_v16 = vld [vmem:[#allocation2 + $0x30] sm:$0xff] }
 0x4e5   : > { %v3760_v17 = vmax.f32 %v3680_v48, 0.0  ;;  %v3768_v27 = vmax.f32 %v3688_v52, 0.0  ;;  %v9548_v48 = vld [vmem:[#allocation10 + $0x6e8] ss:$16 sps:$4 sm:$0xff]  }
 0x4e6   : > { %5593 = vmatpush1.bf16.msra.mxu0 %v9479_v53  ;;  %5925 = vmatpush1.bf16.msra.mxu1 %v9482_v55  ;;  %v3575_v53 = vld [vmem:[#allocation2 + $0x1a8] sm:$0xff]  ;;  %v9515_v55 = vld [vmem:[#allocation10 + $0x640] ss:$16 sps:$4 sm:$0xff]  }
 0x4e7   : > { %5594 = vmatprep.subr.bf16.mxu0 %v9487_v56  ;;  %5926 = vmatprep.subr.bf16.mxu1 %v9490_v50  ;;  %v9518_v56 = vld [vmem:[#allocation10 + $0x648] ss:$16 sps:$4 sm:$0xff]   ;;  %v9523_v50 = vld [vmem:[#allocation10 + $0x664] ss:$16 sps:$4 sm:$0xff]   ;;  %v3824_v2 = vpack.c.bf16 %v3768_v27, %v3760_v17  ;;  %v9551_v27 = vld [vmem:[#allocation10 + $0x700] ss:$16 sps:$4 sm:$0xff]  }
 0x4e8   : > { %v3569_v17 = vld [vmem:[#allocation2 + $0x178] sm:$0xff] }
 0x4ea   : > { %5595 = vmatpush1.bf16.msra.mxu0 %v9485_v57  ;;  %5927 = vmatpush1.bf16.msra.mxu1 %v9488_v14  ;;  %v9526_v57 = vld [vmem:[#allocation10 + $0x66c] ss:$16 sps:$4 sm:$0xff]   ;;  %v9521_v14 = vld [vmem:[#allocation10 + $0x660] ss:$16 sps:$4 sm:$0xff]  }
 0x4eb   : > { %5596 = vmatprep.subr.bf16.mxu0 %v9493_v37  ;;  %5928 = vmatprep.subr.bf16.mxu1 %v9496_v22  ;;  %v3697_v37 = vadd.f32 %v11464_v49, %v3575_v53  ;;  %v3705_v22 = vadd.f32 %v11464_v49, %v3583_v54  ;;  %v3793_v49 = vmax.f32 %v3713_v41, 0.0  ;;  %v3592_v41 = vld [vmem:[#allocation2 + $0x230] sm:$0xff] }
 0x4ed   : > { %v3841_v52 = vpack.c.bf16 %v3801_v20, %v3793_v49  ;;  %v9568_v49 = vld [vmem:[#allocation10 + $0x74c] ss:$16 sps:$4 sm:$0xff]  }
 0x4ee   : > { %5597 = vmatpush1.bf16.msra.mxu0 %v9491_v61  ;;  %5929 = vmatpush1.bf16.msra.mxu1 %v9494_v44  ;;  %v3582_v61 = vld [vmem:[#allocation2 + $0x1e0] sm:$0xff]  ;;  %v9532_v44 = vld [vmem:[#allocation10 + $0x68c] ss:$16 sps:$4 sm:$0xff]  }
 0x4ef   : > { %5598 = vmatprep.subr.bf16.mxu0 %v9499_v18  ;;  %5930 = vmatprep.subr.bf16.mxu1 %v9502_v58  ;;  %v9527_v18 = vld [vmem:[#allocation10 + $0x680] ss:$16 sps:$4 sm:$0xff]   ;;  %v3777_v58 = vmax.f32 %v3697_v37, 0.0  ;;  %v3704_v0 = vadd.f32 %v11472_v39, %v3582_v61 }
 0x4f1   : > { %v3784_v10 = vmax.f32 %v3704_v0, 0.0 }
 0x4f2   : > { %5599 = vmatpush1.bf16.msra.mxu0 %v9497_v12  ;;  %5931 = vmatpush1.bf16.msra.mxu1 %v9500_v4  ;;  %v3785_v12 = vmax.f32 %v3705_v22, 0.0  ;;  %v3696_v4 = vadd.f32 %v11472_v39, %v3574_v29  ;;  %v3552_v22 = vld [vmem:[#allocation2 + $0xf0] sm:$0xff]  ;;  %v9554_v29 = vld [vmem:[#allocation10 + $0x708] ss:$16 sps:$4 sm:$0xff]  }
 0x4f3   : > { %5651 = vmatprep.subr.bf16.mxu0 %v9505_v6  ;;  %5983 = vmatprep.subr.bf16.mxu1 %v9508_v35  ;;  %v9538_v6 = vld [vmem:[#allocation10 + $0x6ac] ss:$16 sps:$4 sm:$0xff]   ;;  %v9533_v35 = vld [vmem:[#allocation10 + $0x6a0] ss:$16 sps:$4 sm:$0xff]  }
 0x4f4   : > { %v3776_v32 = vmax.f32 %v3696_v4, 0.0 }
 0x4f5   : > { %5601 = vmatmul.mubr.bf16.vlgmr.msra.gmra.mrb[0].mxu0 %v3808_v24  ;;  %5933 = vmatmul.mubr.bf16.vlgmr.msra.gmra.mrb[0].mxu1 %v3808_v24  ;;  %v3634_v24 = vsub.s32 7, %v10924_v25 }
 0x4f6   : > { %5652 = vmatpush1.bf16.msra.mxu0 %v9503_v7  ;;  %5984 = vmatpush1.bf16.msra.mxu1 %v9506_v13  ;;  %v3833_v7 = vpack.c.bf16 %v3785_v12, %v3777_v58  ;;  %v3598_v13 = vld [vmem:[#allocation2 + $0x260] sm:$0xff]  ;;  %v3832_v21 = vpack.c.bf16 %v3784_v10, %v3776_v32  ;;  %v3568_v58 = vld [vmem:[#allocation2 + $0x170] sm:$0xff]  ;;  %v3577_v12 = vld [vmem:[#allocation2 + $0x1b8] sm:$0xff] }
 0x4f7   : > { %5653 = vmatprep.subr.bf16.mxu0 %v9511_v51  ;;  %5985 = vmatprep.subr.bf16.mxu1 %v9514_v23  ;;  %v9541_v51 = vld [vmem:[#allocation10 + $0x6c4] ss:$16 sps:$4 sm:$0xff]   ;;  %v9544_v23 = vld [vmem:[#allocation10 + $0x6cc] ss:$16 sps:$4 sm:$0xff]   ;;  %v11493_v40 = vrot.slane %v11461_v62, %v3634_v24  ;;  %v3720_v45 = vadd.f32 %v11472_v39, %v3598_v13  ;;  %v9557_v10 = vld [vmem:[#allocation10 + $0x720] ss:$16 sps:$4 sm:$0xff]  }
 0x4f8   : > { %5610 = vmatprep.mubr.bf16.mxu0 %v3817_v31  ;;  %5942 = vmatprep.mubr.bf16.mxu1 %v3817_v31  ;;  %v3630_v31 = vsub.s32 6, %v10924_v25  ;;  %v9550_v25 = vld [vmem:[#allocation10 + $0x6ec] ss:$16 sps:$4 sm:$0xff]   ;;  %v3600_v32 = vld [vmem:[#allocation2 + $0x270] sm:$0xff] }
 0x4f9   : > { %v3659_v54 = vadd.f32 %v11493_v40, %v3537_v19  ;;  %v11540_v19 = vadd.f32 %v11493_v40, %v3585_v11  ;;  %v9581_v11 = vld [vmem:[#allocation10 + $0x7a0] ss:$16 sps:$4 sm:$0xff]  }
 0x4fa   : > { %5654 = vmatpush1.bf16.msra.mxu0 %v9509_v34  ;;  %5986 = vmatpush1.bf16.msra.mxu1 %v9512_v42  ;;  %v3529_v34 = vld [vmem:[#allocation2 + $0x38] sm:$0xff]  ;;  %v3712_v42 = vadd.f32 %v11472_v39, %v3590_v30  ;;  %v11498_v46 = vrot.slane %v11461_v62, %v3630_v31  ;;  %v3536_v39 = vld [vmem:[#allocation2 + $0x70] sm:$0xff]  ;;  %v11526_v31 = vadd.f32 %v11493_v40, %v3569_v17 }
 0x4fb   : > { %5655 = vmatprep.subr.bf16.mxu0 %v9517_v15  ;;  %5987 = vmatprep.subr.bf16.mxu1 %v9520_v43  ;;  %v9542_v15 = vld [vmem:[#allocation10 + $0x6c8] ss:$16 sps:$4 sm:$0xff]   ;;  %v9547_v43 = vld [vmem:[#allocation10 + $0x6e4] ss:$16 sps:$4 sm:$0xff]   ;;  %v3651_v53 = vadd.f32 %v11493_v40, %v3529_v34 }
 0x4fc   : > { %v3544_v62 = vld [vmem:[#allocation2 + $0xb0] sm:$0xff]  ;;  %v11506_v37 = vadd.f32 %v11498_v46, %v3536_v39  ;;  %v9560_v30 = vld [vmem:[#allocation10 + $0x728] ss:$16 sps:$4 sm:$0xff]  }
 0x4fd   : > { %5611 = vmatmul.mubr.bf16.gmra.mrb[4].mxu0 %v3816_v47  ;;  %5943 = vmatmul.mubr.bf16.gmra.mrb[4].mxu1 %v3816_v47  ;;  %v9545_v47 = vld [vmem:[#allocation10 + $0x6e0] ss:$16 sps:$4 sm:$0xff]   ;;  %v3731_v61 = vmax.f32 %v3651_v53, 0.0  ;;  %v9566_v53 = vld [vmem:[#allocation10 + $0x748] ss:$16 sps:$4 sm:$0xff]  }
 0x4fe   : > { %5656 = vmatpush1.bf16.msra.mxu0 %v9515_v55  ;;  %5988 = vmatpush1.bf16.msra.mxu1 %v9518_v56  ;;  %v9553_v55 = vld [vmem:[#allocation10 + $0x704] ss:$16 sps:$4 sm:$0xff]   ;;  %v9556_v56 = vld [vmem:[#allocation10 + $0x70c] ss:$16 sps:$4 sm:$0xff]   ;;  %v3738_v24 = vmax.f32 %v11506_v37, 0.0 }
 0x4ff   : > { %5657 = vmatprep.subr.bf16.mxu0 %v9523_v50  ;;  %5989 = vmatprep.subr.bf16.mxu1 %v9526_v57  ;;  %v3792_v50 = vmax.f32 %v3712_v42, 0.0  ;;  %v3800_v57 = vmax.f32 %v3720_v45, 0.0  ;;  %v11536_v42 = vadd.f32 %v11493_v40, %v3577_v12  ;;  %v9575_v12 = vld [vmem:[#allocation10 + $0x780] ss:$16 sps:$4 sm:$0xff]   ;;  %v9605_v37 = vld [vmem:[#allocation13 + $0x20] ss:$8 sps:$4 sm:$0xff]  }
 0x500   : > { %5620 = vmatprep.mubr.bf16.mxu0 %v3825_v60  ;;  %5952 = vmatprep.mubr.bf16.mxu1 %v3825_v60  ;;  %v11503_v60 = vadd.f32 %v11498_v46, %v3528_v16 }
 0x501   : > { %v3840_v4 = vpack.c.bf16 %v3800_v57, %v3792_v50  ;;  %v9571_v50 = vld [vmem:[#allocation10 + $0x764] ss:$16 sps:$4 sm:$0xff]   ;;  %v9574_v57 = vld [vmem:[#allocation10 + $0x76c] ss:$16 sps:$4 sm:$0xff]  }
 0x502   : > { %5658 = vmatpush1.bf16.msra.mxu0 %v9521_v14  ;;  %5990 = vmatpush1.bf16.msra.mxu1 %v9524_v59  ;;  %v3545_v14 = vld [vmem:[#allocation2 + $0xb8] sm:$0xff]  ;;  %v3730_v8 = vmax.f32 %v11503_v60, 0.0 }
 0x503   : > { %5659 = vmatprep.subr.bf16.mxu0 %v9529_v3  ;;  %5991 = vmatprep.subr.bf16.mxu1 %v9532_v44  ;;  %v3553_v59 = vld [vmem:[#allocation2 + $0xf8] sm:$0xff]  ;;  %v3739_v44 = vmax.f32 %v3659_v54, 0.0  ;;  %v11509_v0 = vadd.f32 %v11493_v40, %v3545_v14 }
 0x504   : > { %v3561_v3 = vld [vmem:[#allocation2 + $0x138] sm:$0xff] }
 0x505   : > { %5621 = vmatmul.mubr.bf16.gmra.mrb[8].mxu0 %v3824_v2  ;;  %5953 = vmatmul.mubr.bf16.gmra.mrb[8].mxu1 %v3824_v2  ;;  %v9562_v2 = vld [vmem:[#allocation10 + $0x72c] ss:$16 sps:$4 sm:$0xff]   ;;  %v3811_v13 = vpack.c.bf16 %v3739_v44, %v3731_v61  ;;  %v3747_v20 = vmax.f32 %v11509_v0, 0.0  ;;  %v9572_v61 = vld [vmem:[#allocation10 + $0x768] ss:$16 sps:$4 sm:$0xff]  }
 0x506   : > { %5660 = vmatpush1.bf16.msra.mxu0 %v9527_v18  ;;  %5992 = vmatpush1.bf16.msra.mxu1 %v9530_v5  ;;  %v3560_v18 = vld [vmem:[#allocation2 + $0x130] sm:$0xff] }
 0x507   : > { %5661 = vmatprep.subr.bf16.mxu0 %v9535_v63  ;;  %5993 = vmatprep.subr.bf16.mxu1 %v9538_v6  ;;  %v3576_v5 = vld [vmem:[#allocation2 + $0x1b0] sm:$0xff]  ;;  %v11512_v6 = vadd.f32 %v11493_v40, %v3553_v59  ;;  %v11530_v34 = vadd.f32 %v11498_v46, %v3560_v18  ;;  %v3779_v59 = vmax.f32 %v11536_v42, 0.0 }
 0x508   : > { %5630 = vmatprep.mubr.bf16.mxu0 %v3833_v7  ;;  %5962 = vmatprep.mubr.bf16.mxu1 %v3833_v7  ;;  %v3584_v63 = vld [vmem:[#allocation2 + $0x1f0] sm:$0xff]  ;;  %v3601_v7 = vld [vmem:[#allocation2 + $0x278] sm:$0xff] }
 0x509   : > { %v3755_v45 = vmax.f32 %v11512_v6, 0.0  ;;  %v9577_v18 = vld [vmem:[#allocation10 + $0x784] ss:$16 sps:$4 sm:$0xff]   ;;  %v9610_v6 = vld [vmem:[#allocation13 + $0x34] ss:$8 sps:$4 sm:$0xff]  }
 0x50a   : > { %5662 = vmatpush1.bf16.msra.mxu0 %v9533_v35  ;;  %5994 = vmatpush1.bf16.msra.mxu1 %v9536_v9  ;;  %v3593_v35 = vld [vmem:[#allocation2 + $0x238] sm:$0xff]  ;;  %v11517_v9 = vadd.f32 %v11498_v46, %v3544_v62  ;;  %v3787_v62 = vmax.f32 %v11540_v19, 0.0  ;;  %v9622_v19 = vld [vmem:[#allocation13 + $0x74] ss:$8 sps:$4 sm:$0xff]  }
 0x50b   : > { %5663 = vmatprep.subr.bf16.mxu0 %v9541_v51  ;;  %5995 = vmatprep.subr.bf16.mxu1 %v9544_v23  ;;  %v11520_v51 = vadd.f32 %v11498_v46, %v3552_v22  ;;  %v11523_v23 = vadd.f32 %v11493_v40, %v3561_v3  ;;  %v11550_v16 = vadd.f32 %v11493_v40, %v3593_v35  ;;  %v9592_v35 = vld [vmem:[#allocation10 + $0x7cc] ss:$16 sps:$4 sm:$0xff]  }
 0x50d   : > { %5631 = vmatmul.mubr.bf16.gmra.mrb[12].mxu0 %v3832_v21  ;;  %5963 = vmatmul.mubr.bf16.gmra.mrb[12].mxu1 %v3832_v21  ;;  %v11533_v21 = vadd.f32 %v11498_v46, %v3568_v58  ;;  %v3754_v54 = vmax.f32 %v11520_v51, 0.0  ;;  %v3763_v39 = vmax.f32 %v11523_v23, 0.0  ;;  %v9580_v58 = vld [vmem:[#allocation10 + $0x78c] ss:$16 sps:$4 sm:$0xff]   ;;  %v3835_v23 = vpack.c.bf16 %v3787_v62, %v3779_v59  ;;  %v9640_v59 = vld [vmem:[#allocation13 + $0xd4] ss:$8 sps:$4 sm:$0xff]  }
 0x50e   : > { %5664 = vmatpush1.bf16.msra.mxu0 %v9539_v38  ;;  %5996 = vmatpush1.bf16.msra.mxu1 %v9542_v15  ;;  %v9565_v38 = vld [vmem:[#allocation10 + $0x744] ss:$16 sps:$4 sm:$0xff]   ;;  %v11543_v15 = vadd.f32 %v11498_v46, %v3576_v5  ;;  %v9584_v5 = vld [vmem:[#allocation10 + $0x7a8] ss:$16 sps:$4 sm:$0xff]  }
 0x50f   : > { %5665 = vmatprep.subr.bf16.mxu0 %v9547_v43  ;;  %5997 = vmatprep.subr.bf16.mxu1 %v9550_v25  ;;  %v11546_v43 = vadd.f32 %v11498_v46, %v3584_v63  ;;  %v3746_v25 = vmax.f32 %v11517_v9, 0.0  ;;  %v3770_v14 = vmax.f32 %v11533_v21, 0.0  ;;  %v9589_v63 = vld [vmem:[#allocation10 + $0x7c4] ss:$16 sps:$4 sm:$0xff]  }
 0x510   : > { %5640 = vmatprep.mubr.bf16.mxu0 %v3841_v52  ;;  %5972 = vmatprep.mubr.bf16.mxu1 %v3841_v52  ;;  %v9563_v52 = vld [vmem:[#allocation10 + $0x740] ss:$16 sps:$4 sm:$0xff]   ;;  %v3778_v22 = vmax.f32 %v11543_v15, 0.0  ;;  %v9611_v51 = vld [vmem:[#allocation13 + $0x40] ss:$8 sps:$4 sm:$0xff]  }
 0x511   : > { %v3786_v3 = vmax.f32 %v11546_v43, 0.0  ;;  %v3818_v60 = vpack.c.bf16 %v3754_v54, %v3746_v25  ;;  %v9617_v21 = vld [vmem:[#allocation13 + $0x60] ss:$8 sps:$4 sm:$0xff]   ;;  %v9620_v25 = vld [vmem:[#allocation13 + $0x70] ss:$8 sps:$4 sm:$0xff]  }
 0x512   : > { %5666 = vmatpush1.bf16.msra.mxu0 %v9545_v47  ;;  %5998 = vmatpush1.bf16.msra.mxu1 %v9548_v48  ;;  %v11553_v47 = vadd.f32 %v11493_v40, %v3601_v7  ;;  %v11556_v48 = vadd.f32 %v11498_v46, %v3592_v41  ;;  %v3762_v40 = vmax.f32 %v11530_v34, 0.0  ;;  %v9587_v7 = vld [vmem:[#allocation10 + $0x7c0] ss:$16 sps:$4 sm:$0xff]   ;;  %v9590_v41 = vld [vmem:[#allocation10 + $0x7c8] ss:$16 sps:$4 sm:$0xff]  }
 0x513   : > { %5667 = vmatprep.subr.bf16.mxu0 %v9553_v55  ;;  %5999 = vmatprep.subr.bf16.mxu1 %v9556_v56  ;;  %v3771_v55 = vmax.f32 %v11526_v31, 0.0  ;;  %v11562_v56 = vadd.f32 %v11498_v46, %v3600_v32  ;;  %v3795_v46 = vmax.f32 %v11550_v16, 0.0  ;;  %v9595_v32 = vld [vmem:[#allocation10 + $0x7e4] ss:$16 sps:$4 sm:$0xff]   ;;  %v9616_v31 = vld [vmem:[#allocation13 + $0x54] ss:$8 sps:$4 sm:$0xff]   ;;  %v3834_v34 = vpack.c.bf16 %v3786_v3, %v3778_v22 }
 0x514   : > { %v3803_v17 = vmax.f32 %v11553_v47, 0.0  ;;  %v3826_v9 = vpack.c.bf16 %v3770_v14, %v3762_v40  ;;  %v9625_v54 = vld [vmem:[#allocation13 + $0x84] ss:$8 sps:$4 sm:$0xff]   ;;  %v9623_v43 = vld [vmem:[#allocation13 + $0x80] ss:$8 sps:$4 sm:$0xff]  }
 0x515   : > { %5641 = vmatmul.mubr.bf16.gmra.mrb[16].mxu0 %v3840_v4  ;;  %5973 = vmatmul.mubr.bf16.gmra.mrb[16].mxu1 %v3840_v4  ;;  %v3802_v44 = vmax.f32 %v11562_v56, 0.0  ;;  %v9586_v4 = vld [vmem:[#allocation10 + $0x7ac] ss:$16 sps:$4 sm:$0xff]   ;;  %v3827_v0 = vpack.c.bf16 %v3771_v55, %v3763_v39  ;;  %v9628_v16 = vld [vmem:[#allocation13 + $0x94] ss:$8 sps:$4 sm:$0xff]  }
 0x516   : > { %5668 = vmatpush1.bf16.msra.mxu0 %v9551_v27  ;;  %6000 = vmatpush1.bf16.msra.mxu1 %v9554_v29  ;;  %v3794_v27 = vmax.f32 %v11556_v48, 0.0  ;;  %v9569_v29 = vld [vmem:[#allocation10 + $0x760] ss:$16 sps:$4 sm:$0xff]   ;;  %v3843_v42 = vpack.c.bf16 %v3803_v17, %v3795_v46  ;;  %v9626_v47 = vld [vmem:[#allocation13 + $0x90] ss:$8 sps:$4 sm:$0xff]  }
 0x517   : > { %5669 = vmatprep.subr.bf16.mxu0 %v9559_v1  ;;  %6001 = vmatprep.subr.bf16.mxu1 %v9562_v2  ;;  %v9578_v1 = vld [vmem:[#allocation10 + $0x788] ss:$16 sps:$4 sm:$0xff]   ;;  %v9583_v2 = vld [vmem:[#allocation10 + $0x7a4] ss:$16 sps:$4 sm:$0xff]  }
 0x518   : > { %5683 = vmatprep.mubr.bf16.mxu0 %v3811_v13  ;;  %6015 = vmatprep.mubr.bf16.mxu1 %v3811_v13  ;;  %v9596_v13 = vld [vmem:[#allocation10 + $0x7e8] ss:$16 sps:$4 sm:$0xff]   ;;  %v3842_v15 = vpack.c.bf16 %v3802_v44, %v3794_v27  ;;  %v9629_v55 = vld [vmem:[#allocation13 + $0xa0] ss:$8 sps:$4 sm:$0xff]   ;;  %v9632_v14 = vld [vmem:[#allocation13 + $0xb0] ss:$8 sps:$4 sm:$0xff]  }
 0x519   : > { %v9631_v39 = vld [vmem:[#allocation13 + $0xa4] ss:$8 sps:$4 sm:$0xff]   ;;  %v9634_v40 = vld [vmem:[#allocation13 + $0xb4] ss:$8 sps:$4 sm:$0xff]   ;;  %v9635_v56 = vld [vmem:[#allocation13 + $0xc0] ss:$8 sps:$4 sm:$0xff]  }
 0x51a   : > { %5670 = vmatpush1.bf16.msra.mxu0 %v9557_v10  ;;  %6002 = vmatpush1.bf16.msra.mxu1 %v9560_v30  ;;  %v9598_v10 = vld [vmem:[#allocation10 + $0x7ec] ss:$16 sps:$4 sm:$0xff]   ;;  %v9593_v30 = vld [vmem:[#allocation10 + $0x7e0] ss:$16 sps:$4 sm:$0xff]  }
 0x51b   : > { %5671 = vmatprep.subr.bf16.mxu0 %v9565_v38  ;;  %6003 = vmatprep.subr.bf16.mxu1 %v9568_v49  ;;  %v9601_v38 = vld [vmem:[#allocation13 + $0x4] ss:$8 sps:$4 sm:$0xff]   ;;  %v3810_v49 = vpack.c.bf16 %v3738_v24, %v3730_v8  ;;  %v9608_v8 = vld [vmem:[#allocation13 + $0x30] ss:$8 sps:$4 sm:$0xff]   ;;  %v9641_v3 = vld [vmem:[#allocation13 + $0xe0] ss:$8 sps:$4 sm:$0xff]  }
 0x51c   : > { %v9613_v24 = vld [vmem:[#allocation13 + $0x44] ss:$8 sps:$4 sm:$0xff]   ;;  %v9638_v62 = vld [vmem:[#allocation13 + $0xd0] ss:$8 sps:$4 sm:$0xff]   ;;  %v9646_v46 = vld [vmem:[#allocation13 + $0xf4] ss:$8 sps:$4 sm:$0xff]  }
 0x51d   : > { %v9637_v48 = vld [vmem:[#allocation13 + $0xc4] ss:$8 sps:$4 sm:$0xff]   ;;  %v9644_v17 = vld [vmem:[#allocation13 + $0xf0] ss:$8 sps:$4 sm:$0xff]  }
 0x51e   : > { %5672 = vmatpush1.bf16.msra.mxu0 %v9563_v52  ;;  %6004 = vmatpush1.bf16.msra.mxu1 %v9566_v53  ;;  %v9599_v52 = vld [vmem:[#allocation13] ss:$8 sps:$4 sm:$0xff]   ;;  %v3819_v53 = vpack.c.bf16 %v3755_v45, %v3747_v20  ;;  %v9614_v20 = vld [vmem:[#allocation13 + $0x50] ss:$8 sps:$4 sm:$0xff]   ;;  %v9619_v45 = vld [vmem:[#allocation13 + $0x64] ss:$8 sps:$4 sm:$0xff]  }
 0x51f   : > { %5673 = vmatprep.subr.bf16.mxu0 %v9571_v50  ;;  %6005 = vmatprep.subr.bf16.mxu1 %v9574_v57  ;;  %v9604_v50 = vld [vmem:[#allocation13 + $0x14] ss:$8 sps:$4 sm:$0xff]   ;;  %v9602_v57 = vld [vmem:[#allocation13 + $0x10] ss:$8 sps:$4 sm:$0xff]   ;;  %v9643_v22 = vld [vmem:[#allocation13 + $0xe4] ss:$8 sps:$4 sm:$0xff]  }
 0x520   : > { %v9649_v27 = vld [vmem:[#allocation13 + $0x104] ss:$8 sps:$4 sm:$0xff]  }
 0x521   : > { %v9696_v44 = vld [vmem:[#allocation16 + $0x80] sm:$0xff]  }
 0x522   : > { %5674 = vmatpush1.bf16.msra.mxu0 %v9569_v29  ;;  %6006 = vmatpush1.bf16.msra.mxu1 %v9572_v61  ;;  %v9607_v29 = vld [vmem:[#allocation13 + $0x24] ss:$8 sps:$4 sm:$0xff]  }
 0x523   : > { %5675 = vmatprep.subr.bf16.mxu0 %v9577_v18  ;;  %6007 = vmatprep.subr.bf16.mxu1 %v9580_v58  ;;  %v9695_v61 = vld [vmem:[#allocation16 + $0xc0] sm:$0xff]   ;;  %v9697_v18 = vld [vmem:[#allocation16 + $0xc8] sm:$0xff]  }
 0x524   : > { %v9698_v58 = vld [vmem:[#allocation16 + $0x88] sm:$0xff]  }
 0x526   : > { %5676 = vmatpush1.bf16.msra.mxu0 %v9575_v12  ;;  %6008 = vmatpush1.bf16.msra.mxu1 %v9578_v1  ;;  %v9699_v12 = vld [vmem:[#allocation16 + $0xd0] sm:$0xff]  }
 0x527   : > { %5677 = vmatprep.subr.bf16.mxu0 %v9583_v2  ;;  %6009 = vmatprep.subr.bf16.mxu1 %v9586_v4  ;;  %v9700_v1 = vld [vmem:[#allocation16 + $0x90] sm:$0xff]   ;;  %v9701_v2 = vld [vmem:[#allocation16 + $0xd8] sm:$0xff]  }
 0x528   : > { %v9702_v4 = vld [vmem:[#allocation16 + $0x98] sm:$0xff]  }
 0x52a   : > { %5678 = vmatpush1.bf16.msra.mxu0 %v9581_v11  ;;  %6010 = vmatpush1.bf16.msra.mxu1 %v9584_v5  ;;  %v9703_v11 = vld [vmem:[#allocation16 + $0xe0] sm:$0xff]   ;;  %v4100_v5 = vld [vmem:[#allocation11] sm:$0xf] }
 0x52b   : > { %5679 = vmatprep.subr.bf16.mxu0 %v9589_v63  ;;  %6011 = vmatprep.subr.bf16.mxu1 %v9592_v35  ;;  %v9704_v63 = vld [vmem:[#allocation16 + $0xa0] sm:$0xff]   ;;  %v11611_v35 = vrot.slane %v4100_v5, %v10927_v26 }
 0x52e   : > { %5680 = vmatpush1.bf16.msra.mxu0 %v9587_v7  ;;  %6012 = vmatpush1.bf16.msra.mxu1 %v9590_v41  ;;  %v11614_v7 = vrot.slane %v4100_v5, %v10941_v33  ;;  %v11617_v41 = vrot.slane %v4100_v5, %v10931_v28 }
 0x52f   : > { %5681 = vmatprep.subr.bf16.mxu0 %v9595_v32  ;;  %6013 = vmatprep.subr.bf16.mxu1 %v9598_v10  ;;  %v11620_v32 = vrot.slane %v4100_v5, %v10945_v36 }
 0x532   : > { %5682 = vmatpush1.bf16.msra.mxu0 %v9593_v30  ;;  %6014 = vmatpush1.bf16.msra.mxu1 %v9596_v13 }
 0x533   : > { %6522 = vmatprep.subr.bf16.mxu0 %v9601_v38  ;;  %8626 = vmatprep.subr.bf16.mxu1 %v9695_v61 }
 0x535   : > { %5684 = vmatmul.mubr.bf16.vlgmr.msra.gmra.mrb[0].mxu0 %v3810_v49  ;;  %6016 = vmatmul.mubr.bf16.vlgmr.msra.gmra.mrb[0].mxu1 %v3810_v49 }
 0x536   : > { %5693 = vmatprep.mubr.bf16.mxu0 %v3819_v53  ;;  %6025 = vmatprep.mubr.bf16.mxu1 %v3819_v53 }
 0x537   : > { %6523 = vmatpush1.bf16.msra.mxu0 %v9599_v52  ;;  %8627 = vmatpush3.bf16.msra.mxu1 %v9696_v44 }
 0x538   : > { %6524 = vmatprep.subr.bf16.mxu0 %v9604_v50  ;;  %8628 = vmatprep.subr.bf16.mxu1 %v9697_v18 }
 0x53b   : > { %6525 = vmatpush1.bf16.msra.mxu0 %v9602_v57  ;;  %8629 = vmatpush3.bf16.msra.mxu1 %v9698_v58 }
 0x53c   : > { %6526 = vmatprep.subr.bf16.mxu0 %v9607_v29  ;;  %8630 = vmatprep.subr.bf16.mxu1 %v9699_v12  ;;  %v9655_v12 = vld [vmem:[#allocation13 + $0x124] ss:$8 sps:$4 sm:$0xff]  }
 0x53d   : > { %5694 = vmatmul.mubr.bf16.gmra.mrb[4].mxu0 %v3818_v60  ;;  %6026 = vmatmul.mubr.bf16.gmra.mrb[4].mxu1 %v3818_v60 }
 0x53e   : > { %5703 = vmatprep.mubr.bf16.mxu0 %v3827_v0  ;;  %6035 = vmatprep.mubr.bf16.mxu1 %v3827_v0 }
 0x53f   : > { %6527 = vmatpush1.bf16.msra.mxu0 %v9605_v37  ;;  %8631 = vmatpush3.bf16.msra.mxu1 %v9700_v1 }
 0x540   : > { %6528 = vmatprep.subr.bf16.mxu0 %v9610_v6  ;;  %8632 = vmatprep.subr.bf16.mxu1 %v9701_v2 }
 0x543   : > { %6529 = vmatpush1.bf16.msra.mxu0 %v9608_v8  ;;  %8633 = vmatpush3.bf16.msra.mxu1 %v9702_v4 }
 0x544   : > { %6530 = vmatprep.subr.bf16.mxu0 %v9613_v24  ;;  %8634 = vmatprep.subr.bf16.mxu1 %v9703_v11 }
 0x545   : > { %5704 = vmatmul.mubr.bf16.gmra.mrb[8].mxu0 %v3826_v9  ;;  %6036 = vmatmul.mubr.bf16.gmra.mrb[8].mxu1 %v3826_v9 }
 0x546   : > { %5713 = vmatprep.mubr.bf16.mxu0 %v3835_v23  ;;  %6045 = vmatprep.mubr.bf16.mxu1 %v3835_v23 }
 0x547   : > { %6531 = vmatpush1.bf16.msra.mxu0 %v9611_v51  ;;  %8635 = vmatpush3.bf16.msra.mxu1 %v9704_v63 }
 0x548   : > { %6532 = vmatprep.subr.bf16.mxu0 %v9616_v31 }
 0x54b   : > { %6533 = vmatpush1.bf16.msra.mxu0 %v9614_v20 }
 0x54c   : > { %6534 = vmatprep.subr.bf16.mxu0 %v9619_v45 }
 0x54d   : > { %5714 = vmatmul.mubr.bf16.gmra.mrb[12].mxu0 %v3834_v34  ;;  %6046 = vmatmul.mubr.bf16.gmra.mrb[12].mxu1 %v3834_v34 }
 0x54e   : > { %5723 = vmatprep.mubr.bf16.mxu0 %v3843_v42  ;;  %6055 = vmatprep.mubr.bf16.mxu1 %v3843_v42 }
 0x54f   : > { %6535 = vmatpush1.bf16.msra.mxu0 %v9617_v21 }
 0x550   : > { %6536 = vmatprep.subr.bf16.mxu0 %v9622_v19 }
 0x553   : > { %6537 = vmatpush1.bf16.msra.mxu0 %v9620_v25 }
 0x554   : > { %6538 = vmatprep.subr.bf16.mxu0 %v9625_v54 }
 0x555   : > { %5724 = vmatmul.mubr.bf16.gmra.mrb[16].mxu0 %v3842_v15  ;;  %6056 = vmatmul.mubr.bf16.gmra.mrb[16].mxu1 %v3842_v15  ;;  %v9647_v15 = vld [vmem:[#allocation13 + $0x100] ss:$8 sps:$4 sm:$0xff]  }
 0x557   : > { %6539 = vmatpush1.bf16.msra.mxu0 %v9623_v43 }
 0x558   : > { %6540 = vmatprep.subr.bf16.mxu0 %v9628_v16 }
 0x55b   : > { %6541 = vmatpush1.bf16.msra.mxu0 %v9626_v47 }
 0x55c   : > { %6542 = vmatprep.subr.bf16.mxu0 %v9631_v39 }
 0x55f   : > { %6543 = vmatpush1.bf16.msra.mxu0 %v9629_v55  ;;  %v9652_v55 = vld [vmem:[#allocation13 + $0x114] ss:$8 sps:$4 sm:$0xff]  }
 0x560   : > { %6544 = vmatprep.subr.bf16.mxu0 %v9634_v40 }
 0x563   : > { %6545 = vmatpush1.bf16.msra.mxu0 %v9632_v14 }
 0x564   : > { %6546 = vmatprep.subr.bf16.mxu0 %v9637_v48 }
 0x567   : > { %6547 = vmatpush1.bf16.msra.mxu0 %v9635_v56 }
 0x568   : > { %6548 = vmatprep.subr.bf16.mxu0 %v9640_v59 }
 0x56b   : > { %6549 = vmatpush1.bf16.msra.mxu0 %v9638_v62 }
 0x56c   : > { %6550 = vmatprep.subr.bf16.mxu0 %v9643_v22 }
 0x56f   : > { %6551 = vmatpush1.bf16.msra.mxu0 %v9641_v3 }
 0x570   : > { %6552 = vmatprep.subr.bf16.mxu0 %v9646_v46 }
 0x573   : > { %6553 = vmatpush1.bf16.msra.mxu0 %v9644_v17 }
 0x574   : > { %6605 = vmatprep.subr.bf16.mxu0 %v9649_v27  ;;  %v9650_v27 = vld [vmem:[#allocation13 + $0x110] ss:$8 sps:$4 sm:$0xff]  }
 0x608   : > { %v5685_v10 = vpop.f32.mrb[0].mxu0  ;;  %v6017_v30 = vpop.f32.mrb[0].mxu1 }
 0x609   : > { %v8845_v13 = vadd.f32 %v5685_v10, %v11611_v35  ;;  %v8865_v38 = vadd.f32 %v6017_v30, %v11614_v7  ;;  %v5687_v49 = vpop.f32.mrb[1].mxu0  ;;  %v6019_v52 = vpop.f32.mrb[1].mxu1 }
 0x60a   : > { %v8846_v53 = vadd.f32 %v5687_v49, %v11617_v41  ;;  %v8866_v33 = vadd.f32 %v6019_v52, %v11620_v32  ;;  %v5689_v50 = vpop.f32.mrb[2].mxu0  ;;  %v6021_v57 = vpop.f32.mrb[2].mxu1  ;;  %v9653_v49 = vld [vmem:[#allocation13 + $0x120] ss:$8 sps:$4 sm:$0xff]  }
 0x60b   : > { %v8847_v29 = vadd.f32 %v5689_v50, %v11611_v35  ;;  %v8867_v36 = vadd.f32 %v6021_v57, %v11614_v7  ;;  %v5691_v60 = vpop.f32.mrb[3].mxu0  ;;  %v6023_v37 = vpop.f32.mrb[3].mxu1  ;;  %v6066_v8 = vmax.f32 %v8845_v13, 0.0  ;;  %v6068_v24 = vmax.f32 %v8865_v38, 0.0  ;;  %v9658_v57 = vld [vmem:[#allocation13 + $0x134] ss:$8 sps:$4 sm:$0xff]  }
 0x60c   : > { %v8848_v0 = vadd.f32 %v5691_v60, %v11617_v41  ;;  %v8868_v6 = vadd.f32 %v6023_v37, %v11620_v32  ;;  %v6067_v23 = vmax.f32 %v8846_v53, 0.0  ;;  %v6069_v31 = vmax.f32 %v8866_v33, 0.0 }
 0x60d   : > { %v6070_v9 = vmax.f32 %v8847_v29, 0.0  ;;  %v6072_v51 = vmax.f32 %v8867_v36, 0.0 }
 0x60e   : > { %v6071_v20 = vmax.f32 %v8848_v0, 0.0  ;;  %v6073_v45 = vmax.f32 %v8868_v6, 0.0 }
 0x60f   : > { %v6106_v34 = vpack.c.bf16 %v6070_v9, %v6066_v8  ;;  %v11630_v21 = vpack.c.bf16 %v6072_v51, %v6068_v24 }
 0x610   : > { %v6107_v42 = vpack.c.bf16 %v6071_v20, %v6067_v23  ;;  %v11632_v19 = vpack.c.bf16 %v6073_v45, %v6069_v31  ;;  %v5695_v25 = vpop.f32.mrb[4].mxu0  ;;  %v6027_v54 = vpop.f32.mrb[4].mxu1  ;;  %v9656_v23 = vld [vmem:[#allocation13 + $0x130] ss:$8 sps:$4 sm:$0xff]  }
 0x611   : > { %v8849_v43 = vadd.f32 %v5695_v25, %v11611_v35  ;;  %v8869_v16 = vadd.f32 %v6027_v54, %v11614_v7  ;;  %v5697_v47 = vpop.f32.mrb[5].mxu0  ;;  %v6029_v39 = vpop.f32.mrb[5].mxu1 }
 0x612   : > { %v8850_v40 = vadd.f32 %v5697_v47, %v11617_v41  ;;  %v8870_v14 = vadd.f32 %v6029_v39, %v11620_v32  ;;  %v5699_v48 = vpop.f32.mrb[6].mxu0  ;;  %v6031_v56 = vpop.f32.mrb[6].mxu1  ;;  %6554 = vmatprep.mubr.bf16.mxu0 %v6107_v42  ;;  %v9661_v42 = vld [vmem:[#allocation13 + $0x144] ss:$8 sps:$4 sm:$0xff]  }
 0x613   : > { %v8851_v59 = vadd.f32 %v5699_v48, %v11611_v35  ;;  %v8871_v62 = vadd.f32 %v6031_v56, %v11614_v7  ;;  %v5701_v22 = vpop.f32.mrb[7].mxu0  ;;  %v6033_v3 = vpop.f32.mrb[7].mxu1  ;;  %6555 = vmatmul.mubr.bf16.vlgmr.msra.gmra.mrb[20].mxu0 %v6106_v34  ;;  %v6074_v61 = vmax.f32 %v8849_v43, 0.0  ;;  %v6076_v44 = vmax.f32 %v8869_v16, 0.0  ;;  %v9659_v48 = vld [vmem:[#allocation13 + $0x140] ss:$8 sps:$4 sm:$0xff]  }
 0x614   : > { %v8852_v46 = vadd.f32 %v5701_v22, %v11617_v41  ;;  %v8872_v17 = vadd.f32 %v6033_v3, %v11620_v32  ;;  %6606 = vmatpush1.bf16.msra.mxu0 %v9647_v15  ;;  %v6075_v1 = vmax.f32 %v8850_v40, 0.0  ;;  %v6077_v2 = vmax.f32 %v8870_v14, 0.0  ;;  %v9664_v3 = vld [vmem:[#allocation13 + $0x154] ss:$8 sps:$4 sm:$0xff]  }
 0x615   : > { %v6078_v18 = vmax.f32 %v8851_v59, 0.0  ;;  %v6080_v58 = vmax.f32 %v8871_v62, 0.0  ;;  %6607 = vmatprep.subr.bf16.mxu0 %v9652_v55 }
 0x616   : > { %v6079_v4 = vmax.f32 %v8852_v46, 0.0  ;;  %v6081_v11 = vmax.f32 %v8872_v17, 0.0 }
 0x617   : > { %v6110_v5 = vpack.c.bf16 %v6078_v18, %v6074_v61  ;;  %v11642_v63 = vpack.c.bf16 %v6080_v58, %v6076_v44 }
 0x618   : > { %v6111_v10 = vpack.c.bf16 %v6079_v4, %v6075_v1  ;;  %v11644_v30 = vpack.c.bf16 %v6081_v11, %v6077_v2  ;;  %6608 = vmatpush1.bf16.msra.mxu0 %v9650_v27  ;;  %v5705_v13 = vpop.f32.mrb[8].mxu0  ;;  %v6037_v38 = vpop.f32.mrb[8].mxu1  ;;  %v9662_v4 = vld [vmem:[#allocation13 + $0x150] ss:$8 sps:$4 sm:$0xff]  }
 0x619   : > { %v8853_v52 = vadd.f32 %v5705_v13, %v11611_v35  ;;  %v8873_v53 = vadd.f32 %v6037_v38, %v11614_v7  ;;  %v5707_v33 = vpop.f32.mrb[9].mxu0  ;;  %v6039_v50 = vpop.f32.mrb[9].mxu1  ;;  %6609 = vmatprep.subr.bf16.mxu0 %v9655_v12  ;;  %v9667_v38 = vld [vmem:[#allocation13 + $0x164] ss:$8 sps:$4 sm:$0xff]  }
 0x61a   : > { %v8854_v29 = vadd.f32 %v5707_v33, %v11617_v41  ;;  %v8874_v36 = vadd.f32 %v6039_v50, %v11620_v32  ;;  %v5709_v60 = vpop.f32.mrb[10].mxu0  ;;  %v6041_v37 = vpop.f32.mrb[10].mxu1  ;;  %6564 = vmatprep.mubr.bf16.mxu0 %v6111_v10 }
 0x61b   : > { %v8855_v0 = vadd.f32 %v5709_v60, %v11611_v35  ;;  %v8875_v6 = vadd.f32 %v6041_v37, %v11614_v7  ;;  %v5711_v8 = vpop.f32.mrb[11].mxu0  ;;  %v6043_v24 = vpop.f32.mrb[11].mxu1  ;;  %6565 = vmatmul.mubr.bf16.gmra.mrb[24].mxu0 %v6110_v5  ;;  %v6082_v31 = vmax.f32 %v8853_v52, 0.0  ;;  %v6084_v20 = vmax.f32 %v8873_v53, 0.0 }
 0x61c   : > { %v8856_v9 = vadd.f32 %v5711_v8, %v11617_v41  ;;  %v8876_v51 = vadd.f32 %v6043_v24, %v11620_v32  ;;  %6610 = vmatpush1.bf16.msra.mxu0 %v9653_v49  ;;  %v6083_v25 = vmax.f32 %v8854_v29, 0.0  ;;  %v6085_v54 = vmax.f32 %v8874_v36, 0.0 }
 0x61d   : > { %v6086_v45 = vmax.f32 %v8855_v0, 0.0  ;;  %v6088_v34 = vmax.f32 %v8875_v6, 0.0  ;;  %6611 = vmatprep.subr.bf16.mxu0 %v9658_v57  ;;  %v9665_v0 = vld [vmem:[#allocation13 + $0x160] ss:$8 sps:$4 sm:$0xff]  }
 0x61e   : > { %v6087_v15 = vmax.f32 %v8856_v9, 0.0  ;;  %v6089_v43 = vmax.f32 %v8876_v51, 0.0  ;;  %v9670_v51 = vld [vmem:[#allocation13 + $0x174] ss:$8 sps:$4 sm:$0xff]  }
 0x61f   : > { %v6114_v16 = vpack.c.bf16 %v6086_v45, %v6082_v31  ;;  %v11654_v47 = vpack.c.bf16 %v6088_v34, %v6084_v20 }
 0x620   : > { %v6115_v39 = vpack.c.bf16 %v6087_v15, %v6083_v25  ;;  %v11656_v55 = vpack.c.bf16 %v6089_v43, %v6085_v54  ;;  %6612 = vmatpush1.bf16.msra.mxu0 %v9656_v23  ;;  %v5715_v40 = vpop.f32.mrb[12].mxu0  ;;  %v6047_v14 = vpop.f32.mrb[12].mxu1 }
 0x621   : > { %v8857_v56 = vadd.f32 %v5715_v40, %v11611_v35  ;;  %v8877_v59 = vadd.f32 %v6047_v14, %v11614_v7  ;;  %v5717_v62 = vpop.f32.mrb[13].mxu0  ;;  %v6049_v22 = vpop.f32.mrb[13].mxu1  ;;  %6613 = vmatprep.subr.bf16.mxu0 %v9661_v42 }
 0x622   : > { %v8858_v46 = vadd.f32 %v5717_v62, %v11617_v41  ;;  %v8878_v17 = vadd.f32 %v6049_v22, %v11620_v32  ;;  %v5719_v27 = vpop.f32.mrb[14].mxu0  ;;  %v6051_v61 = vpop.f32.mrb[14].mxu1  ;;  %6574 = vmatprep.mubr.bf16.mxu0 %v6115_v39 }
 0x623   : > { %v8859_v44 = vadd.f32 %v5719_v27, %v11611_v35  ;;  %v8879_v18 = vadd.f32 %v6051_v61, %v11614_v7  ;;  %v5721_v58 = vpop.f32.mrb[15].mxu0  ;;  %v6053_v12 = vpop.f32.mrb[15].mxu1  ;;  %6575 = vmatmul.mubr.bf16.gmra.mrb[28].mxu0 %v6114_v16  ;;  %v6090_v11 = vmax.f32 %v8857_v56, 0.0  ;;  %v6092_v5 = vmax.f32 %v8877_v59, 0.0  ;;  %v9668_v16 = vld [vmem:[#allocation13 + $0x170] ss:$8 sps:$4 sm:$0xff]  }
 0x624   : > { %v8860_v1 = vadd.f32 %v5721_v58, %v11617_v41  ;;  %v8880_v2 = vadd.f32 %v6053_v12, %v11620_v32  ;;  %6614 = vmatpush1.bf16.msra.mxu0 %v9659_v48  ;;  %v6091_v49 = vmax.f32 %v8858_v46, 0.0  ;;  %v6093_v52 = vmax.f32 %v8878_v17, 0.0  ;;  %v9673_v56 = vld [vmem:[#allocation13 + $0x184] ss:$8 sps:$4 sm:$0xff]   ;;  %v9674_v27 = vld [vmem:[#allocation13 + $0x190] ss:$8 sps:$4 sm:$0xff]  }
 0x625   : > { %v6094_v10 = vmax.f32 %v8859_v44, 0.0  ;;  %v6096_v13 = vmax.f32 %v8879_v18, 0.0  ;;  %6615 = vmatprep.subr.bf16.mxu0 %v9664_v3  ;;  %v9679_v61 = vld [vmem:[#allocation13 + $0x1a4] ss:$8 sps:$4 sm:$0xff]   ;;  %v9677_v44 = vld [vmem:[#allocation13 + $0x1a0] ss:$8 sps:$4 sm:$0xff]  }
 0x626   : > { %v6095_v53 = vmax.f32 %v8860_v1, 0.0  ;;  %v6097_v33 = vmax.f32 %v8880_v2, 0.0  ;;  %v9682_v18 = vld [vmem:[#allocation13 + $0x1b4] ss:$8 sps:$4 sm:$0xff]   ;;  %v9680_v58 = vld [vmem:[#allocation13 + $0x1b0] ss:$8 sps:$4 sm:$0xff]  }
 0x627   : > { %v6118_v50 = vpack.c.bf16 %v6094_v10, %v6090_v11  ;;  %v11666_v57 = vpack.c.bf16 %v6096_v13, %v6092_v5  ;;  %v9685_v12 = vld [vmem:[#allocation13 + $0x1c4] ss:$8 sps:$4 sm:$0xff]   ;;  %v9683_v1 = vld [vmem:[#allocation13 + $0x1c0] ss:$8 sps:$4 sm:$0xff]   ;;  %v9688_v2 = vld [vmem:[#allocation13 + $0x1d4] ss:$8 sps:$4 sm:$0xff]  }
 0x628   : > { %v6119_v29 = vpack.c.bf16 %v6095_v53, %v6091_v49  ;;  %v11668_v36 = vpack.c.bf16 %v6097_v33, %v6093_v52  ;;  %6616 = vmatpush1.bf16.msra.mxu0 %v9662_v4  ;;  %v5725_v60 = vpop.f32.mrb[16].mxu0  ;;  %v6057_v37 = vpop.f32.mrb[16].mxu1  ;;  %v9686_v4 = vld [vmem:[#allocation13 + $0x1d0] ss:$8 sps:$4 sm:$0xff]   ;;  %v9691_v11 = vld [vmem:[#allocation13 + $0x1e4] ss:$8 sps:$4 sm:$0xff]  }
 0x629   : > { %v8861_v6 = vadd.f32 %v5725_v60, %v11611_v35  ;;  %v8881_v8 = vadd.f32 %v6057_v37, %v11614_v7  ;;  %v5727_v24 = vpop.f32.mrb[17].mxu0  ;;  %v6059_v9 = vpop.f32.mrb[17].mxu1  ;;  %6617 = vmatprep.subr.bf16.mxu0 %v9667_v38  ;;  %v9694_v5 = vld [vmem:[#allocation13 + $0x1f4] ss:$8 sps:$4 sm:$0xff]   ;;  %v9692_v10 = vld [vmem:[#allocation13 + $0x1f0] ss:$8 sps:$4 sm:$0xff]  }
 0x62a   : > { %v8862_v23 = vadd.f32 %v5727_v24, %v11617_v41  ;;  %v8882_v31 = vadd.f32 %v6059_v9, %v11620_v32  ;;  %v5729_v20 = vpop.f32.mrb[18].mxu0  ;;  %v6061_v45 = vpop.f32.mrb[18].mxu1  ;;  %6584 = vmatprep.mubr.bf16.mxu0 %v6119_v29  ;;  %v9705_v13 = vld [vmem:[#allocation16 + $0xe8] sm:$0xff]   ;;  %v9707_v49 = vld [vmem:[#allocation16 + $0xf0] sm:$0xff]   ;;  %v9709_v52 = vld [vmem:[#allocation16 + $0x240] sm:$0xff]  }
 0x62b   : > { %v8863_v34 = vadd.f32 %v5729_v20, %v11611_v35  ;;  %v8883_v42 = vadd.f32 %v6061_v45, %v11614_v7  ;;  %v5731_v25 = vpop.f32.mrb[19].mxu0  ;;  %v6063_v54 = vpop.f32.mrb[19].mxu1  ;;  %6585 = vmatmul.mubr.bf16.gmra.mrb[32].mxu0 %v6118_v50  ;;  %v6098_v39 = vmax.f32 %v8861_v6, 0.0  ;;  %v6100_v40 = vmax.f32 %v8881_v8, 0.0  ;;  %v9706_v38 = vld [vmem:[#allocation16 + $0xa8] sm:$0xff]   ;;  %8636 = vmatprep.subr.bf16.mxu1 %v9705_v13  ;;  %v9715_v33 = vld [vmem:[#allocation16 + $0x40] sm:$0xff]  }
 0x62c   : > { %v8864_v15 = vadd.f32 %v5731_v25, %v11617_v41  ;;  %v8884_v43 = vadd.f32 %v6063_v54, %v11620_v32  ;;  %6618 = vmatpush1.bf16.msra.mxu0 %v9665_v0  ;;  %v6099_v59 = vmax.f32 %v8862_v23, 0.0  ;;  %v6101_v62 = vmax.f32 %v8882_v31, 0.0  ;;  %v9671_v41 = vld [vmem:[#allocation13 + $0x180] ss:$8 sps:$4 sm:$0xff]   ;;  %v9676_v32 = vld [vmem:[#allocation13 + $0x194] ss:$8 sps:$4 sm:$0xff]   ;;  %8637 = vmatpush3.bf16.msra.mxu1 %v9706_v38 }
 0x62d   : > { %v6102_v14 = vmax.f32 %v8863_v34, 0.0  ;;  %v6104_v48 = vmax.f32 %v8883_v42, 0.0  ;;  %6619 = vmatprep.subr.bf16.mxu0 %v9670_v51  ;;  %8638 = vmatprep.subr.bf16.mxu1 %v9707_v49  ;;  %v9714_v53 = vld [vmem:[#allocation16 + $0x208] sm:$0xff]   ;;  %v9717_v50 = vld [vmem:[#allocation16 + $0x250] sm:$0xff]   ;;  %v9721_v29 = vld [vmem:[#allocation16 + $0x258] sm:$0xff]  }
 0x62e   : > { %v6103_v35 = vmax.f32 %v8864_v15, 0.0  ;;  %v6105_v22 = vmax.f32 %v8884_v43, 0.0  ;;  %v9725_v60 = vld [vmem:[#allocation16 + $0x260] sm:$0xff]   ;;  %v9729_v0 = vld [vmem:[#allocation16 + $0x268] sm:$0xff]   ;;  %v9733_v8 = vld [vmem:[#allocation16 + $0x270] sm:$0xff]  }
 0x62f   : > { %v6122_v7 = vpack.c.bf16 %v6102_v14, %v6098_v39  ;;  %v6124_v3 = vpack.c.bf16 %v6104_v48, %v6100_v40  ;;  %v9726_v37 = vld [vmem:[#allocation16 + $0x220] sm:$0xff]   ;;  %v9730_v6 = vld [vmem:[#allocation16 + $0x228] sm:$0xff]   ;;  %v9734_v24 = vld [vmem:[#allocation16 + $0x230] sm:$0xff]  }
 0x630   : > { %v6123_v46 = vpack.c.bf16 %v6103_v35, %v6099_v59  ;;  %v6125_v17 = vpack.c.bf16 %v6105_v22, %v6101_v62  ;;  %6620 = vmatpush1.bf16.msra.mxu0 %v9668_v16  ;;  %v9737_v9 = vld [vmem:[#allocation16 + $0x278] sm:$0xff]   ;;  %v9720_v13 = vld [vmem:[#allocation16 + $0x8] sm:$0xff]  }
 0x631   : > { %6621 = vmatprep.subr.bf16.mxu0 %v9673_v56  ;;  %v9738_v51 = vld [vmem:[#allocation16 + $0x238] sm:$0xff]  }
 0x632   : > { %6594 = vmatprep.mubr.bf16.mxu0 %v6123_v46  ;;  %v6190_v23 = vld [vmem:[#allocation14] sm:$0x3] }
 0x633   : > { %6595 = vmatmul.mubr.bf16.gmra.mrb[36].mxu0 %v6122_v7  ;;  %v11687_v31 = vrot.slane %v6190_v23, %v10927_v26  ;;  %v11690_v20 = vrot.slane %v6190_v23, %v10931_v28 }
 0x634   : > { %6622 = vmatpush1.bf16.msra.mxu0 %v9671_v41  ;;  %6637 = vmatprep.mubr.bf16.mxu0 %v11632_v19  ;;  %v9689_v19 = vld [vmem:[#allocation13 + $0x1e0] ss:$8 sps:$4 sm:$0xff]  }
 0x635   : > { %6623 = vmatprep.subr.bf16.mxu0 %v9676_v32 }
 0x638   : > { %6624 = vmatpush1.bf16.msra.mxu0 %v9674_v27 }
 0x639   : > { %6625 = vmatprep.subr.bf16.mxu0 %v9679_v61 }
 0x63c   : > { %6626 = vmatpush1.bf16.msra.mxu0 %v9677_v44 }
 0x63d   : > { %6627 = vmatprep.subr.bf16.mxu0 %v9682_v18 }
 0x640   : > { %6628 = vmatpush1.bf16.msra.mxu0 %v9680_v58  ;;  %v9716_v58 = vld [vmem:[#allocation16] sm:$0xff]  }
 0x641   : > { %6629 = vmatprep.subr.bf16.mxu0 %v9685_v12 }
 0x644   : > { %6630 = vmatpush1.bf16.msra.mxu0 %v9683_v1 }
 0x645   : > { %6631 = vmatprep.subr.bf16.mxu0 %v9688_v2  ;;  %v9719_v2 = vld [vmem:[#allocation16 + $0x48] sm:$0xff]  }
 0x648   : > { %6632 = vmatpush1.bf16.msra.mxu0 %v9686_v4 }
 0x649   : > { %6633 = vmatprep.subr.bf16.mxu0 %v9691_v11 }
 0x64c   : > { %6634 = vmatpush1.bf16.msra.mxu0 %v9689_v19 }
 0x64d   : > { %6635 = vmatprep.subr.bf16.mxu0 %v9694_v5 }
 0x650   : > { %6636 = vmatpush1.bf16.msra.mxu0 %v9692_v10 }
 0x651   : > { %8714 = vmatprep.subr.bf16.mxu0 %v9709_v52 }
 0x653   : > { %6638 = vmatmul.mubr.bf16.vlgmr.msra.gmra.mrb[20].mxu0 %v11630_v21  ;;  %v9708_v21 = vld [vmem:[#allocation16 + $0xb0] sm:$0xff]  }
 0x654   : > { %6647 = vmatprep.mubr.bf16.mxu0 %v11644_v30  ;;  %v9710_v30 = vld [vmem:[#allocation16 + $0x200] sm:$0xff]   ;;  %8639 = vmatpush3.bf16.msra.mxu1 %v9708_v21  ;;  %v9723_v21 = vld [vmem:[#allocation16 + $0x50] sm:$0xff]  }
 0x655   : > { %8715 = vmatpush3.bf16.msra.mxu0 %v9710_v30 }
 0x65b   : > { %6648 = vmatmul.mubr.bf16.gmra.mrb[24].mxu0 %v11642_v63  ;;  %v9711_v63 = vld [vmem:[#allocation16 + $0xf8] sm:$0xff]  }
 0x65c   : > { %6657 = vmatprep.mubr.bf16.mxu0 %v11656_v55  ;;  %v9713_v55 = vld [vmem:[#allocation16 + $0x248] sm:$0xff]   ;;  %8640 = vmatprep.subr.bf16.mxu1 %v9711_v63 }
 0x65d   : > { %8716 = vmatprep.subr.bf16.mxu0 %v9713_v55 }
 0x65e   : > { %8717 = vmatpush3.bf16.msra.mxu0 %v9714_v53  ;;  %v9724_v53 = vld [vmem:[#allocation16 + $0x10] sm:$0xff]  }
 0x65f   : > { %8718 = vmatprep.subr.bf16.mxu0 %v9717_v50 }
 0x663   : > { %6658 = vmatmul.mubr.bf16.gmra.mrb[28].mxu0 %v11654_v47  ;;  %v9712_v47 = vld [vmem:[#allocation16 + $0xb8] sm:$0xff]  }
 0x664   : > { %6667 = vmatprep.mubr.bf16.mxu0 %v11668_v36  ;;  %8641 = vmatpush3.bf16.msra.mxu1 %v9712_v47  ;;  %v9722_v36 = vld [vmem:[#allocation16 + $0x218] sm:$0xff]  }
 0x665   : > { %8648 = vmatprep.subr.bf16.mxu1 %v9715_v33 }
 0x66b   : > { %6668 = vmatmul.mubr.bf16.gmra.mrb[32].mxu0 %v11666_v57  ;;  %v9718_v57 = vld [vmem:[#allocation16 + $0x210] sm:$0xff]  }
 0x66c   : > { %6677 = vmatprep.mubr.bf16.mxu0 %v6125_v17  ;;  %8719 = vmatpush3.bf16.msra.mxu0 %v9718_v57  ;;  %v9727_v57 = vld [vmem:[#allocation16 + $0x58] sm:$0xff]  }
 0x66d   : > { %8720 = vmatprep.subr.bf16.mxu0 %v9721_v29 }
 0x670   : > { %8721 = vmatpush3.bf16.msra.mxu0 %v9722_v36 }
 0x671   : > { %8722 = vmatprep.subr.bf16.mxu0 %v9725_v60 }
 0x673   : > { %6678 = vmatmul.mubr.bf16.gmra.mrb[36].mxu0 %v6124_v3 }
 0x674   : > { %8723 = vmatpush3.bf16.msra.mxu0 %v9726_v37 }
 0x675   : > { %8724 = vmatprep.subr.bf16.mxu0 %v9729_v0 }
 0x678   : > { %8725 = vmatpush3.bf16.msra.mxu0 %v9730_v6  ;;  %v9728_v6 = vld [vmem:[#allocation16 + $0x18] sm:$0xff]  }
 0x679   : > { %8726 = vmatprep.subr.bf16.mxu0 %v9733_v8 }
 0x67c   : > { %8727 = vmatpush3.bf16.msra.mxu0 %v9734_v24 }
 0x67d   : > { %8728 = vmatprep.subr.bf16.mxu0 %v9737_v9  ;;  %v9731_v9 = vld [vmem:[#allocation16 + $0x60] sm:$0xff]  }
 0x680   : > { %8729 = vmatpush3.bf16.msra.mxu0 %v9738_v51 }
 0x726   : > { %v6639_v45 = vpop.f32.mrb[20].mxu0 }
 0x727   : > { %v8885_v34 = vadd.f32 %v6639_v45, %v11687_v31  ;;  %v6641_v42 = vpop.f32.mrb[21].mxu0 }
 0x728   : > { %v8886_v25 = vadd.f32 %v6641_v42, %v11690_v20  ;;  %v6643_v54 = vpop.f32.mrb[22].mxu0 }
 0x729   : > { %v8887_v15 = vadd.f32 %v6643_v54, %v11687_v31  ;;  %v6645_v43 = vpop.f32.mrb[23].mxu0  ;;  %v6688_v39 = vmax.f32 %v8885_v34, 0.0 }
 0x72a   : > { %v8888_v16 = vadd.f32 %v6645_v43, %v11690_v20  ;;  %v6689_v14 = vmax.f32 %v8886_v25, 0.0  ;;  %v9732_v25 = vld [vmem:[#allocation16 + $0x20] sm:$0xff]   ;;  %v9735_v43 = vld [vmem:[#allocation16 + $0x68] sm:$0xff]  }
 0x72b   : > { %v6690_v40 = vmax.f32 %v8887_v15, 0.0 }
 0x72c   : > { %v6691_v26 = vmax.f32 %v8888_v16, 0.0 }
 0x72d   : > { %v11696_v48 = vpack.c.bf16 %v6690_v40, %v6688_v39 }
 0x72e   : > { %v6709_v28 = vpack.c.bf16 %v6691_v26, %v6689_v14  ;;  %v6649_v56 = vpop.f32.mrb[24].mxu0 }
 0x72f   : > { %v8889_v59 = vadd.f32 %v6649_v56, %v11687_v31  ;;  %v6651_v62 = vpop.f32.mrb[25].mxu0 }
 0x730   : > { %v8890_v35 = vadd.f32 %v6651_v62, %v11690_v20  ;;  %v6653_v22 = vpop.f32.mrb[26].mxu0  ;;  %v9739_v62 = vld [vmem:[#allocation16 + $0x70] sm:$0xff]  }
 0x731   : > { %v8891_v7 = vadd.f32 %v6653_v22, %v11687_v31  ;;  %v6655_v3 = vpop.f32.mrb[27].mxu0  ;;  %v6692_v17 = vmax.f32 %v8889_v59, 0.0 }
 0x732   : > { %v8892_v46 = vadd.f32 %v6655_v3, %v11690_v20  ;;  %v6693_v32 = vmax.f32 %v8890_v35, 0.0 }
 0x733   : > { %v6694_v41 = vmax.f32 %v8891_v7, 0.0 }
 0x734   : > { %v6695_v27 = vmax.f32 %v8892_v46, 0.0  ;;  %v9740_v46 = vld [vmem:[#allocation16 + $0x30] sm:$0xff]  }
 0x735   : > { %v6710_v61 = vpack.c.bf16 %v6694_v41, %v6692_v17  ;;  %v9741_v17 = vld [vmem:[#allocation16 + $0x78] sm:$0xff]   ;;  %v9744_v41 = vld [vmem:[#allocation16 + $0x100] sm:$0xff]  }
 0x736   : > { %v6711_v44 = vpack.c.bf16 %v6695_v27, %v6693_v32  ;;  %v6659_v18 = vpop.f32.mrb[28].mxu0  ;;  %v9745_v32 = vld [vmem:[#allocation16 + $0x148] sm:$0xff]  }
 0x737   : > { %v8893_v12 = vadd.f32 %v6659_v18, %v11687_v31  ;;  %v6661_v1 = vpop.f32.mrb[29].mxu0  ;;  %v9746_v27 = vld [vmem:[#allocation16 + $0x108] sm:$0xff]   ;;  %v9749_v18 = vld [vmem:[#allocation16 + $0x158] sm:$0xff]  }
 0x738   : > { %v8894_v4 = vadd.f32 %v6661_v1, %v11690_v20  ;;  %v6663_v11 = vpop.f32.mrb[30].mxu0  ;;  %6910 = vmatprep.mubr.bf16.mxu1 %v6711_v44  ;;  %v9748_v44 = vld [vmem:[#allocation16 + $0x110] sm:$0xff]   ;;  %v9752_v1 = vld [vmem:[#allocation16 + $0x120] sm:$0xff]  }
 0x739   : > { %v8895_v19 = vadd.f32 %v6663_v11, %v11687_v31  ;;  %v6665_v5 = vpop.f32.mrb[31].mxu0  ;;  %6911 = vmatmul.mubr.bf16.vlgmr.msra.gmra.mrb[20].mxu1 %v6710_v61  ;;  %v6696_v38 = vmax.f32 %v8893_v12, 0.0  ;;  %v9747_v61 = vld [vmem:[#allocation16 + $0x150] sm:$0xff]   ;;  %v9751_v12 = vld [vmem:[#allocation16 + $0x160] sm:$0xff]  }
 0x73a   : > { %v8896_v10 = vadd.f32 %v6665_v5, %v11690_v20  ;;  %8649 = vmatpush3.bf16.msra.mxu1 %v9716_v58  ;;  %7047 = vmatprep.mubr.bf16.mxu1 %v6709_v28  ;;  %v6697_v52 = vmax.f32 %v8894_v4, 0.0  ;;  %v9736_v28 = vld [vmem:[#allocation16 + $0x28] sm:$0xff]   ;;  %v9750_v58 = vld [vmem:[#allocation16 + $0x118] sm:$0xff]   ;;  %v9756_v11 = vld [vmem:[#allocation16 + $0x130] sm:$0xff]  }
 0x73b   : > { %v6698_v49 = vmax.f32 %v8895_v19, 0.0  ;;  %8650 = vmatprep.subr.bf16.mxu1 %v9719_v2  ;;  %v9753_v2 = vld [vmem:[#allocation16 + $0x168] sm:$0xff]   ;;  %v9757_v19 = vld [vmem:[#allocation16 + $0x178] sm:$0xff]  }
 0x73c   : > { %v6699_v30 = vmax.f32 %v8896_v10, 0.0  ;;  %v9754_v4 = vld [vmem:[#allocation16 + $0x128] sm:$0xff]   ;;  %v9758_v5 = vld [vmem:[#allocation16 + $0x138] sm:$0xff]   ;;  %v9759_v10 = vld [vmem:[#allocation16 + $0x1c0] sm:$0xff]  }
 0x73d   : > { %v11706_v63 = vpack.c.bf16 %v6698_v49, %v6696_v38  ;;  %v9761_v38 = vld [vmem:[#allocation16 + $0x1c8] sm:$0xff]  }
 0x73e   : > { %v6713_v47 = vpack.c.bf16 %v6699_v30, %v6697_v52  ;;  %8651 = vmatpush3.bf16.msra.mxu1 %v9720_v13  ;;  %v6669_v55 = vpop.f32.mrb[32].mxu0  ;;  %v9760_v13 = vld [vmem:[#allocation16 + $0x180] sm:$0xff]   ;;  %v9762_v49 = vld [vmem:[#allocation16 + $0x188] sm:$0xff]   ;;  %v9764_v52 = vld [vmem:[#allocation16 + $0x190] sm:$0xff]  }
 0x73f   : > { %v8897_v33 = vadd.f32 %v6669_v55, %v11687_v31  ;;  %v6671_v50 = vpop.f32.mrb[33].mxu0  ;;  %8652 = vmatprep.subr.bf16.mxu1 %v9723_v21  ;;  %v9763_v21 = vld [vmem:[#allocation16 + $0x1d0] sm:$0xff]   ;;  %v9765_v30 = vld [vmem:[#allocation16 + $0x1d8] sm:$0xff]   ;;  %v9767_v55 = vld [vmem:[#allocation16 + $0x1e0] sm:$0xff]  }
 0x740   : > { %v8898_v29 = vadd.f32 %v6671_v50, %v11690_v20  ;;  %v6673_v36 = vpop.f32.mrb[34].mxu0  ;;  %v9771_v50 = vld [vmem:[#allocation16 + $0x1f0] sm:$0xff]  }
 0x741   : > { %v8899_v60 = vadd.f32 %v6673_v36, %v11687_v31  ;;  %v6675_v37 = vpop.f32.mrb[35].mxu0  ;;  %v6700_v8 = vmax.f32 %v8897_v33, 0.0  ;;  %v9769_v33 = vld [vmem:[#allocation16 + $0x1e8] sm:$0xff]   ;;  %v9774_v36 = vld [vmem:[#allocation16 + $0x1b8] sm:$0xff]  }
 0x742   : > { %v8900_v0 = vadd.f32 %v6675_v37, %v11690_v20  ;;  %8653 = vmatpush3.bf16.msra.mxu1 %v9724_v53  ;;  %v6701_v51 = vmax.f32 %v8898_v29, 0.0  ;;  %v9768_v53 = vld [vmem:[#allocation16 + $0x1a0] sm:$0xff]   ;;  %v9773_v29 = vld [vmem:[#allocation16 + $0x1f8] sm:$0xff]   ;;  %v10225_v37 = vmov 0.0  }
 0x743   : > { %v6702_v24 = vmax.f32 %v8899_v60, 0.0  ;;  %8654 = vmatprep.subr.bf16.mxu1 %v9727_v57  ;;  %v9772_v57 = vld [vmem:[#allocation16 + $0x1b0] sm:$0xff]   ;;  %v9775_v60 = vld [vmem:[#allocation19] sm:$0xff]  }
 0x744   : > { %v6703_v23 = vmax.f32 %v8900_v0, 0.0  ;;  %v9776_v0 = vld [vmem:[#allocation19 + $0x8] sm:$0xff]  }
 0x745   : > { %v11712_v45 = vpack.c.bf16 %v6702_v24, %v6700_v8  ;;  %v9778_v8 = vld [vmem:[#allocation19 + $0x18] sm:$0xff]   ;;  %v9779_v24 = vld [vmem:[#allocation19 + $0x20] sm:$0xff]  }
 0x746   : > { %v11714_v34 = vpack.c.bf16 %v6703_v23, %v6701_v51  ;;  %8655 = vmatpush3.bf16.msra.mxu1 %v9728_v6  ;;  %v6679_v42 = vpop.f32.mrb[36].mxu0  ;;  %v9777_v6 = vld [vmem:[#allocation19 + $0x10] sm:$0xff]  }
 0x747   : > { %v8901_v54 = vadd.f32 %v6679_v42, %v11687_v31  ;;  %v6681_v15 = vpop.f32.mrb[37].mxu0  ;;  %8656 = vmatprep.subr.bf16.mxu1 %v9731_v9  ;;  %v9780_v9 = vld [vmem:[#allocation19 + $0x28] sm:$0xff]   ;;  %v9781_v51 = vld [vmem:[#allocation19 + $0x30] sm:$0xff]  }
 0x748   : > { %v8902_v16 = vadd.f32 %v6681_v15, %v11690_v20  ;;  %v6683_v39 = vpop.f32.mrb[38].mxu0 }
 0x749   : > { %v8903_v40 = vadd.f32 %v6683_v39, %v11687_v31  ;;  %v6685_v14 = vpop.f32.mrb[39].mxu0  ;;  %v6704_v56 = vmax.f32 %v8901_v54, 0.0  ;;  %v9742_v31 = vld [vmem:[#allocation16 + $0x38] sm:$0xff]  }
 0x74a   : > { %v8904_v26 = vadd.f32 %v6685_v14, %v11690_v20  ;;  %8657 = vmatpush3.bf16.msra.mxu1 %v9732_v25  ;;  %v6705_v35 = vmax.f32 %v8902_v16, 0.0  ;;  %v9743_v20 = vld [vmem:[#allocation16 + $0x140] sm:$0xff]  }
 0x74b   : > { %v6706_v59 = vmax.f32 %v8903_v40, 0.0  ;;  %8658 = vmatprep.subr.bf16.mxu1 %v9735_v43 }
 0x74c   : > { %v6707_v22 = vmax.f32 %v8904_v26, 0.0 }
 0x74d   : > { %v6716_v7 = vpack.c.bf16 %v6706_v59, %v6704_v56 }
 0x74e   : > { %v6717_v3 = vpack.c.bf16 %v6707_v22, %v6705_v35  ;;  %8659 = vmatpush3.bf16.msra.mxu1 %v9736_v28 }
 0x74f   : > { %8660 = vmatprep.subr.bf16.mxu1 %v9739_v62 }
 0x750   : > { %7558 = vmatprep.mubr.bf16.mxu0 %v6717_v3 }
 0x751   : > { %7559 = vmatmul.mubr.bf16.vlgmr.msra.gmra.mrb[40].mxu0 %v6716_v7 }
 0x752   : > { %8661 = vmatpush3.bf16.msra.mxu1 %v9740_v46 }
 0x753   : > { %8662 = vmatprep.subr.bf16.mxu1 %v9741_v17 }
 0x756   : > { %8663 = vmatpush3.bf16.msra.mxu1 %v9742_v31 }
 0x757   : > { %8670 = vmatprep.subr.bf16.mxu1 %v9743_v20 }
 0x759   : > { %7048 = vmatmul.mubr.bf16.vlgmr.msra.gmra.mrb[24].mxu1 %v11696_v48  ;;  %v9755_v48 = vld [vmem:[#allocation16 + $0x170] sm:$0xff]  }
 0x75a   : > { %8671 = vmatpush3.bf16.msra.mxu1 %v9744_v41  ;;  %7216 = vmatprep.mubr.bf16.mxu1 %v6713_v47  ;;  %v9766_v47 = vld [vmem:[#allocation16 + $0x198] sm:$0xff]  }
 0x75b   : > { %8672 = vmatprep.subr.bf16.mxu1 %v9745_v32 }
 0x75e   : > { %8673 = vmatpush3.bf16.msra.mxu1 %v9746_v27 }
 0x75f   : > { %8674 = vmatprep.subr.bf16.mxu1 %v9747_v61 }
 0x762   : > { %8675 = vmatpush3.bf16.msra.mxu1 %v9748_v44 }
 0x763   : > { %8676 = vmatprep.subr.bf16.mxu1 %v9749_v18 }
 0x766   : > { %8677 = vmatpush3.bf16.msra.mxu1 %v9750_v58 }
 0x767   : > { %8678 = vmatprep.subr.bf16.mxu1 %v9751_v12 }
 0x76a   : > { %8679 = vmatpush3.bf16.msra.mxu1 %v9752_v1 }
 0x76b   : > { %8680 = vmatprep.subr.bf16.mxu1 %v9753_v2 }
 0x76e   : > { %8681 = vmatpush3.bf16.msra.mxu1 %v9754_v4 }
 0x76f   : > { %8682 = vmatprep.subr.bf16.mxu1 %v9755_v48  ;;  %v8608_v48 = vld [vmem:[#allocation17] ss:$0 sm:$0xff] }
 0x772   : > { %8683 = vmatpush3.bf16.msra.mxu1 %v9756_v11 }
 0x773   : > { %8684 = vmatprep.subr.bf16.mxu1 %v9757_v19 }
 0x776   : > { %8685 = vmatpush3.bf16.msra.mxu1 %v9758_v5 }
 0x777   : > { %8692 = vmatprep.subr.bf16.mxu1 %v9759_v10 }
 0x779   : > { %7217 = vmatmul.mubr.bf16.vlgmr.msra.gmra.mrb[28].mxu1 %v11706_v63  ;;  %v9770_v63 = vld [vmem:[#allocation16 + $0x1a8] sm:$0xff]  }
 0x77a   : > { %8693 = vmatpush3.bf16.msra.mxu1 %v9760_v13  ;;  %7387 = vmatprep.mubr.bf16.mxu1 %v11714_v34  ;;  %v9782_v34 = vld [vmem:[#allocation19 + $0x38] sm:$0xff]  }
 0x77b   : > { %8694 = vmatprep.subr.bf16.mxu1 %v9761_v38 }
 0x77e   : > { %8695 = vmatpush3.bf16.msra.mxu1 %v9762_v49 }
 0x77f   : > { %8696 = vmatprep.subr.bf16.mxu1 %v9763_v21 }
 0x782   : > { %8697 = vmatpush3.bf16.msra.mxu1 %v9764_v52 }
 0x783   : > { %8698 = vmatprep.subr.bf16.mxu1 %v9765_v30 }
 0x786   : > { %8699 = vmatpush3.bf16.msra.mxu1 %v9766_v47 }
 0x787   : > { %8700 = vmatprep.subr.bf16.mxu1 %v9767_v55 }
 0x78a   : > { %8701 = vmatpush3.bf16.msra.mxu1 %v9768_v53 }
 0x78b   : > { %8702 = vmatprep.subr.bf16.mxu1 %v9769_v33 }
 0x78e   : > { %8703 = vmatpush3.bf16.msra.mxu1 %v9770_v63  ;;  %v8611_v63 = vld [vmem:[#allocation20] ss:$0 sm:$0xff] }
 0x78f   : > { %8704 = vmatprep.subr.bf16.mxu1 %v9771_v50 }
 0x792   : > { %8705 = vmatpush3.bf16.msra.mxu1 %v9772_v57 }
 0x793   : > { %8706 = vmatprep.subr.bf16.mxu1 %v9773_v29 }
 0x796   : > { %8707 = vmatpush3.bf16.msra.mxu1 %v9774_v36 }
 0x797   : > { %8745 = vmatprep.subr.bf16.mxu1 %v10225_v37 }
 0x799   : > { %7388 = vmatmul.mubr.bf16.vlgmr.msra.gmra.mrb[32].mxu1 %v11712_v45 }
 0x79a   : > { %8746 = vmatpush3.bf16.msra.mxu1 %v9775_v60  ;;  %8761 = vmatprep.mubr.msk.bf16.mxu1 %vm10226_vm1, %v10225_v37 }
 0x79b   : > { %8747 = vmatprep.subr.bf16.mxu1 %v10225_v37 }
 0x79e   : > { %8748 = vmatpush3.bf16.msra.mxu1 %v9776_v0 }
 0x79f   : > { %8749 = vmatprep.subr.bf16.mxu1 %v10225_v37 }
 0x7a2   : > { %8750 = vmatpush3.bf16.msra.mxu1 %v9777_v6 }
 0x7a3   : > { %8751 = vmatprep.subr.bf16.mxu1 %v10225_v37 }
 0x7a6   : > { %8752 = vmatpush3.bf16.msra.mxu1 %v9778_v8 }
 0x7a7   : > { %8753 = vmatprep.subr.bf16.mxu1 %v10225_v37 }
 0x7aa   : > { %8754 = vmatpush3.bf16.msra.mxu1 %v9779_v24 }
 0x7ab   : > { %8755 = vmatprep.subr.bf16.mxu1 %v10225_v37 }
 0x7ae   : > { %8756 = vmatpush3.bf16.msra.mxu1 %v9780_v9 }
 0x7af   : > { %8757 = vmatprep.subr.bf16.mxu1 %v10225_v37 }
 0x7b2   : > { %8758 = vmatpush3.bf16.msra.mxu1 %v9781_v51 }
 0x7b3   : > { %8759 = vmatprep.subr.bf16.mxu1 %v10225_v37 }
 0x7b6   : > { %8760 = vmatpush3.bf16.msra.mxu1 %v9782_v34 }
 0x80c   : > { %v8642_v23 = vpop.f32.mrb[20].mxu1 }
 0x80d   : > { %v8643_v45 = vpop.f32.mrb[21].mxu1 }
 0x80e   : > { %v8644_v42 = vadd.f32 %v8643_v45, %v8642_v23  ;;  %v8645_v25 = vpop.f32.mrb[22].mxu1 }
 0x80f   : > { %v8646_v54 = vpop.f32.mrb[23].mxu1 }
 0x810   : > { %v8647_v15 = vadd.f32 %v8646_v54, %v8645_v25 }
 0x824   : > { %v8730_v43 = vpop.f32.mrb[40].mxu0 }
 0x825   : > { %v8731_v16 = vpop.f32.mrb[41].mxu0 }
 0x826   : > { %v8732_v39 = vadd.f32 %v8731_v16, %v8730_v43  ;;  %v8733_v40 = vpop.f32.mrb[42].mxu0 }
 0x827   : > { %v8734_v14 = vpop.f32.mrb[43].mxu0 }
 0x828   : > { %v8735_v26 = vadd.f32 %v8734_v14, %v8733_v40 }
 0x82c   : > { %v8664_v28 = vpop.f32.mrb[24].mxu1 }
 0x82d   : > { %v8665_v56 = vpop.f32.mrb[25].mxu1 }
 0x82e   : > { %v8666_v59 = vadd.f32 %v8665_v56, %v8664_v28  ;;  %v8667_v62 = vpop.f32.mrb[26].mxu1 }
 0x82f   : > { %v8668_v35 = vpop.f32.mrb[27].mxu1 }
 0x830   : > { %v7050_v22 = vadd.f32 %v8666_v59, %v8644_v42  ;;  %v8669_v7 = vadd.f32 %v8668_v35, %v8667_v62 }
 0x832   : > { %v7053_v3 = vadd.f32 %v8669_v7, %v8647_v15 }
 0x84c   : > { %v8686_v46 = vpop.f32.mrb[28].mxu1 }
 0x84d   : > { %v8687_v17 = vpop.f32.mrb[29].mxu1 }
 0x84e   : > { %v8688_v31 = vadd.f32 %v8687_v17, %v8686_v46  ;;  %v8689_v20 = vpop.f32.mrb[30].mxu1 }
 0x84f   : > { %v8690_v41 = vpop.f32.mrb[31].mxu1 }
 0x850   : > { %v7225_v32 = vadd.f32 %v8688_v31, %v7050_v22  ;;  %v8691_v27 = vadd.f32 %v8690_v41, %v8689_v20 }
 0x852   : > { %v7226_v61 = vadd.f32 %v8691_v27, %v7053_v3 }
 0x86c   : > { %v8708_v44 = vpop.f32.mrb[32].mxu1 }
 0x86d   : > { %v8709_v18 = vpop.f32.mrb[33].mxu1 }
 0x86e   : > { %v8710_v58 = vadd.f32 %v8709_v18, %v8708_v44  ;;  %v8711_v12 = vpop.f32.mrb[34].mxu1 }
 0x86f   : > { %v8712_v1 = vpop.f32.mrb[35].mxu1 }
 0x870   : > { %v7396_v2 = vadd.f32 %v8710_v58, %v7225_v32  ;;  %v8713_v4 = vadd.f32 %v8712_v1, %v8711_v12 }
 0x872   : > { %v7567_v11 = vadd.f32 %v8732_v39, %v7396_v2  ;;  %v7397_v19 = vadd.f32 %v8713_v4, %v7226_v61 }
 0x874   : > { %v7576_v5 = vadd.f32 %v8608_v48, %v7567_v11  ;;  %v7568_v10 = vadd.f32 %v8735_v26, %v7397_v19 }
 0x876   : > { %v8609_v13 = vmul.f32 -1.442695, %v7576_v5  ;;  %v7577_v38 = vadd.f32 %v8608_v48, %v7568_v10 }
 0x878   : > { %9783 = vpow2.f32 %v8609_v13  ;;  %v8610_v49 = vmul.f32 -1.442695, %v7577_v38 }
 0x87a   : > { %9785 = vpow2.f32 %v8610_v49 }
 0x882   : > { %v9784_v21 = vpop.eup %9783 }
 0x883   : > { %v7584_v52 = vadd.f32 1.0, %v9784_v21 }
 0x884   : > { %v9786_v30 = vpop.eup %9785 }
 0x885   : > { %v7585_v47 = vadd.f32 1.0, %v9786_v30  ;;  %9787 = vrcp.f32 %v7584_v52 }
 0x887   : > { %9789 = vrcp.f32 %v7585_v47 }
 0x88f   : > { %v9788_v55 = vpop.eup %9787 }
 0x891   : > { %v9790_v53 = vpop.eup %9789 }
 0x892   : > { %v7590_v33 = vpack.c.bf16 %v9790_v53, %v9788_v55 }
 0x894   : > { %8762 = vmatmul.mubr.bf16.vlgmr.msra.gmra.mrb[36].mxu1 %v7590_v33 }
 0x967   : > { %v7696_v50 = vpop.f32.mrb[36].mxu1 }
 0x968   : > { %v7697_v57 = vadd.f32 %v8611_v63, %v7696_v50  ;;  %v8763_v29 = vpop.f32.mrb[37].mxu1 }
 0x969   : > { %v7699_v36 = vpop.f32.mrb[38].mxu1 }
 0x96a   : > { %7703 = vmax.xlane.f32.xlu0 %v7697_v57  ;;  %v8764_v60 = vpop.f32.mrb[39].mxu1  ;;  %v7700_v37 = vadd.f32 %v8611_v63, %v7699_v36 }
 0x96e   : > { %7705 = vmax.xlane.f32.xlu0 %v7700_v37 }
 0x9f7   : > { %v7704_v0 = vpop.xlane.xlu0 %7703 }
 0x9f8   : > { %v7707_v6 = vsub.f32 %v7697_v57, %v7704_v0 }
 0x9fa   : > { %v7709_v8 = vmul.f32 1.442695, %v7707_v6 }
 0x9fb   : > { %v7706_v24 = vpop.xlane.xlu0 %7705 }
 0x9fc   : > { %9791 = vpow2.f32 %v7709_v8  ;;  %v7708_v9 = vsub.f32 %v7700_v37, %v7706_v24 }
 0x9fe   : > { %v7711_v51 = vmul.f32 1.442695, %v7708_v9 }
 0xa00   : > { %9793 = vpow2.f32 %v7711_v51 }
 0xa06   : > { %v9792_v23 = vpop.eup %9791 }
 0xa07   : > { %7713 = vadd.xlane.f32.xlu1 %v9792_v23 }
 0xa0a   : > { %v9794_v45 = vpop.eup %9793 }
 0xa0b   : > { %7715 = vadd.xlane.f32.xlu1 %v9794_v45 }
 0xa94   : > { %v7714_v34 = vpop.xlane.xlu1 %7713 }
 0xa95   : > { %9795 = vrcp.f32 %v7714_v34 }
 0xa98   : > { %v7716_v42 = vpop.xlane.xlu1 %7715 }
 0xa99   : > { %9797 = vrcp.f32 %v7716_v42 }
 0xa9f   : > { %v9796_v25 = vpop.eup %9795 }
 0xaa0   : > { %v7718_v54 = vmul.f32 %v9796_v25, %v9792_v23 }
 0xaa2   : > { %7722 = vst.msk [vmem:[%s11822_s4] sm:$0xff] %vm7721_vm2, %v7718_v54 }
 0xaa3   : > { %v9798_v15 = vpop.eup %9797 }
 0xaa4   : > { %v7720_v43 = vmul.f32 %v9798_v15, %v9794_v45 }
 0xaa6   : > { %7723 = vst.msk [vmem:[%s11822_s4 + $0x8] sm:$0xff] %vm7721_vm2, %v7720_v43 }
 0xaa7 PF: > { %s11823_s28 = sld [smem:[#allocation29_spill]]  ;;  %s11824_s27 = sld [smem:[#allocation31_spill]] }
 0xaa8   : > { %p31_p11 = scmp.ge.s32.totalorder %s10439_s3, 6   ;;  %s11825_s25 = smov %s10192_s26 }
 0xaaa   :  { %33 = sbr.rel (!%p31_p11) target bundleno = 19 (0x13), region = 176 }
 0xaad   : > { %s11826_s26 = smov %s11823_s28  ;;  %s11827_s28 = smov %s10439_s3 }
 0xab1   :  { %7735 = vsyncpa [#allocation4], 1 }
 0xab2   :  { %7737 = vsyncpa [#allocation4 + $0x1], 1 }
 0xab3   :  { %7738 = vsyncpa [#allocation6], 1 }
 0xab4   :  { %7740 = vsyncpa [#allocation6 + $0x1], 1 }
 0xab5   :  { %7741 = vsyncpa [#allocation9], 1 }
 0xab6   :  { %7742 = vsyncpa [#allocation12], 1 }
 0xab7   :  { %7743 = vsyncpa [#allocation15], 1 }
 0xab8   :  { %7744 = vsyncpa [#allocation18], 1 }
 0xab9   :  { %7745 = vsyncpa [#allocation21], 1 }

</bundles_post_ra>
